<compile_context>
chip_gen: v7x
topology: tpu7x:2x2x1
jax: 0.10.0
libtpu: 0.0.40
codegen_flags: <defaults>
</compile_context>

<pallas_src>
import functools

import jax
import jax.numpy as jnp
from jax.experimental import pallas as pl
from jax.experimental.pallas import tpu as pltpu


# --------------------------------------------------------------------------- kernels

def _prop1_kernel(adj_ref, xaug_ref, w1_ref, w2_ref, b2_ref, h2_ref, acc_ref):
    """H2_tile = relu((adj_tile @ [x|1]) @ [W1^T; b1]) @ W2^T + b2, adj K-blocked."""
    k = pl.program_id(1)

    @pl.when(k == 0)
    def _init():
        acc_ref[...] = jnp.zeros_like(acc_ref)

    acc_ref[...] += jnp.dot(adj_ref[...], xaug_ref[...],
                            preferred_element_type=jnp.float32)

    @pl.when(k == pl.num_programs(1) - 1)
    def _finalize():
        z1 = jnp.maximum(
            jnp.dot(acc_ref[...].astype(w1_ref.dtype), w1_ref[...],
                    preferred_element_type=jnp.float32), 0.0)
        h2 = jnp.dot(z1.astype(w2_ref.dtype), w2_ref[...],
                     preferred_element_type=jnp.float32) + b2_ref[...]
        h2_ref[...] = h2.astype(h2_ref.dtype)


def _prop2_readout_kernel(idx_ref, adj_ref, h2_ref, w3_ref, b3_ref, w4_ref, b4_ref,
                          out_ref, acc_ref, zg_ref):
    """Z2_tile = relu(adj_tile @ H2) (K-blocked), pooled into zG, then fc3/fc4/log_softmax."""
    i = pl.program_id(0)
    k = pl.program_id(1)
    last_i = pl.num_programs(0) - 1
    last_k = pl.num_programs(1) - 1

    @pl.when(jnp.logical_and(i == 0, k == 0))
    def _init_zg():
        zg_ref[...] = jnp.zeros_like(zg_ref)

    @pl.when(k == 0)
    def _init_acc():
        acc_ref[...] = jnp.zeros_like(acc_ref)

    acc_ref[...] += jnp.dot(adj_ref[...], h2_ref[...],
                            preferred_element_type=jnp.float32)

    @pl.when(k == last_k)
    def _pool():
        z2 = jnp.maximum(acc_ref[...], 0.0)                      # (TM, H2p) f32
        n_graphs, tile_rows = zg_ref.shape[0], z2.shape[0]
        gids = jax.lax.broadcasted_iota(jnp.int32, (n_graphs, tile_rows), 0)
        # One-hot built per row tile (never a full (G, N) matrix). Nodes with idx outside
        # [0, n_graphs) contribute nothing (torch.scatter_add_ would be OOB there).
        onehot = (gids == idx_ref[...]).astype(jnp.float32)
        zg_ref[...] += jnp.dot(onehot, z2, preferred_element_type=jnp.float32)

    @pl.when(jnp.logical_and(i == last_i, k == last_k))
    def _head():
        zg = zg_ref[...]
        h3 = jnp.dot(zg.astype(w3_ref.dtype), w3_ref[...],
                     preferred_element_type=jnp.float32) + b3_ref[...]
        h3 = jnp.maximum(h3, 0.0)
        logits = jnp.dot(h3.astype(w4_ref.dtype), w4_ref[...],
                         preferred_element_type=jnp.float32) + b4_ref[...]
        m = jnp.max(logits, axis=1, keepdims=True)
        s = logits - m
        out_ref[...] = s - jnp.log(jnp.sum(jnp.exp(s), axis=1, keepdims=True))


# --------------------------------------------------------------------------- helpers

def _pad_dim(a, axis, mult):
    """Zero-pad `axis` of `a` up to the next multiple of `mult` (at least `mult`)."""
    size = a.shape[axis]
    target = max(mult, ((size + mult - 1) // mult) * mult)
    if target == size:
        return a
    widths = [(0, 0)] * a.ndim
    widths[axis] = (0, target - size)
    return jnp.pad(a, widths)


def _vmem_budget_bytes():
    """0.75 * physical per-core VMEM (leaves headroom on v7x's 64 MiB; ~96 MiB on v5e/v6e)."""
    try:
        cap = int(pltpu.get_tpu_info().vmem_capacity_bytes)
    except Exception:
        cap = 64 << 20   # conservative fallback (v7x per-TC physical VMEM)
    return max(32 << 20, int(0.75 * cap))


def _pick_tiles(n_pad, per_step_bytes, budget, row_tile, col_tile):
    cands = [t for t in (512, 384, 256, 128) if t <= n_pad and n_pad % t == 0]
    if not cands:
        cands = [n_pad]
    tms = [row_tile] if row_tile is not None else cands
    tks = [col_tile] if col_tile is not None else cands
    for tm in tms:            # prefer the biggest row tile that fits VMEM
        for tk in tks:
            if per_step_bytes(tm, tk) <= budget:
                return tm, tk
    return tms[-1], tks[-1]


# --------------------------------------------------------------------------- wrapper

@functools.partial(jax.jit,
                   static_argnames=("n_graphs", "compute_dtype", "row_tile", "col_tile"))
def gnn_forward(x_in, adj, idx, params, n_graphs, *,
                compute_dtype=jnp.bfloat16, row_tile=None, col_tile=None):
    """Pallas implementation of GNN.forward(x_in, adj, idx).

    compute_dtype: dtype of the MXU matmul operands (float32 or bfloat16). Accumulation,
    bias adds, ReLU, pooling and log_softmax are always float32.
    """
    w1, b1, w2, b2, w3, b3, w4, b4 = params
    n, _ = x_in.shape
    n_class = w4.shape[0]
    cdt = jnp.dtype(compute_dtype)
    isz = cdt.itemsize

    # ---- glue / zero padding (exact: padded rows/cols contribute nothing) -----------
    # fc1 folded into propagation 1: relu(adj @ (x W1^T + b1)) == relu((adj @ [x|1]) @ [W1^T; b1]).
    xaug = jnp.concatenate([x_in, jnp.ones((n, 1), x_in.dtype)], axis=1)       # (n, f+1)
    w1aug = jnp.concatenate([w1.T, b1.reshape(1, -1)], axis=0)                 # (f+1, h1)

    xaug_p = _pad_dim(_pad_dim(xaug, 1, 128), 0, 128).astype(cdt)              # (n_pad, fp)
    w1aug_p = _pad_dim(_pad_dim(w1aug, 0, 128), 1, 128).astype(cdt)            # (fp, h1p)
    w2t_p = _pad_dim(_pad_dim(w2.T, 0, 128), 1, 128).astype(cdt)               # (h1p, h2p)
    w3t_p = _pad_dim(_pad_dim(w3.T, 0, 128), 1, 128).astype(cdt)               # (h2p, h3p)
    w4t_p = _pad_dim(w4.T, 0, 128).astype(cdt)                                 # (h3p, n_class)
    b2_p = _pad_dim(b2.reshape(1, -1), 1, 128).astype(jnp.float32)             # (1, h2p)
    b3_p = _pad_dim(b3.reshape(1, -1), 1, 128).astype(jnp.float32)             # (1, h3p)
    b4_p = b4.reshape(1, -1).astype(jnp.float32)                               # (1, n_class)

    adj_p = _pad_dim(_pad_dim(adj, 0, 128), 1, 128).astype(cdt)                # (n_pad, n_pad)
    idx_p = _pad_dim(idx.astype(jnp.int32).reshape(1, -1), 1, 128)             # (1, n_pad)

    n_pad, fp = xaug_p.shape
    h1p, h2p, h3p = w1aug_p.shape[1], w2t_p.shape[1], w3t_p.shape[1]

    if row_tile is not None:
        assert row_tile % 128 == 0 and n_pad % row_tile == 0, "row_tile must divide padded N"
    if col_tile is not None:
        assert col_tile % 128 == 0 and n_pad % col_tile == 0, "col_tile must divide padded N"

    # ---- tile selection & VMEM budget -------------------------------------------------
    budget = _vmem_budget_bytes()

    def per_step_bytes(tm, tk):
        wts1 = 2 * (fp * h1p + h1p * h2p + h2p) * isz
        prop1 = (2 * tm * tk * isz + 2 * tk * fp * isz + wts1
                 + 2 * tm * h2p * isz + tm * fp * 4)
        wts2 = 2 * (h2p * h3p + h3p + h3p * n_class + n_class) * isz
        prop2 = (2 * tm * tk * isz + 2 * tk * h2p * isz + wts2 + 2 * tm * 4
                 + 2 * n_graphs * n_class * 4 + tm * h2p * 4 + n_graphs * h2p * 4)
        return max(prop1, prop2) + (4 << 20)

    tm, tk = _pick_tiles(n_pad, per_step_bytes, budget, row_tile, col_tile)
    grid = (n_pad // tm, n_pad // tk)          # (row tiles "parallel", adj-column reduction last)
    vmem_lim = int(min(max(per_step_bytes(tm, tk), 16 << 20), budget))

    def cparams(semantics):
        return pltpu.CompilerParams(dimension_semantics=semantics,
                                    vmem_limit_bytes=vmem_lim)

    nbytes = lambda *arrs: int(sum(int(a.size) * a.dtype.itemsize for a in arrs))

    # ---- kernel 1: H2 = relu((adj @ [x|1]) @ [W1^T; b1]) @ W2^T + b2 -------------------
    h2 = pl.pallas_call(
        _prop1_kernel,
        out_shape=jax.ShapeDtypeStruct((n_pad, h2p), cdt),
        grid_spec=pltpu.PrefetchScalarGridSpec(
            num_scalar_prefetch=0, grid=grid,
            in_specs=[
                pl.BlockSpec((tm, tk), lambda i, k: (i, k)),       # adj tile (streamed, K-blocked)
                pl.BlockSpec((tk, fp), lambda i, k: (k, 0)),       # [x|1] K-block
                pl.BlockSpec((fp, h1p), lambda i, k: (0, 0)),      # [W1^T; b1] (grid-invariant)
                pl.BlockSpec((h1p, h2p), lambda i, k: (0, 0)),     # W2^T
                pl.BlockSpec((1, h2p), lambda i, k: (0, 0)),       # b2
            ],
            out_specs=pl.BlockSpec((tm, h2p), lambda i, k: (i, 0)),
            scratch_shapes=[pltpu.VMEM((tm, fp), jnp.float32)]),   # adj @ [x|1] accumulator
        compiler_params=cparams(("parallel", "arbitrary")),
        cost_estimate=pl.CostEstimate(
            flops=2 * n_pad * n_pad * fp + 2 * n_pad * (fp * h1p + h1p * h2p),
            transcendentals=0,
            bytes_accessed=nbytes(adj_p, w1aug_p, w2t_p, b2_p)
            + (n_pad // tm) * n_pad * fp * isz + n_pad * h2p * isz),
    )(adj_p, xaug_p, w1aug_p, w2t_p, b2_p)

    # ---- kernel 2: Z2 = relu(adj @ H2); zG = scatter_add; fc3/relu/fc4; log_softmax ----
    out = pl.pallas_call(
        _prop2_readout_kernel,
        out_shape=jax.ShapeDtypeStruct((n_graphs, n_class), jnp.float32),
        grid_spec=pltpu.PrefetchScalarGridSpec(
            num_scalar_prefetch=0, grid=grid,
            in_specs=[
                pl.BlockSpec((1, tm), lambda i, k: (0, i)),        # idx row tile
                pl.BlockSpec((tm, tk), lambda i, k: (i, k)),       # adj tile
                pl.BlockSpec((tk, h2p), lambda i, k: (k, 0)),      # H2 K-block
                pl.BlockSpec((h2p, h3p), lambda i, k: (0, 0)),     # W3^T
                pl.BlockSpec((1, h3p), lambda i, k: (0, 0)),       # b3
                pl.BlockSpec((h3p, n_class), lambda i, k: (0, 0)), # W4^T
                pl.BlockSpec((1, n_class), lambda i, k: (0, 0)),   # b4
            ],
            out_specs=pl.BlockSpec((n_graphs, n_class), lambda i, k: (0, 0)),
            scratch_shapes=[pltpu.VMEM((tm, h2p), jnp.float32),        # adj @ H2 accumulator
                            pltpu.VMEM((n_graphs, h2p), jnp.float32)]),# zG accumulator
        compiler_params=cparams(("arbitrary", "arbitrary")),       # zG/out resident over both axes
        cost_estimate=pl.CostEstimate(
            flops=2 * n_pad * n_pad * h2p
            + 2 * n_graphs * (n_pad * h2p + h2p * h3p + h3p * n_class),
            transcendentals=n_graphs * (n_class + 1),
            bytes_accessed=nbytes(adj_p, idx_p, w3t_p, w4t_p)
            + (n_pad // tm) * n_pad * h2p * isz + n_graphs * n_class * 4),
    )(idx_p, adj_p, h2, w3t_p, b3_p, w4t_p, b4_p)
    return out


# --------------------------------------------------------------------------- references

def _reference_forward(x_in, adj, idx, params, n_graphs):
    """Pure-JAX float32 reference mirroring the PyTorch module exactly."""
    w1, b1, w2, b2, w3, b3, w4, b4 = params
    z1 = jax.nn.relu(adj @ (x_in @ w1.T + b1))
    z2 = jax.nn.relu(adj @ (z1 @ w2.T + b2))
    zg = jnp.zeros((n_graphs, z2.shape[1]), jnp.float32).at[idx].add(z2)
    out = jax.nn.relu(zg @ w3.T + b3) @ w4.T + b4
    return jax.nn.log_softmax(out, axis=1)


def _structured_reference(x_in, adj, idx, params, n_graphs, compute_dtype):
    """Pure-JAX reference with the same cast points as the kernels (compute_dtype MXU
    operands, float32 accumulation / elementwise / pooling)."""
    w1, b1, w2, b2, w3, b3, w4, b4 = params
    cdt = jnp.dtype(compute_dtype)
    dot = lambda a, b: jnp.dot(a.astype(cdt), b.astype(cdt),
                               preferred_element_type=jnp.float32)
    xaug = jnp.concatenate([x_in, jnp.ones((x_in.shape[0], 1), x_in.dtype)], axis=1)
    w1aug = jnp.concatenate([w1.T, b1.reshape(1, -1)], axis=0)
    a1 = dot(adj, xaug)
    z1 = jax.nn.relu(dot(a1, w1aug))
    h2 = (dot(z1, w2.T) + b2).astype(cdt)
    z2 = jax.nn.relu(dot(adj, h2))
    onehot = (jnp.arange(n_graphs, dtype=jnp.int32)[:, None] ==
              idx.astype(jnp.int32)[None, :]).astype(jnp.float32)
    zg = jnp.dot(onehot, z2, preferred_element_type=jnp.float32)
    h3 = jax.nn.relu(dot(zg, w3.T) + b3)
    logits = dot(h3, w4.T) + b4
    return jax.nn.log_softmax(logits, axis=1)


if __name__ == "__main__":
    # Small shapes: 512 nodes over 8 graphs of 64 nodes each.
    N = 512
    input_dim = 16
    hidden_dim_1 = 32
    hidden_dim_2 = 32
    hidden_dim_3 = 32
    n_class = 4
    n_graphs = 8          # static in JAX (the torch code derives it as idx.max()+1 at runtime)

    key = jax.random.PRNGKey(0)
    ks = jax.random.split(key, 10)

    def linear_params(kw, kb, fan_in, fan_out):
        bound = 1.0 / jnp.sqrt(fan_in)
        w = jax.random.uniform(kw, (fan_out, fan_in), jnp.float32, -bound, bound)
        b = jax.random.uniform(kb, (fan_out,), jnp.float32, -bound, bound)
        return w, b

    w1, b1 = linear_params(ks[0], ks[1], input_dim, hidden_dim_1)
    w2, b2 = linear_params(ks[2], ks[3], hidden_dim_1, hidden_dim_2)
    w3, b3 = linear_params(ks[4], ks[5], hidden_dim_2, hidden_dim_3)
    w4, b4 = linear_params(ks[6], ks[7], hidden_dim_3, n_class)
    params = (w1, b1, w2, b2, w3, b3, w4, b4)

    # Node features, sparse symmetric adjacency with self-loops, row-normalized (GCN-style).
    x_in = jax.random.normal(ks[8], (N, input_dim), jnp.float32)
    a = (jax.random.uniform(ks[9], (N, N)) < 0.02).astype(jnp.float32)
    a = jnp.maximum(a, a.T) + jnp.eye(N, dtype=jnp.float32)
    adj = a / jnp.sum(a, axis=1, keepdims=True)
    idx = jnp.repeat(jnp.arange(n_graphs, dtype=jnp.int32), N // n_graphs)

    ref_f32 = _reference_forward(x_in, adj, idx, params, n_graphs)

    # float32 path, default (largest) tiles: must match the PyTorch-equivalent reference.
    out_f32 = gnn_forward(x_in, adj, idx, params, n_graphs, compute_dtype=jnp.float32)
    jax.block_until_ready(out_f32)
    assert out_f32.shape == (n_graphs, n_class)
    assert jnp.allclose(out_f32, ref_f32, atol=5e-4, rtol=5e-4), "f32 mismatch"

    # float32 path with small tiles: exercises the K-blocked adj accumulation and the
    # multi-row-tile pooling / zG accumulation path.
    out_f32_t = gnn_forward(x_in, adj, idx, params, n_graphs,
                            compute_dtype=jnp.float32, row_tile=128, col_tile=128)
    jax.block_until_ready(out_f32_t)
    assert jnp.allclose(out_f32_t, ref_f32, atol=5e-4, rtol=5e-4), "tiled f32 mismatch"

    # bfloat16 MXU operands (default), f32 accumulation: checked against a reference with
    # identical cast points (kernel correctness) AND loosely against the full-f32 reference
    # (honest end-to-end quantization bound for the row-normalized adjacency).
    out_bf16 = gnn_forward(x_in, adj, idx, params, n_graphs)    # default compute_dtype=bf16
    jax.block_until_ready(out_bf16)
    ref_bf16 = _structured_reference(x_in, adj, idx, params, n_graphs, jnp.bfloat16)
    assert jnp.allclose(out_bf16, ref_bf16, atol=5e-3, rtol=5e-3), "bf16 mismatch"
    assert float(jnp.max(jnp.abs(out_bf16 - ref_f32))) < 2e-1, "bf16 quantization error too large"

    print("KERNEL_OK")
</pallas_src>

<mosaic_0001>
module attributes {stable_mosaic.version = 11 : i64} {
  func.func @_prop1_kernel(%arg0: i32, %arg1: i32, %arg2: memref<512x512xf32, #tpu.memory_space<vmem>>, %arg3: memref<512x128xf32, #tpu.memory_space<vmem>>, %arg4: memref<128x128xf32, #tpu.memory_space<vmem>>, %arg5: memref<128x128xf32, #tpu.memory_space<vmem>>, %arg6: memref<1x128xf32, #tpu.memory_space<vmem>>, %arg7: memref<512x128xf32, #tpu.memory_space<vmem>>, %arg8: memref<512x128xf32, #tpu.memory_space<vmem>>) attributes {dimension_semantics = [#tpu.dimension_semantics<parallel>, #tpu.dimension_semantics<arbitrary>], iteration_bounds = array<i64: 1, 1>, scalar_prefetch = 0 : i64, scratch_operands = 1 : i64, tpu.core_type = #tpu.core_type<tc>, window_params = [{transform_indices = @transform_0, window_bounds = array<i64: 512, 512>}, {transform_indices = @transform_1, window_bounds = array<i64: 512, 128>}, {pipeline_mode = #tpu.pipeline_mode<synchronous>, transform_indices = @transform_2, window_bounds = array<i64: 128, 128>}, {pipeline_mode = #tpu.pipeline_mode<synchronous>, transform_indices = @transform_3, window_bounds = array<i64: 128, 128>}, {pipeline_mode = #tpu.pipeline_mode<synchronous>, transform_indices = @transform_4, window_bounds = array<i64: 1, 128>}, {transform_indices = @transform_5, window_bounds = array<i64: 512, 128>}]} {
    %c0_i32 = arith.constant 0 : i32
    %0 = arith.cmpi eq, %arg1, %c0_i32 : i32
    %1 = arith.extui %0 : i1 to i32
    %c0_i32_0 = arith.constant 0 : i32
    %2 = arith.cmpi ne, %1, %c0_i32_0 : i32
    scf.if %2 {
      %cst_10 = arith.constant 0.000000e+00 : f32
      %12 = vector.broadcast %cst_10 : f32 to vector<512x128xf32>
      %c0_11 = arith.constant 0 : index
      %c0_12 = arith.constant 0 : index
      %13 = vector.load %arg8[%c0_11, %c0_12] : memref<512x128xf32, #tpu.memory_space<vmem>>, vector<512x128xf32>
      tpu.vector_store %arg8[%c0_11, %c0_12], %12 {strides = array<i32>} : memref<512x128xf32, #tpu.memory_space<vmem>>, vector<512x128xf32>,
    } else {
    }
    %c0 = arith.constant 0 : index
    %c0_1 = arith.constant 0 : index
    %3 = vector.load %arg8[%c0, %c0_1] : memref<512x128xf32, #tpu.memory_space<vmem>>, vector<512x128xf32>
    %c0_2 = arith.constant 0 : index
    %c0_3 = arith.constant 0 : index
    %4 = vector.load %arg2[%c0_2, %c0_3] : memref<512x512xf32, #tpu.memory_space<vmem>>, vector<512x512xf32>
    %c0_4 = arith.constant 0 : index
    %c0_5 = arith.constant 0 : index
    %5 = vector.load %arg3[%c0_4, %c0_5] : memref<512x128xf32, #tpu.memory_space<vmem>>, vector<512x128xf32>
    %cst = arith.constant dense<0.000000e+00> : vector<512x128xf32>
    %6 = tpu.matmul %4, %5, %cst {dimension_numbers = #tpu.dot_dimension_numbers<[1], [0], [0], [1], [0, 0, 1, 1], [], []>} : vector<512x512xf32>, vector<512x128xf32>, vector<512x128xf32> -> vector<512x128xf32>
    %7 = arith.addf %3, %6 : vector<512x128xf32>
    %c0_6 = arith.constant 0 : index
    %c0_7 = arith.constant 0 : index
    %8 = vector.load %arg8[%c0_6, %c0_7] : memref<512x128xf32, #tpu.memory_space<vmem>>, vector<512x128xf32>
    tpu.vector_store %arg8[%c0_6, %c0_7], %7 {strides = array<i32>} : memref<512x128xf32, #tpu.memory_space<vmem>>, vector<512x128xf32>,
    %c0_i32_8 = arith.constant 0 : i32
    %9 = arith.cmpi eq, %arg1, %c0_i32_8 : i32
    %10 = arith.extui %9 : i1 to i32
    %c0_i32_9 = arith.constant 0 : i32
    %11 = arith.cmpi ne, %10, %c0_i32_9 : i32
    scf.if %11 {
      %c0_10 = arith.constant 0 : index
      %c0_11 = arith.constant 0 : index
      %12 = vector.load %arg8[%c0_10, %c0_11] : memref<512x128xf32, #tpu.memory_space<vmem>>, vector<512x128xf32>
      %c0_12 = arith.constant 0 : index
      %c0_13 = arith.constant 0 : index
      %13 = vector.load %arg4[%c0_12, %c0_13] : memref<128x128xf32, #tpu.memory_space<vmem>>, vector<128x128xf32>
      %cst_14 = arith.constant dense<0.000000e+00> : vector<512x128xf32>
      %14 = tpu.matmul %12, %13, %cst_14 {dimension_numbers = #tpu.dot_dimension_numbers<[1], [0], [0], [1], [0, 0, 1, 1], [], []>} : vector<512x128xf32>, vector<128x128xf32>, vector<512x128xf32> -> vector<512x128xf32>
      %cst_15 = arith.constant 0.000000e+00 : f32
      %15 = vector.broadcast %cst_15 : f32 to vector<512x128xf32>
      %16 = arith.maximumf %14, %15 : vector<512x128xf32>
      %c0_16 = arith.constant 0 : index
      %c0_17 = arith.constant 0 : index
      %17 = vector.load %arg5[%c0_16, %c0_17] : memref<128x128xf32, #tpu.memory_space<vmem>>, vector<128x128xf32>
      %cst_18 = arith.constant dense<0.000000e+00> : vector<512x128xf32>
      %18 = tpu.matmul %16, %17, %cst_18 {dimension_numbers = #tpu.dot_dimension_numbers<[1], [0], [0], [1], [0, 0, 1, 1], [], []>} : vector<512x128xf32>, vector<128x128xf32>, vector<512x128xf32> -> vector<512x128xf32>
      %c0_19 = arith.constant 0 : index
      %c0_20 = arith.constant 0 : index
      %19 = vector.load %arg6[%c0_19, %c0_20] : memref<1x128xf32, #tpu.memory_space<vmem>>, vector<1x128xf32>
      %20 = vector.broadcast %19 : vector<1x128xf32> to vector<512x128xf32>
      %21 = arith.addf %18, %20 : vector<512x128xf32>
      %c0_21 = arith.constant 0 : index
      %c0_22 = arith.constant 0 : index
      %22 = vector.load %arg7[%c0_21, %c0_22] : memref<512x128xf32, #tpu.memory_space<vmem>>, vector<512x128xf32>
      tpu.vector_store %arg7[%c0_21, %c0_22], %21 {strides = array<i32>} : memref<512x128xf32, #tpu.memory_space<vmem>>, vector<512x128xf32>,
    } else {
    }
    return
  }
  func.func @transform_0(%arg0: i32, %arg1: i32) -> (i32, i32) {
    %c0_i32 = arith.constant 0 : i32
    return %arg0, %arg1 : i32, i32
  }
  func.func @transform_1(%arg0: i32, %arg1: i32) -> (i32, i32) {
    %c0_i32 = arith.constant 0 : i32
    %c0_i32_0 = arith.constant 0 : i32
    return %arg1, %c0_i32 : i32, i32
  }
  func.func @transform_2(%arg0: i32, %arg1: i32) -> (i32, i32) {
    %c0_i32 = arith.constant 0 : i32
    %c0_i32_0 = arith.constant 0 : i32
    %c0_i32_1 = arith.constant 0 : i32
    return %c0_i32, %c0_i32_0 : i32, i32
  }
  func.func @transform_3(%arg0: i32, %arg1: i32) -> (i32, i32) {
    %c0_i32 = arith.constant 0 : i32
    %c0_i32_0 = arith.constant 0 : i32
    %c0_i32_1 = arith.constant 0 : i32
    return %c0_i32, %c0_i32_0 : i32, i32
  }
  func.func @transform_4(%arg0: i32, %arg1: i32) -> (i32, i32) {
    %c0_i32 = arith.constant 0 : i32
    %c0_i32_0 = arith.constant 0 : i32
    %c0_i32_1 = arith.constant 0 : i32
    return %c0_i32, %c0_i32_0 : i32, i32
  }
  func.func @transform_5(%arg0: i32, %arg1: i32) -> (i32, i32) {
    %c0_i32 = arith.constant 0 : i32
    %c0_i32_0 = arith.constant 0 : i32
    return %arg0, %c0_i32 : i32, i32
  }
}

module attributes {stable_mosaic.version = 11 : i64} {
  func.func @_prop2_readout_kernel(%arg0: i32, %arg1: i32, %arg2: memref<1x512xi32, #tpu.memory_space<vmem>>, %arg3: memref<512x512xf32, #tpu.memory_space<vmem>>, %arg4: memref<512x128xf32, #tpu.memory_space<vmem>>, %arg5: memref<128x128xf32, #tpu.memory_space<vmem>>, %arg6: memref<1x128xf32, #tpu.memory_space<vmem>>, %arg7: memref<128x4xf32, #tpu.memory_space<vmem>>, %arg8: memref<1x4xf32, #tpu.memory_space<vmem>>, %arg9: memref<8x4xf32, #tpu.memory_space<vmem>>, %arg10: memref<512x128xf32, #tpu.memory_space<vmem>>, %arg11: memref<8x128xf32, #tpu.memory_space<vmem>>) attributes {dimension_semantics = [#tpu.dimension_semantics<arbitrary>, #tpu.dimension_semantics<arbitrary>], iteration_bounds = array<i64: 1, 1>, scalar_prefetch = 0 : i64, scratch_operands = 2 : i64, tpu.core_type = #tpu.core_type<tc>, window_params = [{transform_indices = @transform_0, window_bounds = array<i64: 1, 512>}, {transform_indices = @transform_1, window_bounds = array<i64: 512, 512>}, {transform_indices = @transform_2, window_bounds = array<i64: 512, 128>}, {pipeline_mode = #tpu.pipeline_mode<synchronous>, transform_indices = @transform_3, window_bounds = array<i64: 128, 128>}, {pipeline_mode = #tpu.pipeline_mode<synchronous>, transform_indices = @transform_4, window_bounds = array<i64: 1, 128>}, {pipeline_mode = #tpu.pipeline_mode<synchronous>, transform_indices = @transform_5, window_bounds = array<i64: 128, 4>}, {pipeline_mode = #tpu.pipeline_mode<synchronous>, transform_indices = @transform_6, window_bounds = array<i64: 1, 4>}, {pipeline_mode = #tpu.pipeline_mode<synchronous>, transform_indices = @transform_7, window_bounds = array<i64: 8, 4>}]} {
    %c0_i32 = arith.constant 0 : i32
    %0 = arith.cmpi eq, %arg0, %c0_i32 : i32
    %c0_i32_0 = arith.constant 0 : i32
    %1 = arith.cmpi eq, %arg1, %c0_i32_0 : i32
    %2 = arith.andi %0, %1 : i1
    %3 = arith.extui %2 : i1 to i32
    %c0_i32_1 = arith.constant 0 : i32
    %4 = arith.cmpi ne, %3, %c0_i32_1 : i32
    scf.if %4 {
      %cst_16 = arith.constant 0.000000e+00 : f32
      %22 = vector.broadcast %cst_16 : f32 to vector<8x128xf32>
      %c0_17 = arith.constant 0 : index
      %c0_18 = arith.constant 0 : index
      %23 = vector.load %arg11[%c0_17, %c0_18] : memref<8x128xf32, #tpu.memory_space<vmem>>, vector<8x128xf32>
      tpu.vector_store %arg11[%c0_17, %c0_18], %22 {strides = array<i32>} : memref<8x128xf32, #tpu.memory_space<vmem>>, vector<8x128xf32>,
    } else {
    }
    %c0_i32_2 = arith.constant 0 : i32
    %5 = arith.cmpi eq, %arg1, %c0_i32_2 : i32
    %6 = arith.extui %5 : i1 to i32
    %c0_i32_3 = arith.constant 0 : i32
    %7 = arith.cmpi ne, %6, %c0_i32_3 : i32
    scf.if %7 {
      %cst_16 = arith.constant 0.000000e+00 : f32
      %22 = vector.broadcast %cst_16 : f32 to vector<512x128xf32>
      %c0_17 = arith.constant 0 : index
      %c0_18 = arith.constant 0 : index
      %23 = vector.load %arg10[%c0_17, %c0_18] : memref<512x128xf32, #tpu.memory_space<vmem>>, vector<512x128xf32>
      tpu.vector_store %arg10[%c0_17, %c0_18], %22 {strides = array<i32>} : memref<512x128xf32, #tpu.memory_space<vmem>>, vector<512x128xf32>,
    } else {
    }
    %c0 = arith.constant 0 : index
    %c0_4 = arith.constant 0 : index
    %8 = vector.load %arg10[%c0, %c0_4] : memref<512x128xf32, #tpu.memory_space<vmem>>, vector<512x128xf32>
    %c0_5 = arith.constant 0 : index
    %c0_6 = arith.constant 0 : index
    %9 = vector.load %arg3[%c0_5, %c0_6] : memref<512x512xf32, #tpu.memory_space<vmem>>, vector<512x512xf32>
    %c0_7 = arith.constant 0 : index
    %c0_8 = arith.constant 0 : index
    %10 = vector.load %arg4[%c0_7, %c0_8] : memref<512x128xf32, #tpu.memory_space<vmem>>, vector<512x128xf32>
    %cst = arith.constant dense<0.000000e+00> : vector<512x128xf32>
    %11 = tpu.matmul %9, %10, %cst {dimension_numbers = #tpu.dot_dimension_numbers<[1], [0], [0], [1], [0, 0, 1, 1], [], []>} : vector<512x512xf32>, vector<512x128xf32>, vector<512x128xf32> -> vector<512x128xf32>
    %12 = arith.addf %8, %11 : vector<512x128xf32>
    %c0_9 = arith.constant 0 : index
    %c0_10 = arith.constant 0 : index
    %13 = vector.load %arg10[%c0_9, %c0_10] : memref<512x128xf32, #tpu.memory_space<vmem>>, vector<512x128xf32>
    tpu.vector_store %arg10[%c0_9, %c0_10], %12 {strides = array<i32>} : memref<512x128xf32, #tpu.memory_space<vmem>>, vector<512x128xf32>,
    %c0_i32_11 = arith.constant 0 : i32
    %14 = arith.cmpi eq, %arg1, %c0_i32_11 : i32
    %15 = arith.extui %14 : i1 to i32
    %c0_i32_12 = arith.constant 0 : i32
    %16 = arith.cmpi ne, %15, %c0_i32_12 : i32
    scf.if %16 {
      %c0_16 = arith.constant 0 : index
      %c0_17 = arith.constant 0 : index
      %22 = vector.load %arg10[%c0_16, %c0_17] : memref<512x128xf32, #tpu.memory_space<vmem>>, vector<512x128xf32>
      %cst_18 = arith.constant 0.000000e+00 : f32
      %23 = vector.broadcast %cst_18 : f32 to vector<512x128xf32>
      %24 = arith.maximumf %22, %23 : vector<512x128xf32>
      %25 = tpu.iota {dimensions = array<i32: 0>} : vector<8x512xi32>
      %c0_19 = arith.constant 0 : index
      %c0_20 = arith.constant 0 : index
      %26 = vector.load %arg2[%c0_19, %c0_20] : memref<1x512xi32, #tpu.memory_space<vmem>>, vector<1x512xi32>
      %27 = vector.broadcast %26 : vector<1x512xi32> to vector<8x512xi32>
      %28 = arith.cmpi eq, %25, %27 : vector<8x512xi32>
      %29 = arith.extui %28 : vector<8x512xi1> to vector<8x512xi32>
      %30 = arith.sitofp %29 : vector<8x512xi32> to vector<8x512xf32>
      %c0_21 = arith.constant 0 : index
      %c0_22 = arith.constant 0 : index
      %31 = vector.load %arg11[%c0_21, %c0_22] : memref<8x128xf32, #tpu.memory_space<vmem>>, vector<8x128xf32>
      %cst_23 = arith.constant dense<0.000000e+00> : vector<8x128xf32>
      %32 = tpu.matmul %30, %24, %cst_23 {dimension_numbers = #tpu.dot_dimension_numbers<[1], [0], [0], [1], [0, 0, 1, 1], [], []>} : vector<8x512xf32>, vector<512x128xf32>, vector<8x128xf32> -> vector<8x128xf32>
      %33 = arith.addf %31, %32 : vector<8x128xf32>
      %c0_24 = arith.constant 0 : index
      %c0_25 = arith.constant 0 : index
      %34 = vector.load %arg11[%c0_24, %c0_25] : memref<8x128xf32, #tpu.memory_space<vmem>>, vector<8x128xf32>
      tpu.vector_store %arg11[%c0_24, %c0_25], %33 {strides = array<i32>} : memref<8x128xf32, #tpu.memory_space<vmem>>, vector<8x128xf32>,
    } else {
    }
    %c0_i32_13 = arith.constant 0 : i32
    %17 = arith.cmpi eq, %arg0, %c0_i32_13 : i32
    %c0_i32_14 = arith.constant 0 : i32
    %18 = arith.cmpi eq, %arg1, %c0_i32_14 : i32
    %19 = arith.andi %17, %18 : i1
    %20 = arith.extui %19 : i1 to i32
    %c0_i32_15 = arith.constant 0 : i32
    %21 = arith.cmpi ne, %20, %c0_i32_15 : i32
    scf.if %21 {
      %c0_16 = arith.constant 0 : index
      %c0_17 = arith.constant 0 : index
      %22 = vector.load %arg11[%c0_16, %c0_17] : memref<8x128xf32, #tpu.memory_space<vmem>>, vector<8x128xf32>
      %c0_18 = arith.constant 0 : index
      %c0_19 = arith.constant 0 : index
      %23 = vector.load %arg5[%c0_18, %c0_19] : memref<128x128xf32, #tpu.memory_space<vmem>>, vector<128x128xf32>
      %cst_20 = arith.constant dense<0.000000e+00> : vector<8x128xf32>
      %24 = tpu.matmul %22, %23, %cst_20 {dimension_numbers = #tpu.dot_dimension_numbers<[1], [0], [0], [1], [0, 0, 1, 1], [], []>} : vector<8x128xf32>, vector<128x128xf32>, vector<8x128xf32> -> vector<8x128xf32>
      %c0_21 = arith.constant 0 : index
      %c0_22 = arith.constant 0 : index
      %25 = vector.load %arg6[%c0_21, %c0_22] : memref<1x128xf32, #tpu.memory_space<vmem>>, vector<1x128xf32>
      %26 = vector.broadcast %25 : vector<1x128xf32> to vector<8x128xf32>
      %27 = arith.addf %24, %26 : vector<8x128xf32>
      %cst_23 = arith.constant 0.000000e+00 : f32
      %28 = vector.broadcast %cst_23 : f32 to vector<8x128xf32>
      %29 = arith.maximumf %27, %28 : vector<8x128xf32>
      %c0_24 = arith.constant 0 : index
      %c0_25 = arith.constant 0 : index
      %30 = vector.load %arg7[%c0_24, %c0_25] : memref<128x4xf32, #tpu.memory_space<vmem>>, vector<128x4xf32>
      %cst_26 = arith.constant dense<0.000000e+00> : vector<8x4xf32>
      %31 = tpu.matmul %29, %30, %cst_26 {dimension_numbers = #tpu.dot_dimension_numbers<[1], [0], [0], [1], [0, 0, 1, 1], [], []>} : vector<8x128xf32>, vector<128x4xf32>, vector<8x4xf32> -> vector<8x4xf32>
      %c0_27 = arith.constant 0 : index
      %c0_28 = arith.constant 0 : index
      %32 = vector.load %arg8[%c0_27, %c0_28] : memref<1x4xf32, #tpu.memory_space<vmem>>, vector<1x4xf32>
      %33 = vector.broadcast %32 : vector<1x4xf32> to vector<8x4xf32>
      %34 = arith.addf %31, %33 : vector<8x4xf32>
      %cst_29 = arith.constant dense<0xFF800000> : vector<8xf32>
      %35 = vector.multi_reduction <maximumf>, %34, %cst_29 [1] : vector<8x4xf32> to vector<8xf32>
      %36 = vector.shape_cast %35 : vector<8xf32> to vector<8x1xf32>
      %37 = vector.broadcast %36 : vector<8x1xf32> to vector<8x4xf32>
      %38 = arith.subf %34, %37 : vector<8x4xf32>
      %39 = math.exp %38 : vector<8x4xf32>
      %cst_30 = arith.constant dense<0.000000e+00> : vector<8xf32>
      %40 = vector.multi_reduction <add>, %39, %cst_30 [1] : vector<8x4xf32> to vector<8xf32>
      %41 = vector.shape_cast %40 : vector<8xf32> to vector<8x1xf32>
      %42 = math.log %41 : vector<8x1xf32>
      %43 = vector.broadcast %42 : vector<8x1xf32> to vector<8x4xf32>
      %44 = arith.subf %38, %43 : vector<8x4xf32>
      %c0_31 = arith.constant 0 : index
      %c0_32 = arith.constant 0 : index
      %45 = vector.load %arg9[%c0_31, %c0_32] : memref<8x4xf32, #tpu.memory_space<vmem>>, vector<8x4xf32>
      tpu.vector_store %arg9[%c0_31, %c0_32], %44 {strides = array<i32>} : memref<8x4xf32, #tpu.memory_space<vmem>>, vector<8x4xf32>,
    } else {
    }
    return
  }
  func.func @transform_0(%arg0: i32, %arg1: i32) -> (i32, i32) {
    %c0_i32 = arith.constant 0 : i32
    %c0_i32_0 = arith.constant 0 : i32
    return %c0_i32, %arg0 : i32, i32
  }
  func.func @transform_1(%arg0: i32, %arg1: i32) -> (i32, i32) {
    %c0_i32 = arith.constant 0 : i32
    return %arg0, %arg1 : i32, i32
  }
  func.func @transform_2(%arg0: i32, %arg1: i32) -> (i32, i32) {
    %c0_i32 = arith.constant 0 : i32
    %c0_i32_0 = arith.constant 0 : i32
    return %arg1, %c0_i32 : i32, i32
  }
  func.func @transform_3(%arg0: i32, %arg1: i32) -> (i32, i32) {
    %c0_i32 = arith.constant 0 : i32
    %c0_i32_0 = arith.constant 0 : i32
    %c0_i32_1 = arith.constant 0 : i32
    return %c0_i32, %c0_i32_0 : i32, i32
  }
  func.func @transform_4(%arg0: i32, %arg1: i32) -> (i32, i32) {
    %c0_i32 = arith.constant 0 : i32
    %c0_i32_0 = arith.constant 0 : i32
    %c0_i32_1 = arith.constant 0 : i32
    return %c0_i32, %c0_i32_0 : i32, i32
  }
  func.func @transform_5(%arg0: i32, %arg1: i32) -> (i32, i32) {
    %c0_i32 = arith.constant 0 : i32
    %c0_i32_0 = arith.constant 0 : i32
    %c0_i32_1 = arith.constant 0 : i32
    return %c0_i32, %c0_i32_0 : i32, i32
  }
  func.func @transform_6(%arg0: i32, %arg1: i32) -> (i32, i32) {
    %c0_i32 = arith.constant 0 : i32
    %c0_i32_0 = arith.constant 0 : i32
    %c0_i32_1 = arith.constant 0 : i32
    return %c0_i32, %c0_i32_0 : i32, i32
  }
  func.func @transform_7(%arg0: i32, %arg1: i32) -> (i32, i32) {
    %c0_i32 = arith.constant 0 : i32
    %c0_i32_0 = arith.constant 0 : i32
    %c0_i32_1 = arith.constant 0 : i32
    return %c0_i32, %c0_i32_0 : i32, i32
  }
}

</mosaic_0001>

<bundles_post_ra>
// kernel: gnn_forward.2
= control target key start
LH: loop header
LB: loop body
LE: loop exit
PB: predicated region body
PF: predicated region fallthrough
CT: control target
= control target key end

     0   :  { %v3084_v0 = vmov 0.0|0.0   ;;  %s4576_s1 = inlined_call_operand.vmem [shape: f32[512,128], index: 1, kind: input, shape index: {}]   ;;  %s4577_s0 = inlined_call_operand.vmem [shape: f32[512,512], index: 0, kind: input, shape index: {}]   ;;  %s4578_s2 = inlined_call_operand.vmem [shape: f32[128,128], index: 2, kind: input, shape index: {}]   ;;  %s4579_s3 = inlined_call_operand.vmem [shape: f32[128,128], index: 3, kind: input, shape index: {}]   ;;  %s4580_s4 = inlined_call_operand.vmem [shape: f32[1,128], index: 4, kind: input, shape index: {}]   ;;  %s4581_s5 = inlined_call_operand.vmem [shape: f32[512,128], index: 5, kind: output, shape index: {}]  }
   0x1   :  { %2795 = vmatprep.subr.bf16.mxu0 %v3084_v0  ;;  %v408_v1 = vld [vmem:[%s4576_s1] sm:$0xff]  ;;  %v409_v2 = vld [vmem:[%s4576_s1 + $0x8] sm:$0xff]  ;;  %v410_v3 = vld [vmem:[%s4576_s1 + $0x10] sm:$0xff]  ;;  %2955 = vmatprep.subr.bf16.mxu1 %v3084_v0 }
   0x2   :  { %v2796_v4 = vpack.c.bf16 %v409_v2, %v408_v1  ;;  %v411_v5 = vld [vmem:[%s4576_s1 + $0x18] sm:$0xff]  ;;  %v412_v7 = vld [vmem:[%s4576_s1 + $0x20] sm:$0xff]  ;;  %v413_v8 = vld [vmem:[%s4576_s1 + $0x28] sm:$0xff] }
   0x3   :  { %v2799_v6 = vpack.c.bf16 %v411_v5, %v410_v3  ;;  %v2802_v9 = vpack.c.bf16 %v413_v8, %v412_v7  ;;  %v414_v10 = vld [vmem:[%s4576_s1 + $0x30] sm:$0xff]  ;;  %v415_v11 = vld [vmem:[%s4576_s1 + $0x38] sm:$0xff]  ;;  %v153_v12 = vld [vmem:[%s4577_s0 + $0x8] sm:$0xff] }
   0x4   :  { %2797 = vmatpush1.bf16.msra.mxu0 %v2796_v4  ;;  %2971 = vmatpush1.bf16.msra.mxu1 %v2796_v4  ;;  %v2805_v13 = vpack.c.bf16 %v415_v11, %v414_v10  ;;  %v416_v14 = vld [vmem:[%s4576_s1 + $0x40] sm:$0xff]  ;;  %v417_v15 = vld [vmem:[%s4576_s1 + $0x48] sm:$0xff]  ;;  %v418_v17 = vld [vmem:[%s4576_s1 + $0x50] sm:$0xff] }
   0x5   :  { %2798 = vmatprep.subr.bf16.mxu0 %v3084_v0  ;;  %2956 = vmatprep.subr.bf16.mxu1 %v3084_v0  ;;  %v2808_v16 = vpack.c.bf16 %v417_v15, %v416_v14  ;;  %v419_v18 = vld [vmem:[%s4576_s1 + $0x58] sm:$0xff]  ;;  %v420_v20 = vld [vmem:[%s4576_s1 + $0x60] sm:$0xff]  ;;  %v421_v21 = vld [vmem:[%s4576_s1 + $0x68] sm:$0xff] }
   0x6   :  { %536 = vmatprep.mubr.f32.mxu0 %v153_v12  ;;  %v2811_v19 = vpack.c.bf16 %v419_v18, %v418_v17  ;;  %v2814_v22 = vpack.c.bf16 %v421_v21, %v420_v20  ;;  %v422_v23 = vld [vmem:[%s4576_s1 + $0x70] sm:$0xff]  ;;  %v423_v24 = vld [vmem:[%s4576_s1 + $0x78] sm:$0xff]  ;;  %v424_v26 = vld [vmem:[%s4576_s1 + $0x80] sm:$0xff] }
   0x7   :  { %v2817_v25 = vpack.c.bf16 %v423_v24, %v422_v23  ;;  %v425_v27 = vld [vmem:[%s4576_s1 + $0x88] sm:$0xff]  ;;  %v426_v29 = vld [vmem:[%s4576_s1 + $0x90] sm:$0xff]  ;;  %v427_v30 = vld [vmem:[%s4576_s1 + $0x98] sm:$0xff] }
   0x8   :  { %2800 = vmatpush1.bf16.msra.mxu0 %v2799_v6  ;;  %2972 = vmatpush1.bf16.msra.mxu1 %v2799_v6  ;;  %v2820_v28 = vpack.c.bf16 %v425_v27, %v424_v26  ;;  %v2823_v31 = vpack.c.bf16 %v427_v30, %v426_v29  ;;  %v428_v32 = vld [vmem:[%s4576_s1 + $0xa0] sm:$0xff]  ;;  %v429_v33 = vld [vmem:[%s4576_s1 + $0xa8] sm:$0xff]  ;;  %v430_v35 = vld [vmem:[%s4576_s1 + $0xb0] sm:$0xff] }
   0x9   :  { %2801 = vmatprep.subr.bf16.mxu0 %v3084_v0  ;;  %2957 = vmatprep.subr.bf16.mxu1 %v3084_v0  ;;  %v2826_v34 = vpack.c.bf16 %v429_v33, %v428_v32  ;;  %v431_v36 = vld [vmem:[%s4576_s1 + $0xb8] sm:$0xff]  ;;  %v432_v38 = vld [vmem:[%s4576_s1 + $0xc0] sm:$0xff]  ;;  %v433_v39 = vld [vmem:[%s4576_s1 + $0xc8] sm:$0xff] }
   0xa   :  { %v2829_v37 = vpack.c.bf16 %v431_v36, %v430_v35  ;;  %v2832_v40 = vpack.c.bf16 %v433_v39, %v432_v38  ;;  %v434_v41 = vld [vmem:[%s4576_s1 + $0xd0] sm:$0xff]  ;;  %v435_v42 = vld [vmem:[%s4576_s1 + $0xd8] sm:$0xff]  ;;  %v436_v44 = vld [vmem:[%s4576_s1 + $0xe0] sm:$0xff] }
   0xb   :  { %v2835_v43 = vpack.c.bf16 %v435_v42, %v434_v41  ;;  %v437_v45 = vld [vmem:[%s4576_s1 + $0xe8] sm:$0xff]  ;;  %v438_v47 = vld [vmem:[%s4576_s1 + $0xf0] sm:$0xff]  ;;  %v439_v48 = vld [vmem:[%s4576_s1 + $0xf8] sm:$0xff] }
   0xc   :  { %2803 = vmatpush1.bf16.msra.mxu0 %v2802_v9  ;;  %2973 = vmatpush1.bf16.msra.mxu1 %v2802_v9  ;;  %v2838_v46 = vpack.c.bf16 %v437_v45, %v436_v44  ;;  %v2841_v49 = vpack.c.bf16 %v439_v48, %v438_v47  ;;  %v440_v50 = vld [vmem:[%s4576_s1 + $0x100] sm:$0xff]  ;;  %v441_v51 = vld [vmem:[%s4576_s1 + $0x108] sm:$0xff]  ;;  %v442_v55 = vld [vmem:[%s4576_s1 + $0x110] sm:$0xff] }
   0xd   :  { %2804 = vmatprep.subr.bf16.mxu0 %v3084_v0  ;;  %2958 = vmatprep.subr.bf16.mxu1 %v3084_v0  ;;  %v152_v52 = vld [vmem:[%s4577_s0] sm:$0xff]  ;;  %v2844_v53 = vpack.c.bf16 %v441_v51, %v440_v50  ;;  %v157_v54 = vld [vmem:[%s4577_s0 + $0x28] sm:$0xff]  ;;  %v443_v56 = vld [vmem:[%s4576_s1 + $0x118] sm:$0xff] }
   0xe   :  { %v156_v57 = vld [vmem:[%s4577_s0 + $0x20] sm:$0xff]  ;;  %v2847_v58 = vpack.c.bf16 %v443_v56, %v442_v55  ;;  %v161_v59 = vld [vmem:[%s4577_s0 + $0x48] sm:$0xff]  ;;  %v446_v2 = vld [vmem:[%s4576_s1 + $0x130] sm:$0xff] }
   0xf   :  { %v444_v60 = vld [vmem:[%s4576_s1 + $0x120] sm:$0xff]  ;;  %v445_v61 = vld [vmem:[%s4576_s1 + $0x128] sm:$0xff]  ;;  %v447_v3 = vld [vmem:[%s4576_s1 + $0x138] sm:$0xff] }
  0x10   :  { %2806 = vmatpush1.bf16.msra.mxu0 %v2805_v13  ;;  %2974 = vmatpush1.bf16.msra.mxu1 %v2805_v13  ;;  %v160_v62 = vld [vmem:[%s4577_s0 + $0x40] sm:$0xff]  ;;  %v2850_v63 = vpack.c.bf16 %v445_v61, %v444_v60  ;;  %v165_v1 = vld [vmem:[%s4577_s0 + $0x68] sm:$0xff]  ;;  %v2853_v5 = vpack.c.bf16 %v447_v3, %v446_v2  ;;  %v450_v12 = vld [vmem:[%s4576_s1 + $0x150] sm:$0xff] }
  0x11   :  { %2807 = vmatprep.subr.bf16.mxu0 %v3084_v0  ;;  %2959 = vmatprep.subr.bf16.mxu1 %v3084_v0  ;;  %v164_v4 = vld [vmem:[%s4577_s0 + $0x60] sm:$0xff]  ;;  %v169_v6 = vld [vmem:[%s4577_s0 + $0x88] sm:$0xff]  ;;  %v451_v13 = vld [vmem:[%s4576_s1 + $0x158] sm:$0xff] }
  0x12   :  { %v448_v7 = vld [vmem:[%s4576_s1 + $0x140] sm:$0xff]  ;;  %v449_v8 = vld [vmem:[%s4576_s1 + $0x148] sm:$0xff]  ;;  %v2859_v15 = vpack.c.bf16 %v451_v13, %v450_v12  ;;  %v455_v23 = vld [vmem:[%s4576_s1 + $0x178] sm:$0xff] }
  0x13   :  { %v168_v9 = vld [vmem:[%s4577_s0 + $0x80] sm:$0xff]  ;;  %v2856_v10 = vpack.c.bf16 %v449_v8, %v448_v7  ;;  %v173_v11 = vld [vmem:[%s4577_s0 + $0xa8] sm:$0xff]  ;;  %v458_v32 = vld [vmem:[%s4576_s1 + $0x190] sm:$0xff] }
  0x14   :  { %2809 = vmatpush1.bf16.msra.mxu0 %v2808_v16  ;;  %2975 = vmatpush1.bf16.msra.mxu1 %v2808_v16  ;;  %v172_v14 = vld [vmem:[%s4577_s0 + $0xa0] sm:$0xff]  ;;  %v177_v16 = vld [vmem:[%s4577_s0 + $0xc8] sm:$0xff]  ;;  %v459_v33 = vld [vmem:[%s4576_s1 + $0x198] sm:$0xff] }
  0x15   :  { %2810 = vmatprep.subr.bf16.mxu0 %v3084_v0  ;;  %2960 = vmatprep.subr.bf16.mxu1 %v3084_v0  ;;  %v452_v17 = vld [vmem:[%s4576_s1 + $0x160] sm:$0xff]  ;;  %v453_v18 = vld [vmem:[%s4576_s1 + $0x168] sm:$0xff]  ;;  %v2871_v35 = vpack.c.bf16 %v459_v33, %v458_v32  ;;  %v462_v42 = vld [vmem:[%s4576_s1 + $0x1b0] sm:$0xff] }
  0x16   :  { %v2862_v20 = vpack.c.bf16 %v453_v18, %v452_v17  ;;  %v181_v21 = vld [vmem:[%s4577_s0 + $0xe8] sm:$0xff]  ;;  %v180_v24 = vld [vmem:[%s4577_s0 + $0xe0] sm:$0xff] }
  0x17   :  { %v185_v26 = vld [vmem:[%s4577_s0 + $0x108] sm:$0xff]  ;;  %v456_v27 = vld [vmem:[%s4576_s1 + $0x180] sm:$0xff] }
  0x18   :  { %2812 = vmatpush1.bf16.msra.mxu0 %v2811_v19  ;;  %2976 = vmatpush1.bf16.msra.mxu1 %v2811_v19  ;;  %v176_v19 = vld [vmem:[%s4577_s0 + $0xc0] sm:$0xff]  ;;  %v193_v36 = vld [vmem:[%s4577_s0 + $0x148] sm:$0xff] }
  0x19   :  { %2813 = vmatprep.subr.bf16.mxu0 %v3084_v0  ;;  %2961 = vmatprep.subr.bf16.mxu1 %v3084_v0  ;;  %v184_v29 = vld [vmem:[%s4577_s0 + $0x100] sm:$0xff]  ;;  %v461_v38 = vld [vmem:[%s4576_s1 + $0x1a8] sm:$0xff] }
  0x1a   :  { %v192_v39 = vld [vmem:[%s4577_s0 + $0x140] sm:$0xff]  ;;  %v197_v41 = vld [vmem:[%s4577_s0 + $0x168] sm:$0xff] }
  0x1b   :  { %v196_v44 = vld [vmem:[%s4577_s0 + $0x160] sm:$0xff]  ;;  %v465_v48 = vld [vmem:[%s4576_s1 + $0x1c8] sm:$0xff] }
  0x1c   :  { %2815 = vmatpush1.bf16.msra.mxu0 %v2814_v22  ;;  %2977 = vmatpush1.bf16.msra.mxu1 %v2814_v22  ;;  %v454_v22 = vld [vmem:[%s4576_s1 + $0x170] sm:$0xff]  ;;  %v464_v47 = vld [vmem:[%s4576_s1 + $0x1c0] sm:$0xff]  ;;  %v205_v51 = vld [vmem:[%s4577_s0 + $0x1a8] sm:$0xff] }
  0x1d   :  { %2816 = vmatprep.subr.bf16.mxu0 %v3084_v0  ;;  %2962 = vmatprep.subr.bf16.mxu1 %v3084_v0  ;;  %v2880_v50 = vpack.c.bf16 %v465_v48, %v464_v47  ;;  %v209_v56 = vld [vmem:[%s4577_s0 + $0x1c8] sm:$0xff]  ;;  %v224_v7 = vld [vmem:[%s4577_s0 + $0x240] sm:$0xff] }
  0x1e   :  { %v213_v61 = vld [vmem:[%s4577_s0 + $0x1e8] sm:$0xff]  ;;  %v236_v13 = vld [vmem:[%s4577_s0 + $0x2a0] sm:$0xff] }
  0x1f   :  { %v217_v3 = vld [vmem:[%s4577_s0 + $0x208] sm:$0xff]  ;;  %v240_v17 = vld [vmem:[%s4577_s0 + $0x2c0] sm:$0xff] }
  0x20   :  { %2818 = vmatpush1.bf16.msra.mxu0 %v2817_v25  ;;  %2978 = vmatpush1.bf16.msra.mxu1 %v2817_v25  ;;  %v2865_v25 = vpack.c.bf16 %v455_v23, %v454_v22  ;;  %v229_v8 = vld [vmem:[%s4577_s0 + $0x268] sm:$0xff]  ;;  %v296_v32 = vld [vmem:[%s4577_s0 + $0x480] sm:$0xff] }
  0x21   :  { %2819 = vmatprep.subr.bf16.mxu0 %v3084_v0  ;;  %2963 = vmatprep.subr.bf16.mxu1 %v3084_v0  ;;  %v237_v12 = vld [vmem:[%s4577_s0 + $0x2a8] sm:$0xff]  ;;  %v256_v33 = vld [vmem:[%s4577_s0 + $0x340] sm:$0xff] }
  0x22   :  { %v245_v18 = vld [vmem:[%s4577_s0 + $0x2e8] sm:$0xff]  ;;  %v312_v48 = vld [vmem:[%s4577_s0 + $0x500] sm:$0xff] }
  0x23   :  { %v249_v22 = vld [vmem:[%s4577_s0 + $0x308] sm:$0xff] }
  0x24   :  { %2821 = vmatpush1.bf16.msra.mxu0 %v2820_v28  ;;  %2979 = vmatpush1.bf16.msra.mxu1 %v2820_v28  ;;  %v457_v28 = vld [vmem:[%s4576_s1 + $0x188] sm:$0xff] }
  0x25   :  { %2822 = vmatprep.subr.bf16.mxu0 %v3084_v0  ;;  %2964 = vmatprep.subr.bf16.mxu1 %v3084_v0  ;;  %v2868_v30 = vpack.c.bf16 %v457_v28, %v456_v27  ;;  %v289_v23 = vld [vmem:[%s4577_s0 + $0x448] sm:$0xff]  ;;  %v292_v28 = vld [vmem:[%s4577_s0 + $0x460] sm:$0xff] }
  0x26   :  { %v293_v27 = vld [vmem:[%s4577_s0 + $0x468] sm:$0xff] }
  0x27   :  { %v313_v47 = vld [vmem:[%s4577_s0 + $0x508] sm:$0xff] }
  0x28   :  { %2824 = vmatpush1.bf16.msra.mxu0 %v2823_v31  ;;  %2980 = vmatpush1.bf16.msra.mxu1 %v2823_v31  ;;  %v189_v31 = vld [vmem:[%s4577_s0 + $0x128] sm:$0xff] }
  0x29   :  { %2825 = vmatprep.subr.bf16.mxu0 %v3084_v0  ;;  %2965 = vmatprep.subr.bf16.mxu1 %v3084_v0 }
  0x2c   :  { %2827 = vmatpush1.bf16.msra.mxu0 %v2826_v34  ;;  %2981 = vmatpush1.bf16.msra.mxu1 %v2826_v34  ;;  %v188_v34 = vld [vmem:[%s4577_s0 + $0x120] sm:$0xff] }
  0x2d   :  { %2828 = vmatprep.subr.bf16.mxu0 %v3084_v0  ;;  %2966 = vmatprep.subr.bf16.mxu1 %v3084_v0 }
  0x30   :  { %2830 = vmatpush1.bf16.msra.mxu0 %v2829_v37  ;;  %2982 = vmatpush1.bf16.msra.mxu1 %v2829_v37  ;;  %v460_v37 = vld [vmem:[%s4576_s1 + $0x1a0] sm:$0xff] }
  0x31   :  { %2831 = vmatprep.subr.bf16.mxu0 %v3084_v0  ;;  %2967 = vmatprep.subr.bf16.mxu1 %v3084_v0 }
  0x34   :  { %2833 = vmatpush1.bf16.msra.mxu0 %v2832_v40  ;;  %2983 = vmatpush1.bf16.msra.mxu1 %v2832_v40  ;;  %v2874_v40 = vpack.c.bf16 %v461_v38, %v460_v37  ;;  %v260_v37 = vld [vmem:[%s4577_s0 + $0x360] sm:$0xff]  ;;  %v265_v38 = vld [vmem:[%s4577_s0 + $0x388] sm:$0xff] }
  0x35   :  { %2834 = vmatprep.subr.bf16.mxu0 %v3084_v0  ;;  %2968 = vmatprep.subr.bf16.mxu1 %v3084_v0 }
  0x38   :  { %2836 = vmatpush1.bf16.msra.mxu0 %v2835_v43  ;;  %2984 = vmatpush1.bf16.msra.mxu1 %v2835_v43  ;;  %v463_v43 = vld [vmem:[%s4576_s1 + $0x1b8] sm:$0xff] }
  0x39   :  { %2837 = vmatprep.subr.bf16.mxu0 %v3084_v0  ;;  %2969 = vmatprep.subr.bf16.mxu1 %v3084_v0  ;;  %v2877_v45 = vpack.c.bf16 %v463_v43, %v462_v42  ;;  %v269_v42 = vld [vmem:[%s4577_s0 + $0x3a8] sm:$0xff] }
  0x3a   :  { %v309_v43 = vld [vmem:[%s4577_s0 + $0x4e8] sm:$0xff] }
  0x3c   :  { %2839 = vmatpush1.bf16.msra.mxu0 %v2838_v46  ;;  %2985 = vmatpush1.bf16.msra.mxu1 %v2838_v46  ;;  %v201_v46 = vld [vmem:[%s4577_s0 + $0x188] sm:$0xff] }
  0x3d   :  { %2840 = vmatprep.subr.bf16.mxu0 %v3084_v0  ;;  %2970 = vmatprep.subr.bf16.mxu1 %v3084_v0 }
  0x40   :  { %2842 = vmatpush1.bf16.msra.mxu0 %v2841_v49  ;;  %2986 = vmatpush1.bf16.msra.mxu1 %v2841_v49  ;;  %v200_v49 = vld [vmem:[%s4577_s0 + $0x180] sm:$0xff] }
  0x41   :  { %2843 = vmatprep.subr.bf16.mxu0 %v3084_v0 }
  0x43   :  { %537 = vmatmul.mubr.f32.vlgmr.msra.gmra.mrb[0].mxu0 %v152_v52  ;;  %v466_v52 = vld [vmem:[%s4576_s1 + $0x1d0] sm:$0xff] }
  0x44   :  { %2845 = vmatpush1.bf16.msra.mxu0 %v2844_v53  ;;  %541 = vmatprep.mubr.f32.mxu0 %v157_v54  ;;  %v467_v53 = vld [vmem:[%s4576_s1 + $0x1d8] sm:$0xff]  ;;  %v204_v54 = vld [vmem:[%s4577_s0 + $0x1a0] sm:$0xff] }
  0x45   :  { %2846 = vmatprep.subr.bf16.mxu0 %v3084_v0  ;;  %v2883_v55 = vpack.c.bf16 %v467_v53, %v466_v52  ;;  %v316_v52 = vld [vmem:[%s4577_s0 + $0x520] sm:$0xff] }
  0x46   :  { %v276_v53 = vld [vmem:[%s4577_s0 + $0x3e0] sm:$0xff] }
  0x47   :  { %542 = vmatmul.mubr.f32.gmra.mrb[2].mxu0 %v156_v57  ;;  %v468_v57 = vld [vmem:[%s4576_s1 + $0x1e0] sm:$0xff] }
  0x48   :  { %546 = vmatprep.mubr.f32.mxu0 %v161_v59  ;;  %2848 = vmatpush1.bf16.msra.mxu0 %v2847_v58  ;;  %v469_v58 = vld [vmem:[%s4576_s1 + $0x1e8] sm:$0xff]  ;;  %v208_v59 = vld [vmem:[%s4577_s0 + $0x1c0] sm:$0xff] }
  0x49   :  { %2849 = vmatprep.subr.bf16.mxu0 %v3084_v0  ;;  %v2886_v60 = vpack.c.bf16 %v469_v58, %v468_v57  ;;  %v154_v57 = vld [vmem:[%s4577_s0 + $0x10] sm:$0xff]  ;;  %v159_v58 = vld [vmem:[%s4577_s0 + $0x38] sm:$0xff] }
  0x4b   :  { %547 = vmatmul.mubr.f32.gmra.mrb[4].mxu0 %v160_v62  ;;  %v470_v62 = vld [vmem:[%s4576_s1 + $0x1f0] sm:$0xff] }
  0x4c   :  { %551 = vmatprep.mubr.f32.mxu0 %v165_v1  ;;  %2851 = vmatpush1.bf16.msra.mxu0 %v2850_v63  ;;  %v471_v63 = vld [vmem:[%s4576_s1 + $0x1f8] sm:$0xff]  ;;  %v212_v1 = vld [vmem:[%s4577_s0 + $0x1e0] sm:$0xff] }
  0x4d   :  { %2852 = vmatprep.subr.bf16.mxu0 %v3084_v0  ;;  %v2889_v2 = vpack.c.bf16 %v471_v63, %v470_v62  ;;  %v163_v62 = vld [vmem:[%s4577_s0 + $0x58] sm:$0xff]  ;;  %v329_v63 = vld [vmem:[%s4577_s0 + $0x588] sm:$0xff] }
  0x4f   :  { %552 = vmatmul.mubr.f32.gmra.mrb[6].mxu0 %v164_v4  ;;  %v216_v4 = vld [vmem:[%s4577_s0 + $0x200] sm:$0xff] }
  0x50   :  { %556 = vmatprep.mubr.f32.mxu0 %v169_v6  ;;  %2854 = vmatpush1.bf16.msra.mxu0 %v2853_v5  ;;  %v221_v5 = vld [vmem:[%s4577_s0 + $0x228] sm:$0xff]  ;;  %v220_v6 = vld [vmem:[%s4577_s0 + $0x220] sm:$0xff] }
  0x51   :  { %2855 = vmatprep.subr.bf16.mxu0 %v3084_v0 }
  0x53   :  { %557 = vmatmul.mubr.f32.gmra.mrb[8].mxu0 %v168_v9  ;;  %v228_v9 = vld [vmem:[%s4577_s0 + $0x260] sm:$0xff] }
  0x54   :  { %561 = vmatprep.mubr.f32.mxu0 %v173_v11  ;;  %2857 = vmatpush1.bf16.msra.mxu0 %v2856_v10  ;;  %v233_v10 = vld [vmem:[%s4577_s0 + $0x288] sm:$0xff]  ;;  %v232_v11 = vld [vmem:[%s4577_s0 + $0x280] sm:$0xff] }
  0x55   :  { %2858 = vmatprep.subr.bf16.mxu0 %v3084_v0 }
  0x57   :  { %562 = vmatmul.mubr.f32.gmra.mrb[10].mxu0 %v172_v14  ;;  %v241_v14 = vld [vmem:[%s4577_s0 + $0x2c8] sm:$0xff] }
  0x58   :  { %566 = vmatprep.mubr.f32.mxu0 %v177_v16  ;;  %2860 = vmatpush1.bf16.msra.mxu0 %v2859_v15  ;;  %v281_v15 = vld [vmem:[%s4577_s0 + $0x408] sm:$0xff]  ;;  %v280_v16 = vld [vmem:[%s4577_s0 + $0x400] sm:$0xff] }
  0x59   :  { %2861 = vmatprep.subr.bf16.mxu0 %v3084_v0  ;;  %696 = vmatprep.mubr.f32.mxu1 %v281_v15  ;;  %v345_v15 = vld [vmem:[%s4577_s0 + $0x608] sm:$0xff] }
  0x5a   :  { %697 = vmatmul.mubr.f32.vlgmr.msra.gmra.mrb[0].mxu1 %v280_v16  ;;  %v344_v16 = vld [vmem:[%s4577_s0 + $0x600] sm:$0xff] }
  0x5b   :  { %567 = vmatmul.mubr.f32.gmra.mrb[12].mxu0 %v176_v19  ;;  %v285_v19 = vld [vmem:[%s4577_s0 + $0x428] sm:$0xff] }
  0x5c   :  { %571 = vmatprep.mubr.f32.mxu0 %v181_v21  ;;  %2863 = vmatpush1.bf16.msra.mxu0 %v2862_v20  ;;  %v284_v20 = vld [vmem:[%s4577_s0 + $0x420] sm:$0xff] }
  0x5d   :  { %2864 = vmatprep.subr.bf16.mxu0 %v3084_v0  ;;  %v244_v21 = vld [vmem:[%s4577_s0 + $0x2e0] sm:$0xff]  ;;  %701 = vmatprep.mubr.f32.mxu1 %v285_v19  ;;  %v349_v19 = vld [vmem:[%s4577_s0 + $0x628] sm:$0xff] }
  0x5e   :  { %702 = vmatmul.mubr.f32.gmra.mrb[2].mxu1 %v284_v20  ;;  %v348_v20 = vld [vmem:[%s4577_s0 + $0x620] sm:$0xff] }
  0x5f   :  { %572 = vmatmul.mubr.f32.gmra.mrb[14].mxu0 %v180_v24  ;;  %v288_v24 = vld [vmem:[%s4577_s0 + $0x440] sm:$0xff]  ;;  %706 = vmatprep.mubr.f32.mxu1 %v289_v23  ;;  %v353_v23 = vld [vmem:[%s4577_s0 + $0x648] sm:$0xff] }
  0x60   :  { %576 = vmatprep.mubr.f32.mxu0 %v185_v26  ;;  %2866 = vmatpush1.bf16.msra.mxu0 %v2865_v25  ;;  %v248_v25 = vld [vmem:[%s4577_s0 + $0x300] sm:$0xff]  ;;  %v253_v26 = vld [vmem:[%s4577_s0 + $0x328] sm:$0xff] }
  0x61   :  { %2867 = vmatprep.subr.bf16.mxu0 %v3084_v0 }
  0x62   :  { %707 = vmatmul.mubr.f32.gmra.mrb[4].mxu1 %v288_v24  ;;  %v352_v24 = vld [vmem:[%s4577_s0 + $0x640] sm:$0xff] }
  0x63   :  { %577 = vmatmul.mubr.f32.gmra.mrb[16].mxu0 %v184_v29  ;;  %v252_v29 = vld [vmem:[%s4577_s0 + $0x320] sm:$0xff]  ;;  %711 = vmatprep.mubr.f32.mxu1 %v293_v27  ;;  %v357_v27 = vld [vmem:[%s4577_s0 + $0x668] sm:$0xff] }
  0x64   :  { %581 = vmatprep.mubr.f32.mxu0 %v189_v31  ;;  %2869 = vmatpush1.bf16.msra.mxu0 %v2868_v30  ;;  %v257_v30 = vld [vmem:[%s4577_s0 + $0x348] sm:$0xff] }
  0x65   :  { %2870 = vmatprep.subr.bf16.mxu0 %v3084_v0  ;;  %v297_v31 = vld [vmem:[%s4577_s0 + $0x488] sm:$0xff] }
  0x66   :  { %712 = vmatmul.mubr.f32.gmra.mrb[6].mxu1 %v292_v28  ;;  %v356_v28 = vld [vmem:[%s4577_s0 + $0x660] sm:$0xff] }
  0x67   :  { %582 = vmatmul.mubr.f32.gmra.mrb[18].mxu0 %v188_v34  ;;  %716 = vmatprep.mubr.f32.mxu1 %v297_v31  ;;  %v261_v34 = vld [vmem:[%s4577_s0 + $0x368] sm:$0xff] }
  0x68   :  { %586 = vmatprep.mubr.f32.mxu0 %v193_v36  ;;  %2872 = vmatpush1.bf16.msra.mxu0 %v2871_v35  ;;  %v301_v35 = vld [vmem:[%s4577_s0 + $0x4a8] sm:$0xff]  ;;  %v300_v36 = vld [vmem:[%s4577_s0 + $0x4a0] sm:$0xff] }
  0x69   :  { %2873 = vmatprep.subr.bf16.mxu0 %v3084_v0  ;;  %v361_v31 = vld [vmem:[%s4577_s0 + $0x688] sm:$0xff] }
  0x6a   :  { %717 = vmatmul.mubr.f32.gmra.mrb[8].mxu1 %v296_v32  ;;  %v360_v32 = vld [vmem:[%s4577_s0 + $0x680] sm:$0xff] }
  0x6b   :  { %587 = vmatmul.mubr.f32.gmra.mrb[20].mxu0 %v192_v39  ;;  %721 = vmatprep.mubr.f32.mxu1 %v301_v35  ;;  %v305_v39 = vld [vmem:[%s4577_s0 + $0x4c8] sm:$0xff] }
  0x6c   :  { %591 = vmatprep.mubr.f32.mxu0 %v197_v41  ;;  %2875 = vmatpush1.bf16.msra.mxu0 %v2874_v40  ;;  %v304_v40 = vld [vmem:[%s4577_s0 + $0x4c0] sm:$0xff]  ;;  %v365_v35 = vld [vmem:[%s4577_s0 + $0x6a8] sm:$0xff] }
  0x6d   :  { %2876 = vmatprep.subr.bf16.mxu0 %v3084_v0  ;;  %v264_v41 = vld [vmem:[%s4577_s0 + $0x380] sm:$0xff] }
  0x6e   :  { %722 = vmatmul.mubr.f32.gmra.mrb[10].mxu1 %v300_v36  ;;  %v364_v36 = vld [vmem:[%s4577_s0 + $0x6a0] sm:$0xff] }
  0x6f   :  { %592 = vmatmul.mubr.f32.gmra.mrb[22].mxu0 %v196_v44  ;;  %726 = vmatprep.mubr.f32.mxu1 %v305_v39  ;;  %v308_v44 = vld [vmem:[%s4577_s0 + $0x4e0] sm:$0xff]  ;;  %v369_v39 = vld [vmem:[%s4577_s0 + $0x6c8] sm:$0xff] }
  0x70   :  { %596 = vmatprep.mubr.f32.mxu0 %v201_v46  ;;  %2878 = vmatpush1.bf16.msra.mxu0 %v2877_v45  ;;  %v268_v45 = vld [vmem:[%s4577_s0 + $0x3a0] sm:$0xff]  ;;  %v273_v46 = vld [vmem:[%s4577_s0 + $0x3c8] sm:$0xff] }
  0x71   :  { %2879 = vmatprep.subr.bf16.mxu0 %v3084_v0 }
  0x72   :  { %727 = vmatmul.mubr.f32.gmra.mrb[12].mxu1 %v304_v40  ;;  %v368_v40 = vld [vmem:[%s4577_s0 + $0x6c0] sm:$0xff] }
  0x73   :  { %597 = vmatmul.mubr.f32.gmra.mrb[24].mxu0 %v200_v49  ;;  %731 = vmatprep.mubr.f32.mxu1 %v309_v43  ;;  %v272_v49 = vld [vmem:[%s4577_s0 + $0x3c0] sm:$0xff]  ;;  %v373_v43 = vld [vmem:[%s4577_s0 + $0x6e8] sm:$0xff] }
  0x74   :  { %601 = vmatprep.mubr.f32.mxu0 %v205_v51  ;;  %2881 = vmatpush1.bf16.msra.mxu0 %v2880_v50  ;;  %v277_v50 = vld [vmem:[%s4577_s0 + $0x3e8] sm:$0xff] }
  0x75   :  { %2882 = vmatprep.subr.bf16.mxu0 %v3084_v0  ;;  %v317_v51 = vld [vmem:[%s4577_s0 + $0x528] sm:$0xff] }
  0x76   :  { %732 = vmatmul.mubr.f32.gmra.mrb[14].mxu1 %v308_v44  ;;  %v372_v44 = vld [vmem:[%s4577_s0 + $0x6e0] sm:$0xff] }
  0x77   :  { %602 = vmatmul.mubr.f32.gmra.mrb[26].mxu0 %v204_v54  ;;  %736 = vmatprep.mubr.f32.mxu1 %v313_v47  ;;  %v155_v54 = vld [vmem:[%s4577_s0 + $0x18] sm:$0xff]  ;;  %v377_v47 = vld [vmem:[%s4577_s0 + $0x708] sm:$0xff] }
  0x78   :  { %606 = vmatprep.mubr.f32.mxu0 %v209_v56  ;;  %2884 = vmatpush1.bf16.msra.mxu0 %v2883_v55  ;;  %v321_v55 = vld [vmem:[%s4577_s0 + $0x548] sm:$0xff]  ;;  %v320_v56 = vld [vmem:[%s4577_s0 + $0x540] sm:$0xff] }
  0x79   :  { %2885 = vmatprep.subr.bf16.mxu0 %v3084_v0 }
  0x7a   :  { %737 = vmatmul.mubr.f32.gmra.mrb[16].mxu1 %v312_v48  ;;  %v376_v48 = vld [vmem:[%s4577_s0 + $0x700] sm:$0xff] }
  0x7b   :  { %607 = vmatmul.mubr.f32.gmra.mrb[28].mxu0 %v208_v59  ;;  %741 = vmatprep.mubr.f32.mxu1 %v317_v51  ;;  %v325_v59 = vld [vmem:[%s4577_s0 + $0x568] sm:$0xff] }
  0x7c   :  { %611 = vmatprep.mubr.f32.mxu0 %v213_v61  ;;  %2887 = vmatpush1.bf16.msra.mxu0 %v2886_v60  ;;  %v324_v60 = vld [vmem:[%s4577_s0 + $0x560] sm:$0xff]  ;;  %v158_v61 = vld [vmem:[%s4577_s0 + $0x30] sm:$0xff]  ;;  %v1438_v51 = vld [vmem:[%s4578_s2 + $0x8] sm:$0xff] }
  0x7d   :  { %2888 = vmatprep.subr.bf16.mxu0 %v3084_v0  ;;  %v225_v0 = vld [vmem:[%s4577_s0 + $0x248] sm:$0xff] }
  0x7e   :  { %742 = vmatmul.mubr.f32.gmra.mrb[18].mxu1 %v316_v52  ;;  %v215_v52 = vld [vmem:[%s4577_s0 + $0x1f8] sm:$0xff] }
  0x7f   :  { %612 = vmatmul.mubr.f32.gmra.mrb[30].mxu0 %v212_v1  ;;  %746 = vmatprep.mubr.f32.mxu1 %v321_v55  ;;  %v328_v1 = vld [vmem:[%s4577_s0 + $0x580] sm:$0xff] }
  0x80   :  { %616 = vmatprep.mubr.f32.mxu0 %v217_v3  ;;  %2890 = vmatpush1.bf16.msra.mxu0 %v2889_v2  ;;  %v162_v2 = vld [vmem:[%s4577_s0 + $0x50] sm:$0xff]  ;;  %v167_v3 = vld [vmem:[%s4577_s0 + $0x78] sm:$0xff]  ;;  %v380_v55 = vld [vmem:[%s4577_s0 + $0x720] sm:$0xff] }
  0x82   :  { %747 = vmatmul.mubr.f32.gmra.mrb[20].mxu1 %v320_v56  ;;  %v214_v56 = vld [vmem:[%s4577_s0 + $0x1f0] sm:$0xff] }
  0x83   :  { %617 = vmatmul.mubr.f32.gmra.mrb[32].mxu0 %v216_v4  ;;  %751 = vmatprep.mubr.f32.mxu1 %v325_v59  ;;  %v333_v4 = vld [vmem:[%s4577_s0 + $0x5a8] sm:$0xff]  ;;  %v219_v59 = vld [vmem:[%s4577_s0 + $0x218] sm:$0xff] }
  0x84   :  { %621 = vmatprep.mubr.f32.mxu0 %v221_v5  ;;  %v332_v5 = vld [vmem:[%s4577_s0 + $0x5a0] sm:$0xff] }
  0x86   :  { %752 = vmatmul.mubr.f32.gmra.mrb[22].mxu1 %v324_v60 }
  0x87   :  { %622 = vmatmul.mubr.f32.gmra.mrb[34].mxu0 %v220_v6  ;;  %756 = vmatprep.mubr.f32.mxu1 %v329_v63  ;;  %v166_v6 = vld [vmem:[%s4577_s0 + $0x70] sm:$0xff] }
  0x88   :  { %626 = vmatprep.mubr.f32.mxu0 %v225_v0  ;;  %v171_v0 = vld [vmem:[%s4577_s0 + $0x98] sm:$0xff]  ;;  %v218_v63 = vld [vmem:[%s4577_s0 + $0x210] sm:$0xff] }
  0x8a   :  { %757 = vmatmul.mubr.f32.gmra.mrb[24].mxu1 %v328_v1  ;;  %v1441_v1 = vld [vmem:[%s4578_s2 + $0x20] sm:$0xff] }
  0x8b   :  { %627 = vmatmul.mubr.f32.gmra.mrb[36].mxu0 %v224_v7  ;;  %761 = vmatprep.mubr.f32.mxu1 %v333_v4  ;;  %v337_v7 = vld [vmem:[%s4577_s0 + $0x5c8] sm:$0xff] }
  0x8c   :  { %631 = vmatprep.mubr.f32.mxu0 %v229_v8  ;;  %v336_v8 = vld [vmem:[%s4577_s0 + $0x5c0] sm:$0xff] }
  0x8e   :  { %762 = vmatmul.mubr.f32.gmra.mrb[26].mxu1 %v332_v5  ;;  %v389_v5 = vld [vmem:[%s4577_s0 + $0x768] sm:$0xff] }
  0x8f   :  { %632 = vmatmul.mubr.f32.gmra.mrb[38].mxu0 %v228_v9  ;;  %v170_v9 = vld [vmem:[%s4577_s0 + $0x90] sm:$0xff]  ;;  %766 = vmatprep.mubr.f32.mxu1 %v337_v7 }
  0x90   :  { %636 = vmatprep.mubr.f32.mxu0 %v233_v10  ;;  %v175_v10 = vld [vmem:[%s4577_s0 + $0xb8] sm:$0xff]  ;;  %v1443_v7 = vld [vmem:[%s4578_s2 + $0x30] sm:$0xff] }
  0x92   :  { %767 = vmatmul.mubr.f32.gmra.mrb[28].mxu1 %v336_v8  ;;  %v1444_v8 = vld [vmem:[%s4578_s2 + $0x38] sm:$0xff] }
  0x93   :  { %637 = vmatmul.mubr.f32.gmra.mrb[40].mxu0 %v232_v11  ;;  %v341_v11 = vld [vmem:[%s4577_s0 + $0x5e8] sm:$0xff] }
  0x94   :  { %641 = vmatprep.mubr.f32.mxu0 %v237_v12  ;;  %v340_v12 = vld [vmem:[%s4577_s0 + $0x5e0] sm:$0xff]  ;;  %771 = vmatprep.mubr.f32.mxu1 %v341_v11  ;;  %v393_v11 = vld [vmem:[%s4577_s0 + $0x788] sm:$0xff] }
  0x96   :  { %772 = vmatmul.mubr.f32.gmra.mrb[30].mxu1 %v340_v12  ;;  %v392_v12 = vld [vmem:[%s4577_s0 + $0x780] sm:$0xff] }
  0x97   :  { %642 = vmatmul.mubr.f32.gmra.mrb[42].mxu0 %v236_v13  ;;  %v174_v13 = vld [vmem:[%s4577_s0 + $0xb0] sm:$0xff]  ;;  %776 = vmatprep.mubr.f32.mxu1 %v345_v15  ;;  %v1446_v15 = vld [vmem:[%s4578_s2 + $0x48] sm:$0xff] }
  0x98   :  { %646 = vmatprep.mubr.f32.mxu0 %v241_v14  ;;  %v179_v14 = vld [vmem:[%s4577_s0 + $0xd8] sm:$0xff] }
  0x9a   :  { %777 = vmatmul.mubr.f32.gmra.mrb[32].mxu1 %v344_v16  ;;  %v231_v16 = vld [vmem:[%s4577_s0 + $0x278] sm:$0xff] }
  0x9b   :  { %647 = vmatmul.mubr.f32.gmra.mrb[44].mxu0 %v240_v17  ;;  %v178_v17 = vld [vmem:[%s4577_s0 + $0xd0] sm:$0xff]  ;;  %781 = vmatprep.mubr.f32.mxu1 %v349_v19  ;;  %v396_v19 = vld [vmem:[%s4577_s0 + $0x7a0] sm:$0xff] }
  0x9c   :  { %651 = vmatprep.mubr.f32.mxu0 %v245_v18  ;;  %v183_v18 = vld [vmem:[%s4577_s0 + $0xf8] sm:$0xff] }
  0x9e   :  { %782 = vmatmul.mubr.f32.gmra.mrb[34].mxu1 %v348_v20  ;;  %v230_v20 = vld [vmem:[%s4577_s0 + $0x270] sm:$0xff] }
  0x9f   :  { %652 = vmatmul.mubr.f32.gmra.mrb[46].mxu0 %v244_v21  ;;  %v182_v21 = vld [vmem:[%s4577_s0 + $0xf0] sm:$0xff]  ;;  %786 = vmatprep.mubr.f32.mxu1 %v353_v23  ;;  %v235_v23 = vld [vmem:[%s4577_s0 + $0x298] sm:$0xff] }
  0xa0   :  { %656 = vmatprep.mubr.f32.mxu0 %v249_v22  ;;  %v187_v22 = vld [vmem:[%s4577_s0 + $0x118] sm:$0xff] }
  0xa2   :  { %787 = vmatmul.mubr.f32.gmra.mrb[36].mxu1 %v352_v24 }
  0xa3   :  { %657 = vmatmul.mubr.f32.gmra.mrb[48].mxu0 %v248_v25  ;;  %v186_v25 = vld [vmem:[%s4577_s0 + $0x110] sm:$0xff]  ;;  %791 = vmatprep.mubr.f32.mxu1 %v357_v27 }
  0xa4   :  { %661 = vmatprep.mubr.f32.mxu0 %v253_v26  ;;  %v191_v26 = vld [vmem:[%s4577_s0 + $0x138] sm:$0xff]  ;;  %v234_v27 = vld [vmem:[%s4577_s0 + $0x290] sm:$0xff] }
  0xa6   :  { %792 = vmatmul.mubr.f32.gmra.mrb[38].mxu1 %v356_v28  ;;  %v1449_v28 = vld [vmem:[%s4578_s2 + $0x60] sm:$0xff] }
  0xa7   :  { %662 = vmatmul.mubr.f32.gmra.mrb[50].mxu0 %v252_v29  ;;  %v190_v29 = vld [vmem:[%s4577_s0 + $0x130] sm:$0xff]  ;;  %796 = vmatprep.mubr.f32.mxu1 %v361_v31 }
  0xa8   :  { %666 = vmatprep.mubr.f32.mxu0 %v257_v30  ;;  %v195_v30 = vld [vmem:[%s4577_s0 + $0x158] sm:$0xff] }
  0xaa   :  { %797 = vmatmul.mubr.f32.gmra.mrb[40].mxu1 %v360_v32  ;;  %v405_v32 = vld [vmem:[%s4577_s0 + $0x7e8] sm:$0xff] }
  0xab   :  { %667 = vmatmul.mubr.f32.gmra.mrb[52].mxu0 %v256_v33  ;;  %v194_v33 = vld [vmem:[%s4577_s0 + $0x150] sm:$0xff]  ;;  %801 = vmatprep.mubr.f32.mxu1 %v365_v35 }
  0xac   :  { %671 = vmatprep.mubr.f32.mxu0 %v261_v34  ;;  %v199_v34 = vld [vmem:[%s4577_s0 + $0x178] sm:$0xff]  ;;  %v1451_v35 = vld [vmem:[%s4578_s2 + $0x70] sm:$0xff] }
  0xae   :  { %802 = vmatmul.mubr.f32.gmra.mrb[42].mxu1 %v364_v36  ;;  %v1452_v36 = vld [vmem:[%s4578_s2 + $0x78] sm:$0xff] }
  0xaf   :  { %672 = vmatmul.mubr.f32.gmra.mrb[54].mxu0 %v260_v37  ;;  %v198_v37 = vld [vmem:[%s4577_s0 + $0x170] sm:$0xff]  ;;  %806 = vmatprep.mubr.f32.mxu1 %v369_v39 }
  0xb0   :  { %676 = vmatprep.mubr.f32.mxu0 %v265_v38  ;;  %v203_v38 = vld [vmem:[%s4577_s0 + $0x198] sm:$0xff]  ;;  %v242_v39 = vld [vmem:[%s4577_s0 + $0x2d0] sm:$0xff] }
  0xb2   :  { %807 = vmatmul.mubr.f32.gmra.mrb[44].mxu1 %v368_v40  ;;  %v247_v40 = vld [vmem:[%s4577_s0 + $0x2f8] sm:$0xff] }
  0xb3   :  { %677 = vmatmul.mubr.f32.gmra.mrb[56].mxu0 %v264_v41  ;;  %v202_v41 = vld [vmem:[%s4577_s0 + $0x190] sm:$0xff]  ;;  %811 = vmatprep.mubr.f32.mxu1 %v373_v43 }
  0xb4   :  { %681 = vmatprep.mubr.f32.mxu0 %v269_v42  ;;  %v207_v42 = vld [vmem:[%s4577_s0 + $0x1b8] sm:$0xff]  ;;  %v250_v43 = vld [vmem:[%s4577_s0 + $0x310] sm:$0xff] }
  0xb6   :  { %812 = vmatmul.mubr.f32.gmra.mrb[46].mxu1 %v372_v44  ;;  %v255_v44 = vld [vmem:[%s4577_s0 + $0x338] sm:$0xff] }
  0xb7   :  { %682 = vmatmul.mubr.f32.gmra.mrb[58].mxu0 %v268_v45  ;;  %v206_v45 = vld [vmem:[%s4577_s0 + $0x1b0] sm:$0xff]  ;;  %816 = vmatprep.mubr.f32.mxu1 %v377_v47 }
  0xb8   :  { %686 = vmatprep.mubr.f32.mxu0 %v273_v46  ;;  %v211_v46 = vld [vmem:[%s4577_s0 + $0x1d8] sm:$0xff]  ;;  %v258_v47 = vld [vmem:[%s4577_s0 + $0x350] sm:$0xff] }
  0xba   :  { %817 = vmatmul.mubr.f32.gmra.mrb[48].mxu1 %v376_v48  ;;  %v263_v48 = vld [vmem:[%s4577_s0 + $0x378] sm:$0xff] }
  0xbb   :  { %687 = vmatmul.mubr.f32.gmra.mrb[60].mxu0 %v272_v49  ;;  %v210_v49 = vld [vmem:[%s4577_s0 + $0x1d0] sm:$0xff] }
  0xbc   :  { %691 = vmatprep.mubr.f32.mxu0 %v277_v50  ;;  %v1437_v50 = vld [vmem:[%s4578_s2] sm:$0xff] }
  0xbf   :  { %692 = vmatmul.mubr.f32.gmra.mrb[62].mxu0 %v276_v53  ;;  %v2891_v53 = vpack.c.bf16 %v1438_v51, %v1437_v50  ;;  %v267_v50 = vld [vmem:[%s4577_s0 + $0x398] sm:$0xff]  ;;  %v266_v51 = vld [vmem:[%s4577_s0 + $0x390] sm:$0xff] }
  0xc0   :  { %921 = vmatprep.mubr.f32.mxu0 %v155_v54  ;;  %v381_v54 = vld [vmem:[%s4577_s0 + $0x728] sm:$0xff] }
  0xc1   :  { %2892 = vmatprep.subr.bf16.mxu1 %v2891_v53  ;;  %821 = vmatprep.mubr.f32.mxu1 %v381_v54  ;;  %v275_v54 = vld [vmem:[%s4577_s0 + $0x3d8] sm:$0xff] }
  0xc2   :  { %2894 = vmatpush3.bf16.msra.mxu1 %v2891_v53  ;;  %v270_v53 = vld [vmem:[%s4577_s0 + $0x3b0] sm:$0xff] }
  0xc3   :  { %922 = vmatmul.mubr.f32.vlgmr.msra.gmra.mrb[0].mxu0 %v154_v57  ;;  %v1439_v57 = vld [vmem:[%s4578_s2 + $0x10] sm:$0xff]  ;;  %822 = vmatmul.mubr.f32.gmra.mrb[50].mxu1 %v380_v55 }
  0xc4   :  { %926 = vmatprep.mubr.f32.mxu0 %v159_v58  ;;  %v1440_v58 = vld [vmem:[%s4578_s2 + $0x18] sm:$0xff]  ;;  %v274_v55 = vld [vmem:[%s4577_s0 + $0x3d0] sm:$0xff] }
  0xc5   :  { %v2895_v60 = vpack.c.bf16 %v1440_v58, %v1439_v57  ;;  %v278_v57 = vld [vmem:[%s4577_s0 + $0x3f0] sm:$0xff]  ;;  %v283_v58 = vld [vmem:[%s4577_s0 + $0x418] sm:$0xff] }
  0xc7   :  { %927 = vmatmul.mubr.f32.gmra.mrb[2].mxu0 %v158_v61  ;;  %2896 = vmatprep.subr.bf16.mxu1 %v2895_v60  ;;  %v385_v61 = vld [vmem:[%s4577_s0 + $0x748] sm:$0xff] }
  0xc8   :  { %931 = vmatprep.mubr.f32.mxu0 %v163_v62  ;;  %v384_v62 = vld [vmem:[%s4577_s0 + $0x740] sm:$0xff]  ;;  %2898 = vmatpush3.bf16.msra.mxu1 %v2895_v60  ;;  %v287_v60 = vld [vmem:[%s4577_s0 + $0x438] sm:$0xff] }
  0xc9   :  { %826 = vmatprep.mubr.f32.mxu1 %v385_v61  ;;  %v286_v61 = vld [vmem:[%s4577_s0 + $0x430] sm:$0xff] }
  0xca   :  { %827 = vmatmul.mubr.f32.gmra.mrb[52].mxu1 %v384_v62  ;;  %v291_v62 = vld [vmem:[%s4577_s0 + $0x458] sm:$0xff] }
  0xcb   :  { %932 = vmatmul.mubr.f32.gmra.mrb[4].mxu0 %v162_v2  ;;  %v1442_v2 = vld [vmem:[%s4578_s2 + $0x28] sm:$0xff]  ;;  %831 = vmatprep.mubr.f32.mxu1 %v389_v5  ;;  %v303_v5 = vld [vmem:[%s4577_s0 + $0x4b8] sm:$0xff] }
  0xcc   :  { %936 = vmatprep.mubr.f32.mxu0 %v167_v3  ;;  %v223_v3 = vld [vmem:[%s4577_s0 + $0x238] sm:$0xff]  ;;  %v2899_v4 = vpack.c.bf16 %v1442_v2, %v1441_v1  ;;  %v294_v2 = vld [vmem:[%s4577_s0 + $0x470] sm:$0xff] }
  0xcd   :  { %v295_v1 = vld [vmem:[%s4577_s0 + $0x478] sm:$0xff] }
  0xce   :  { %2900 = vmatprep.subr.bf16.mxu1 %v2899_v4 }
  0xcf   :  { %937 = vmatmul.mubr.f32.gmra.mrb[6].mxu0 %v166_v6  ;;  %v388_v6 = vld [vmem:[%s4577_s0 + $0x760] sm:$0xff]  ;;  %2902 = vmatpush3.bf16.msra.mxu1 %v2899_v4  ;;  %v298_v4 = vld [vmem:[%s4577_s0 + $0x490] sm:$0xff] }
  0xd0   :  { %941 = vmatprep.mubr.f32.mxu0 %v171_v0  ;;  %v222_v0 = vld [vmem:[%s4577_s0 + $0x230] sm:$0xff]  ;;  %832 = vmatmul.mubr.f32.gmra.mrb[54].mxu1 %v388_v6 }
  0xd1   :  { %836 = vmatprep.mubr.f32.mxu1 %v393_v11  ;;  %v302_v6 = vld [vmem:[%s4577_s0 + $0x4b0] sm:$0xff] }
  0xd2   :  { %v314_v11 = vld [vmem:[%s4577_s0 + $0x510] sm:$0xff] }
  0xd3   :  { %942 = vmatmul.mubr.f32.gmra.mrb[8].mxu0 %v170_v9  ;;  %v227_v9 = vld [vmem:[%s4577_s0 + $0x258] sm:$0xff] }
  0xd4   :  { %946 = vmatprep.mubr.f32.mxu0 %v175_v10  ;;  %v2903_v10 = vpack.c.bf16 %v1444_v8, %v1443_v7  ;;  %837 = vmatmul.mubr.f32.gmra.mrb[56].mxu1 %v392_v12  ;;  %v306_v7 = vld [vmem:[%s4577_s0 + $0x4d0] sm:$0xff]  ;;  %v311_v8 = vld [vmem:[%s4577_s0 + $0x4f8] sm:$0xff] }
  0xd5   :  { %v319_v12 = vld [vmem:[%s4577_s0 + $0x538] sm:$0xff] }
  0xd6   :  { %2904 = vmatprep.subr.bf16.mxu1 %v2903_v10 }
  0xd7   :  { %947 = vmatmul.mubr.f32.gmra.mrb[10].mxu0 %v174_v13  ;;  %v226_v13 = vld [vmem:[%s4577_s0 + $0x250] sm:$0xff]  ;;  %2906 = vmatpush3.bf16.msra.mxu1 %v2903_v10  ;;  %v315_v10 = vld [vmem:[%s4577_s0 + $0x518] sm:$0xff] }
  0xd8   :  { %951 = vmatprep.mubr.f32.mxu0 %v179_v14  ;;  %v1445_v14 = vld [vmem:[%s4578_s2 + $0x40] sm:$0xff] }
  0xdb   :  { %952 = vmatmul.mubr.f32.gmra.mrb[12].mxu0 %v178_v17  ;;  %v2907_v17 = vpack.c.bf16 %v1446_v15, %v1445_v14  ;;  %v323_v14 = vld [vmem:[%s4577_s0 + $0x558] sm:$0xff]  ;;  %v322_v15 = vld [vmem:[%s4577_s0 + $0x550] sm:$0xff] }
  0xdc   :  { %956 = vmatprep.mubr.f32.mxu0 %v183_v18  ;;  %v397_v18 = vld [vmem:[%s4577_s0 + $0x7a8] sm:$0xff] }
  0xdd   :  { %2908 = vmatprep.subr.bf16.mxu1 %v2907_v17  ;;  %841 = vmatprep.mubr.f32.mxu1 %v397_v18  ;;  %v331_v18 = vld [vmem:[%s4577_s0 + $0x598] sm:$0xff] }
  0xde   :  { %2910 = vmatpush3.bf16.msra.mxu1 %v2907_v17  ;;  %v326_v17 = vld [vmem:[%s4577_s0 + $0x570] sm:$0xff] }
  0xdf   :  { %957 = vmatmul.mubr.f32.gmra.mrb[14].mxu0 %v182_v21  ;;  %v1447_v21 = vld [vmem:[%s4578_s2 + $0x50] sm:$0xff]  ;;  %842 = vmatmul.mubr.f32.gmra.mrb[58].mxu1 %v396_v19 }
  0xe0   :  { %961 = vmatprep.mubr.f32.mxu0 %v187_v22  ;;  %v1448_v22 = vld [vmem:[%s4578_s2 + $0x58] sm:$0xff]  ;;  %v330_v19 = vld [vmem:[%s4577_s0 + $0x590] sm:$0xff] }
  0xe1   :  { %v2911_v24 = vpack.c.bf16 %v1448_v22, %v1447_v21  ;;  %v334_v21 = vld [vmem:[%s4577_s0 + $0x5b0] sm:$0xff]  ;;  %v339_v22 = vld [vmem:[%s4577_s0 + $0x5d8] sm:$0xff] }
  0xe3   :  { %962 = vmatmul.mubr.f32.gmra.mrb[16].mxu0 %v186_v25  ;;  %2912 = vmatprep.subr.bf16.mxu1 %v2911_v24  ;;  %v401_v25 = vld [vmem:[%s4577_s0 + $0x7c8] sm:$0xff] }
  0xe4   :  { %966 = vmatprep.mubr.f32.mxu0 %v191_v26  ;;  %v400_v26 = vld [vmem:[%s4577_s0 + $0x7c0] sm:$0xff]  ;;  %2914 = vmatpush3.bf16.msra.mxu1 %v2911_v24  ;;  %v343_v24 = vld [vmem:[%s4577_s0 + $0x5f8] sm:$0xff] }
  0xe5   :  { %846 = vmatprep.mubr.f32.mxu1 %v401_v25  ;;  %v342_v25 = vld [vmem:[%s4577_s0 + $0x5f0] sm:$0xff] }
  0xe6   :  { %847 = vmatmul.mubr.f32.gmra.mrb[60].mxu1 %v400_v26  ;;  %v347_v26 = vld [vmem:[%s4577_s0 + $0x618] sm:$0xff] }
  0xe7   :  { %967 = vmatmul.mubr.f32.gmra.mrb[18].mxu0 %v190_v29  ;;  %v1450_v29 = vld [vmem:[%s4578_s2 + $0x68] sm:$0xff]  ;;  %851 = vmatprep.mubr.f32.mxu1 %v405_v32  ;;  %v359_v32 = vld [vmem:[%s4577_s0 + $0x678] sm:$0xff] }
  0xe8   :  { %971 = vmatprep.mubr.f32.mxu0 %v195_v30  ;;  %v239_v30 = vld [vmem:[%s4577_s0 + $0x2b8] sm:$0xff]  ;;  %v2915_v31 = vpack.c.bf16 %v1450_v29, %v1449_v28  ;;  %v350_v29 = vld [vmem:[%s4577_s0 + $0x630] sm:$0xff] }
  0xe9   :  { %v351_v28 = vld [vmem:[%s4577_s0 + $0x638] sm:$0xff] }
  0xea   :  { %2916 = vmatprep.subr.bf16.mxu1 %v2915_v31 }
  0xeb   :  { %972 = vmatmul.mubr.f32.gmra.mrb[20].mxu0 %v194_v33  ;;  %v404_v33 = vld [vmem:[%s4577_s0 + $0x7e0] sm:$0xff]  ;;  %2918 = vmatpush3.bf16.msra.mxu1 %v2915_v31  ;;  %v354_v31 = vld [vmem:[%s4577_s0 + $0x650] sm:$0xff] }
  0xec   :  { %976 = vmatprep.mubr.f32.mxu0 %v199_v34  ;;  %v238_v34 = vld [vmem:[%s4577_s0 + $0x2b0] sm:$0xff]  ;;  %852 = vmatmul.mubr.f32.gmra.mrb[62].mxu1 %v404_v33 }
  0xed   :  { %v358_v33 = vld [vmem:[%s4577_s0 + $0x670] sm:$0xff] }
  0xef   :  { %977 = vmatmul.mubr.f32.gmra.mrb[22].mxu0 %v198_v37  ;;  %v243_v37 = vld [vmem:[%s4577_s0 + $0x2d8] sm:$0xff] }
  0xf0   :  { %981 = vmatprep.mubr.f32.mxu0 %v203_v38  ;;  %v2919_v38 = vpack.c.bf16 %v1452_v36, %v1451_v35  ;;  %v362_v35 = vld [vmem:[%s4577_s0 + $0x690] sm:$0xff]  ;;  %v367_v36 = vld [vmem:[%s4577_s0 + $0x6b8] sm:$0xff] }
  0xf2   :  { %2920 = vmatprep.subr.bf16.mxu1 %v2919_v38 }
  0xf3   :  { %982 = vmatmul.mubr.f32.gmra.mrb[24].mxu0 %v202_v41  ;;  %2922 = vmatpush3.bf16.msra.mxu1 %v2919_v38  ;;  %v246_v41 = vld [vmem:[%s4577_s0 + $0x2f0] sm:$0xff] }
  0xf4   :  { %986 = vmatprep.mubr.f32.mxu0 %v207_v42  ;;  %v251_v42 = vld [vmem:[%s4577_s0 + $0x318] sm:$0xff]  ;;  %v366_v38 = vld [vmem:[%s4577_s0 + $0x6b0] sm:$0xff] }
  0xf7   :  { %987 = vmatmul.mubr.f32.gmra.mrb[26].mxu0 %v206_v45  ;;  %v254_v45 = vld [vmem:[%s4577_s0 + $0x330] sm:$0xff] }
  0xf8   :  { %991 = vmatprep.mubr.f32.mxu0 %v211_v46  ;;  %v259_v46 = vld [vmem:[%s4577_s0 + $0x358] sm:$0xff] }
  0xfb   :  { %992 = vmatmul.mubr.f32.gmra.mrb[28].mxu0 %v210_v49  ;;  %v262_v49 = vld [vmem:[%s4577_s0 + $0x370] sm:$0xff] }
  0xfc   :  { %996 = vmatprep.mubr.f32.mxu0 %v215_v52  ;;  %v271_v52 = vld [vmem:[%s4577_s0 + $0x3b8] sm:$0xff] }
  0xff   :  { %997 = vmatmul.mubr.f32.gmra.mrb[30].mxu0 %v214_v56  ;;  %v279_v56 = vld [vmem:[%s4577_s0 + $0x3f8] sm:$0xff] }
 0x100   :  { %1001 = vmatprep.mubr.f32.mxu0 %v219_v59  ;;  %v282_v59 = vld [vmem:[%s4577_s0 + $0x410] sm:$0xff] }
 0x103   :  { %1002 = vmatmul.mubr.f32.gmra.mrb[32].mxu0 %v218_v63  ;;  %v290_v63 = vld [vmem:[%s4577_s0 + $0x450] sm:$0xff] }
 0x104   :  { %1006 = vmatprep.mubr.f32.mxu0 %v223_v3  ;;  %v299_v3 = vld [vmem:[%s4577_s0 + $0x498] sm:$0xff] }
 0x107   :  { %1007 = vmatmul.mubr.f32.gmra.mrb[34].mxu0 %v222_v0  ;;  %v307_v0 = vld [vmem:[%s4577_s0 + $0x4d8] sm:$0xff] }
 0x108   :  { %1011 = vmatprep.mubr.f32.mxu0 %v227_v9  ;;  %v310_v9 = vld [vmem:[%s4577_s0 + $0x4f0] sm:$0xff] }
 0x10b   :  { %1012 = vmatmul.mubr.f32.gmra.mrb[36].mxu0 %v226_v13  ;;  %v318_v13 = vld [vmem:[%s4577_s0 + $0x530] sm:$0xff] }
 0x10c   :  { %1016 = vmatprep.mubr.f32.mxu0 %v231_v16  ;;  %v327_v16 = vld [vmem:[%s4577_s0 + $0x578] sm:$0xff] }
 0x10f   :  { %1017 = vmatmul.mubr.f32.gmra.mrb[38].mxu0 %v230_v20  ;;  %v335_v20 = vld [vmem:[%s4577_s0 + $0x5b8] sm:$0xff] }
 0x110   :  { %1021 = vmatprep.mubr.f32.mxu0 %v235_v23  ;;  %v338_v23 = vld [vmem:[%s4577_s0 + $0x5d0] sm:$0xff] }
 0x113   :  { %1022 = vmatmul.mubr.f32.gmra.mrb[40].mxu0 %v234_v27  ;;  %v346_v27 = vld [vmem:[%s4577_s0 + $0x610] sm:$0xff] }
 0x114   :  { %1026 = vmatprep.mubr.f32.mxu0 %v239_v30  ;;  %v355_v30 = vld [vmem:[%s4577_s0 + $0x658] sm:$0xff] }
 0x117   :  { %1027 = vmatmul.mubr.f32.gmra.mrb[42].mxu0 %v238_v34  ;;  %v363_v34 = vld [vmem:[%s4577_s0 + $0x698] sm:$0xff] }
 0x118   :  { %1031 = vmatprep.mubr.f32.mxu0 %v243_v37 }
 0x11b   :  { %1032 = vmatmul.mubr.f32.gmra.mrb[44].mxu0 %v242_v39 }
 0x11c   :  { %1036 = vmatprep.mubr.f32.mxu0 %v247_v40  ;;  %v371_v40 = vld [vmem:[%s4577_s0 + $0x6d8] sm:$0xff] }
 0x11f   :  { %1037 = vmatmul.mubr.f32.gmra.mrb[46].mxu0 %v246_v41 }
 0x120   :  { %1041 = vmatprep.mubr.f32.mxu0 %v251_v42 }
 0x123   :  { %1042 = vmatmul.mubr.f32.gmra.mrb[48].mxu0 %v250_v43 }
 0x124   :  { %1046 = vmatprep.mubr.f32.mxu0 %v255_v44  ;;  %v370_v44 = vld [vmem:[%s4577_s0 + $0x6d0] sm:$0xff] }
 0x127   :  { %1047 = vmatmul.mubr.f32.gmra.mrb[50].mxu0 %v254_v45 }
 0x128   :  { %1051 = vmatprep.mubr.f32.mxu0 %v259_v46  ;;  %v375_v46 = vld [vmem:[%s4577_s0 + $0x6f8] sm:$0xff] }
 0x12b   :  { %1052 = vmatmul.mubr.f32.gmra.mrb[52].mxu0 %v258_v47 }
 0x12c   :  { %1056 = vmatprep.mubr.f32.mxu0 %v263_v48 }
 0x12d   :  { %v4108_v37 = vpop.f32.mrb[0].mxu1 }
 0x12e   :  { %v700_v39 = vpop.f32.mrb[1].mxu1 }
 0x12f   :  { %1057 = vmatmul.mubr.f32.gmra.mrb[54].mxu0 %v262_v49  ;;  %v374_v49 = vld [vmem:[%s4577_s0 + $0x6f0] sm:$0xff] }
 0x130   :  { %1061 = vmatprep.mubr.f32.mxu0 %v267_v50  ;;  %v379_v50 = vld [vmem:[%s4577_s0 + $0x718] sm:$0xff] }
 0x131   :  { %v4116_v43 = vpop.f32.mrb[2].mxu1 }
 0x132   :  { %v705_v45 = vpop.f32.mrb[3].mxu1 }
 0x133   :  { %1062 = vmatmul.mubr.f32.gmra.mrb[56].mxu0 %v266_v51 }
 0x134   :  { %1066 = vmatprep.mubr.f32.mxu0 %v271_v52 }
 0x135   :  { %v4130_v51 = vpop.f32.mrb[4].mxu1 }
 0x137   :  { %1067 = vmatmul.mubr.f32.gmra.mrb[58].mxu0 %v270_v53  ;;  %v710_v53 = vpop.f32.mrb[5].mxu1 }
 0x138   :  { %1071 = vmatprep.mubr.f32.mxu0 %v275_v54 }
 0x13b   :  { %1072 = vmatmul.mubr.f32.gmra.mrb[60].mxu0 %v274_v55  ;;  %v4132_v55 = vpop.f32.mrb[6].mxu1 }
 0x13c   :  { %1076 = vmatprep.mubr.f32.mxu0 %v279_v56  ;;  %v378_v56 = vld [vmem:[%s4577_s0 + $0x710] sm:$0xff] }
 0x13f   :  { %1077 = vmatmul.mubr.f32.gmra.mrb[62].mxu0 %v278_v57  ;;  %v715_v57 = vpop.f32.mrb[7].mxu1 }
 0x140   :  { %1081 = vmatprep.mubr.f32.mxu0 %v283_v58  ;;  %v383_v58 = vld [vmem:[%s4577_s0 + $0x738] sm:$0xff] }
 0x143   :  { %1082 = vmatmul.mubr.f32.gmra.mrb[64].mxu0 %v282_v59 }
 0x144   :  { %1086 = vmatprep.mubr.f32.mxu0 %v287_v60 }
 0x147   :  { %1087 = vmatmul.mubr.f32.gmra.mrb[66].mxu0 %v286_v61  ;;  %v382_v61 = vld [vmem:[%s4577_s0 + $0x730] sm:$0xff] }
 0x148   :  { %1091 = vmatprep.mubr.f32.mxu0 %v291_v62  ;;  %v387_v62 = vld [vmem:[%s4577_s0 + $0x758] sm:$0xff] }
 0x14b   :  { %1092 = vmatmul.mubr.f32.gmra.mrb[68].mxu0 %v290_v63  ;;  %v4146_v63 = vpop.f32.mrb[8].mxu1 }
 0x14c   :  { %1096 = vmatprep.mubr.f32.mxu0 %v295_v1 }
 0x14f   :  { %1097 = vmatmul.mubr.f32.gmra.mrb[70].mxu0 %v294_v2  ;;  %v720_v2 = vpop.f32.mrb[9].mxu1 }
 0x150   :  { %1101 = vmatprep.mubr.f32.mxu0 %v299_v3 }
 0x153   :  { %1102 = vmatmul.mubr.f32.gmra.mrb[72].mxu0 %v298_v4  ;;  %v4148_v4 = vpop.f32.mrb[10].mxu1 }
 0x154   :  { %1106 = vmatprep.mubr.f32.mxu0 %v303_v5  ;;  %v386_v5 = vld [vmem:[%s4577_s0 + $0x750] sm:$0xff] }
 0x157   :  { %1107 = vmatmul.mubr.f32.gmra.mrb[74].mxu0 %v302_v6  ;;  %v725_v6 = vpop.f32.mrb[11].mxu1 }
 0x158   :  { %1111 = vmatprep.mubr.f32.mxu0 %v307_v0  ;;  %v391_v0 = vld [vmem:[%s4577_s0 + $0x778] sm:$0xff] }
 0x15b   :  { %1112 = vmatmul.mubr.f32.gmra.mrb[76].mxu0 %v306_v7 }
 0x15c   :  { %1116 = vmatprep.mubr.f32.mxu0 %v311_v8 }
 0x15f   :  { %1117 = vmatmul.mubr.f32.gmra.mrb[78].mxu0 %v310_v9  ;;  %v390_v9 = vld [vmem:[%s4577_s0 + $0x770] sm:$0xff] }
 0x160   :  { %1121 = vmatprep.mubr.f32.mxu0 %v315_v10  ;;  %v395_v10 = vld [vmem:[%s4577_s0 + $0x798] sm:$0xff] }
 0x163   :  { %1122 = vmatmul.mubr.f32.gmra.mrb[80].mxu0 %v314_v11  ;;  %v4162_v11 = vpop.f32.mrb[12].mxu1 }
 0x164   :  { %1126 = vmatprep.mubr.f32.mxu0 %v319_v12 }
 0x167   :  { %1127 = vmatmul.mubr.f32.gmra.mrb[82].mxu0 %v318_v13  ;;  %v730_v13 = vpop.f32.mrb[13].mxu1 }
 0x168   :  { %1131 = vmatprep.mubr.f32.mxu0 %v323_v14 }
 0x16b   :  { %1132 = vmatmul.mubr.f32.gmra.mrb[84].mxu0 %v322_v15  ;;  %v4164_v15 = vpop.f32.mrb[14].mxu1 }
 0x16c   :  { %1136 = vmatprep.mubr.f32.mxu0 %v327_v16  ;;  %v394_v16 = vld [vmem:[%s4577_s0 + $0x790] sm:$0xff] }
 0x16f   :  { %1137 = vmatmul.mubr.f32.gmra.mrb[86].mxu0 %v326_v17  ;;  %v735_v17 = vpop.f32.mrb[15].mxu1 }
 0x170   :  { %1141 = vmatprep.mubr.f32.mxu0 %v331_v18  ;;  %v399_v18 = vld [vmem:[%s4577_s0 + $0x7b8] sm:$0xff] }
 0x173   :  { %1142 = vmatmul.mubr.f32.gmra.mrb[88].mxu0 %v330_v19 }
 0x174   :  { %1146 = vmatprep.mubr.f32.mxu0 %v335_v20 }
 0x177   :  { %1147 = vmatmul.mubr.f32.gmra.mrb[90].mxu0 %v334_v21  ;;  %v398_v21 = vld [vmem:[%s4577_s0 + $0x7b0] sm:$0xff] }
 0x178   :  { %1151 = vmatprep.mubr.f32.mxu0 %v339_v22  ;;  %v403_v22 = vld [vmem:[%s4577_s0 + $0x7d8] sm:$0xff] }
 0x17b   :  { %1152 = vmatmul.mubr.f32.gmra.mrb[92].mxu0 %v338_v23  ;;  %v4178_v23 = vpop.f32.mrb[16].mxu1 }
 0x17c   :  { %1156 = vmatprep.mubr.f32.mxu0 %v343_v24 }
 0x17f   :  { %1157 = vmatmul.mubr.f32.gmra.mrb[94].mxu0 %v342_v25  ;;  %v740_v25 = vpop.f32.mrb[17].mxu1 }
 0x180   :  { %1161 = vmatprep.mubr.f32.mxu0 %v347_v26 }
 0x183   :  { %1162 = vmatmul.mubr.f32.gmra.mrb[96].mxu0 %v346_v27  ;;  %v4180_v27 = vpop.f32.mrb[18].mxu1 }
 0x184   :  { %1166 = vmatprep.mubr.f32.mxu0 %v351_v28  ;;  %v402_v28 = vld [vmem:[%s4577_s0 + $0x7d0] sm:$0xff] }
 0x187   :  { %1167 = vmatmul.mubr.f32.gmra.mrb[98].mxu0 %v350_v29  ;;  %v745_v29 = vpop.f32.mrb[19].mxu1 }
 0x188   :  { %1171 = vmatprep.mubr.f32.mxu0 %v355_v30  ;;  %v407_v30 = vld [vmem:[%s4577_s0 + $0x7f8] sm:$0xff] }
 0x18b   :  { %1172 = vmatmul.mubr.f32.gmra.mrb[100].mxu0 %v354_v31 }
 0x18c   :  { %1176 = vmatprep.mubr.f32.mxu0 %v359_v32 }
 0x18f   :  { %1177 = vmatmul.mubr.f32.gmra.mrb[102].mxu0 %v358_v33  ;;  %v406_v33 = vld [vmem:[%s4577_s0 + $0x7f0] sm:$0xff] }
 0x190   :  { %1181 = vmatprep.mubr.f32.mxu0 %v363_v34  ;;  %v4191_v34 = vpop.f32.mrb[20].mxu1 }
 0x193   :  { %1182 = vmatmul.mubr.f32.gmra.mrb[104].mxu0 %v362_v35 }
 0x194   :  { %1186 = vmatprep.mubr.f32.mxu0 %v367_v36  ;;  %v750_v36 = vpop.f32.mrb[21].mxu1 }
 0x195   :  { %v4193_v39 = vpop.f32.mrb[22].mxu1 }
 0x196   :  { %v923_v41 = vpop.f32.mrb[0].mxu0 }
 0x197   :  { %v925_v42 = vpop.f32.mrb[1].mxu0  ;;  %1187 = vmatmul.mubr.f32.gmra.mrb[106].mxu0 %v366_v38  ;;  %2571 = vmatprep.mubr.f32.mxu1 %v923_v41 }
 0x198   :  { %1191 = vmatprep.mubr.f32.mxu0 %v371_v40  ;;  %v755_v40 = vpop.f32.mrb[23].mxu1 }
 0x19a   :  { %v928_v47 = vpop.f32.mrb[2].mxu0 }
 0x19b   :  { %v930_v48 = vpop.f32.mrb[3].mxu0  ;;  %1192 = vmatmul.mubr.f32.gmra.mrb[108].mxu0 %v370_v44  ;;  %2572 = vmatmul.mubr.f32.vlgmr.msra.gmra.mrb[64].mxu1 %v928_v47  ;;  %v4195_v44 = vpop.f32.mrb[24].mxu1 }
 0x19c   :  { %1196 = vmatprep.mubr.f32.mxu0 %v375_v46  ;;  %v760_v46 = vpop.f32.mrb[25].mxu1 }
 0x19d   :  { %v4197_v48 = vpop.f32.mrb[26].mxu1 }
 0x19e   :  { %v933_v52 = vpop.f32.mrb[4].mxu0 }
 0x19f   :  { %v935_v54 = vpop.f32.mrb[5].mxu0  ;;  %1197 = vmatmul.mubr.f32.gmra.mrb[110].mxu0 %v374_v49  ;;  %2574 = vmatprep.mubr.f32.mxu1 %v933_v52  ;;  %v765_v49 = vpop.f32.mrb[27].mxu1 }
 0x1a0   :  { %1201 = vmatprep.mubr.f32.mxu0 %v379_v50  ;;  %v4199_v50 = vpop.f32.mrb[28].mxu1 }
 0x1a1   :  { %v770_v53 = vpop.f32.mrb[29].mxu1 }
 0x1a2   :  { %v938_v59 = vpop.f32.mrb[6].mxu0 }
 0x1a3   :  { %v940_v60 = vpop.f32.mrb[7].mxu0  ;;  %1202 = vmatmul.mubr.f32.gmra.mrb[112].mxu0 %v378_v56  ;;  %2575 = vmatmul.mubr.f32.gmra.mrb[66].mxu1 %v938_v59  ;;  %v4201_v56 = vpop.f32.mrb[30].mxu1 }
 0x1a4   :  { %1206 = vmatprep.mubr.f32.mxu0 %v383_v58  ;;  %v775_v57 = vpop.f32.mrb[31].mxu1 }
 0x1a5   :  { %v4203_v58 = vpop.f32.mrb[32].mxu1 }
 0x1a6   :  { %v943_v1 = vpop.f32.mrb[8].mxu0  ;;  %v780_v60 = vpop.f32.mrb[33].mxu1 }
 0x1a7   :  { %v945_v3 = vpop.f32.mrb[9].mxu0  ;;  %1207 = vmatmul.mubr.f32.gmra.mrb[114].mxu0 %v382_v61  ;;  %2577 = vmatprep.mubr.f32.mxu1 %v943_v1 }
 0x1a8   :  { %1211 = vmatprep.mubr.f32.mxu0 %v387_v62  ;;  %v4205_v62 = vpop.f32.mrb[34].mxu1 }
 0x1a9   :  { %v785_v1 = vpop.f32.mrb[35].mxu1 }
 0x1aa   :  { %v948_v7 = vpop.f32.mrb[10].mxu0  ;;  %v4207_v2 = vpop.f32.mrb[36].mxu1  ;;  %v1903_v1 = vld [vmem:[%s4579_s3 + $0x8] sm:$0xff] }
 0x1ab   :  { %v950_v8 = vpop.f32.mrb[11].mxu0  ;;  %1212 = vmatmul.mubr.f32.gmra.mrb[116].mxu0 %v386_v5  ;;  %2578 = vmatmul.mubr.f32.gmra.mrb[68].mxu1 %v948_v7  ;;  %v790_v5 = vpop.f32.mrb[37].mxu1 }
 0x1ac   :  { %1216 = vmatprep.mubr.f32.mxu0 %v391_v0  ;;  %v4209_v0 = vpop.f32.mrb[38].mxu1 }
 0x1ad   :  { %v795_v7 = vpop.f32.mrb[39].mxu1 }
 0x1ae   :  { %v953_v12 = vpop.f32.mrb[12].mxu0  ;;  %v4211_v8 = vpop.f32.mrb[40].mxu1 }
 0x1af   :  { %v955_v14 = vpop.f32.mrb[13].mxu0  ;;  %1217 = vmatmul.mubr.f32.gmra.mrb[118].mxu0 %v390_v9  ;;  %2580 = vmatprep.mubr.f32.mxu1 %v953_v12 }
 0x1b0   :  { %1221 = vmatprep.mubr.f32.mxu0 %v395_v10  ;;  %v800_v10 = vpop.f32.mrb[41].mxu1 }
 0x1b1   :  { %v4213_v13 = vpop.f32.mrb[42].mxu1 }
 0x1b2   :  { %v958_v19 = vpop.f32.mrb[14].mxu0  ;;  %v805_v14 = vpop.f32.mrb[43].mxu1 }
 0x1b3   :  { %v960_v20 = vpop.f32.mrb[15].mxu0  ;;  %1222 = vmatmul.mubr.f32.gmra.mrb[120].mxu0 %v394_v16  ;;  %2581 = vmatmul.mubr.f32.gmra.mrb[70].mxu1 %v958_v19  ;;  %v4215_v16 = vpop.f32.mrb[44].mxu1  ;;  %v1905_v14 = vld [vmem:[%s4579_s3 + $0x18] sm:$0xff] }
 0x1b4   :  { %1226 = vmatprep.mubr.f32.mxu0 %v399_v18  ;;  %v810_v18 = vpop.f32.mrb[45].mxu1 }
 0x1b5   :  { %v4217_v20 = vpop.f32.mrb[46].mxu1 }
 0x1b6   :  { %v963_v24 = vpop.f32.mrb[16].mxu0 }
 0x1b7   :  { %v965_v26 = vpop.f32.mrb[17].mxu0  ;;  %1227 = vmatmul.mubr.f32.gmra.mrb[122].mxu0 %v398_v21  ;;  %2583 = vmatprep.mubr.f32.mxu1 %v963_v24  ;;  %v815_v21 = vpop.f32.mrb[47].mxu1 }
 0x1b8   :  { %1231 = vmatprep.mubr.f32.mxu0 %v403_v22  ;;  %v4219_v22 = vpop.f32.mrb[48].mxu1  ;;  %v1906_v21 = vld [vmem:[%s4579_s3 + $0x20] sm:$0xff] }
 0x1b9   :  { %v820_v25 = vpop.f32.mrb[49].mxu1 }
 0x1ba   :  { %v968_v31 = vpop.f32.mrb[18].mxu0 }
 0x1bb   :  { %v970_v32 = vpop.f32.mrb[19].mxu0  ;;  %1232 = vmatmul.mubr.f32.gmra.mrb[124].mxu0 %v402_v28  ;;  %2584 = vmatmul.mubr.f32.gmra.mrb[72].mxu1 %v968_v31  ;;  %v4221_v28 = vpop.f32.mrb[50].mxu1 }
 0x1bc   :  { %1236 = vmatprep.mubr.f32.mxu0 %v407_v30  ;;  %v825_v29 = vpop.f32.mrb[51].mxu1 }
 0x1bd   :  { %v4223_v30 = vpop.f32.mrb[52].mxu1 }
 0x1be   :  { %v973_v35 = vpop.f32.mrb[20].mxu0  ;;  %v830_v32 = vpop.f32.mrb[53].mxu1 }
 0x1bf   :  { %v975_v38 = vpop.f32.mrb[21].mxu0  ;;  %1237 = vmatmul.mubr.f32.gmra.mrb[126].mxu0 %v406_v33  ;;  %2586 = vmatprep.mubr.f32.mxu1 %v973_v35  ;;  %v4225_v35 = vpop.f32.mrb[54].mxu1  ;;  %v1909_v32 = vld [vmem:[%s4579_s3 + $0x38] sm:$0xff] }
 0x1c0   :  { %v835_v36 = vpop.f32.mrb[55].mxu1 }
 0x1c1   :  { %v4227_v38 = vpop.f32.mrb[56].mxu1 }
 0x1c2   :  { %v978_v41 = vpop.f32.mrb[22].mxu0 }
 0x1c3   :  { %v980_v42 = vpop.f32.mrb[23].mxu0  ;;  %2587 = vmatmul.mubr.f32.gmra.mrb[74].mxu1 %v978_v41  ;;  %v840_v41 = vpop.f32.mrb[57].mxu1 }
 0x1c4   :  { %v1910_v41 = vld [vmem:[%s4579_s3 + $0x40] sm:$0xff] }
 0x1c6   :  { %v983_v45 = vpop.f32.mrb[24].mxu0 }
 0x1c7   :  { %v985_v47 = vpop.f32.mrb[25].mxu0  ;;  %2589 = vmatprep.mubr.f32.mxu1 %v983_v45  ;;  %v4229_v45 = vpop.f32.mrb[58].mxu1 }
 0x1c8   :  { %v845_v46 = vpop.f32.mrb[59].mxu1 }
 0x1c9   :  { %v4231_v47 = vpop.f32.mrb[60].mxu1 }
 0x1ca   :  { %v988_v52 = vpop.f32.mrb[26].mxu0 }
 0x1cb   :  { %v990_v54 = vpop.f32.mrb[27].mxu0  ;;  %2590 = vmatmul.mubr.f32.gmra.mrb[76].mxu1 %v988_v52  ;;  %v850_v52 = vpop.f32.mrb[61].mxu1 }
 0x1cc   :  { %v4233_v54 = vpop.f32.mrb[62].mxu1 }
 0x1cd   :  { %v855_v57 = vpop.f32.mrb[63].mxu1 }
 0x1ce   :  { %v993_v59 = vpop.f32.mrb[28].mxu0  ;;  %v1913_v57 = vld [vmem:[%s4579_s3 + $0x58] sm:$0xff] }
 0x1cf   :  { %v995_v61 = vpop.f32.mrb[29].mxu0  ;;  %2592 = vmatprep.mubr.f32.mxu1 %v993_v59 }
 0x1d0   :  { %v1902_v61 = vld [vmem:[%s4579_s3] sm:$0xff] }
 0x1d1   :  { %v2923_v5 = vpack.c.bf16 %v1903_v1, %v1902_v61  ;;  %v1914_v1 = vld [vmem:[%s4579_s3 + $0x60] sm:$0xff] }
 0x1d2   :  { %v998_v3 = vpop.f32.mrb[30].mxu0 }
 0x1d3   :  { %v1000_v6 = vpop.f32.mrb[31].mxu0  ;;  %2593 = vmatmul.mubr.f32.gmra.mrb[78].mxu1 %v998_v3  ;;  %2924 = vmatprep.subr.bf16.mxu1 %v2923_v5 }
 0x1d4   :  { %2926 = vmatpush3.bf16.msra.mxu1 %v2923_v5 }
 0x1d6   :  { %v1003_v9 = vpop.f32.mrb[32].mxu0 }
 0x1d7   :  { %v1005_v12 = vpop.f32.mrb[33].mxu0  ;;  %2595 = vmatprep.mubr.f32.mxu1 %v1003_v9 }
 0x1d8   :  { %v1904_v12 = vld [vmem:[%s4579_s3 + $0x10] sm:$0xff] }
 0x1d9   :  { %v2927_v18 = vpack.c.bf16 %v1905_v14, %v1904_v12 }
 0x1da   :  { %v1008_v17 = vpop.f32.mrb[34].mxu0 }
 0x1db   :  { %v1010_v19 = vpop.f32.mrb[35].mxu0  ;;  %2596 = vmatmul.mubr.f32.gmra.mrb[80].mxu1 %v1008_v17  ;;  %2928 = vmatprep.subr.bf16.mxu1 %v2927_v18 }
 0x1dc   :  { %2930 = vmatpush3.bf16.msra.mxu1 %v2927_v18 }
 0x1de   :  { %v1013_v24 = vpop.f32.mrb[36].mxu0 }
 0x1df   :  { %v1015_v26 = vpop.f32.mrb[37].mxu0  ;;  %2598 = vmatprep.mubr.f32.mxu1 %v1013_v24  ;;  %v1907_v24 = vld [vmem:[%s4579_s3 + $0x28] sm:$0xff] }
 0x1e0   :  { %v2931_v26 = vpack.c.bf16 %v1907_v24, %v1906_v21 }
 0x1e2   :  { %v1018_v31 = vpop.f32.mrb[38].mxu0  ;;  %2932 = vmatprep.subr.bf16.mxu1 %v2931_v26 }
 0x1e3   :  { %v1020_v33 = vpop.f32.mrb[39].mxu0  ;;  %2599 = vmatmul.mubr.f32.gmra.mrb[82].mxu1 %v1018_v31  ;;  %v1908_v31 = vld [vmem:[%s4579_s3 + $0x30] sm:$0xff] }
 0x1e4   :  { %2934 = vmatpush3.bf16.msra.mxu1 %v2931_v26  ;;  %v2935_v36 = vpack.c.bf16 %v1909_v32, %v1908_v31 }
 0x1e6   :  { %v1023_v40 = vpop.f32.mrb[40].mxu0  ;;  %2936 = vmatprep.subr.bf16.mxu1 %v2935_v36 }
 0x1e7   :  { %v1025_v42 = vpop.f32.mrb[41].mxu0  ;;  %2601 = vmatprep.mubr.f32.mxu1 %v1023_v40 }
 0x1e8   :  { %2938 = vmatpush3.bf16.msra.mxu1 %v2935_v36  ;;  %v1911_v42 = vld [vmem:[%s4579_s3 + $0x48] sm:$0xff] }
 0x1ea   :  { %v1028_v49 = vpop.f32.mrb[42].mxu0 }
 0x1eb   :  { %v1030_v53 = vpop.f32.mrb[43].mxu0  ;;  %2602 = vmatmul.mubr.f32.gmra.mrb[84].mxu1 %v1028_v49  ;;  %v2939_v49 = vpack.c.bf16 %v1911_v42, %v1910_v41 }
 0x1ec   :  { %v1912_v53 = vld [vmem:[%s4579_s3 + $0x50] sm:$0xff] }
 0x1ed   :  { %2940 = vmatprep.subr.bf16.mxu1 %v2939_v49 }
 0x1ee   :  { %v1033_v59 = vpop.f32.mrb[44].mxu0  ;;  %2942 = vmatpush3.bf16.msra.mxu1 %v2939_v49 }
 0x1ef   :  { %v1035_v60 = vpop.f32.mrb[45].mxu0  ;;  %2604 = vmatprep.mubr.f32.mxu1 %v1033_v59 }
 0x1f0   :  { %v2943_v60 = vpack.c.bf16 %v1913_v57, %v1912_v53 }
 0x1f2   :  { %v1038_v3 = vpop.f32.mrb[46].mxu0  ;;  %2944 = vmatprep.subr.bf16.mxu1 %v2943_v60 }
 0x1f3   :  { %v1040_v6 = vpop.f32.mrb[47].mxu0  ;;  %2605 = vmatmul.mubr.f32.gmra.mrb[86].mxu1 %v1038_v3  ;;  %v1915_v3 = vld [vmem:[%s4579_s3 + $0x68] sm:$0xff] }
 0x1f4   :  { %2946 = vmatpush3.bf16.msra.mxu1 %v2943_v60  ;;  %v2947_v6 = vpack.c.bf16 %v1915_v3, %v1914_v1 }
 0x1f6   :  { %v1043_v7 = vpop.f32.mrb[48].mxu0  ;;  %2948 = vmatprep.subr.bf16.mxu1 %v2947_v6 }
 0x1f7   :  { %v1045_v9 = vpop.f32.mrb[49].mxu0  ;;  %2607 = vmatprep.mubr.f32.mxu1 %v1043_v7 }
 0x1f8   :  { %2950 = vmatpush3.bf16.msra.mxu1 %v2947_v6  ;;  %v1916_v9 = vld [vmem:[%s4579_s3 + $0x70] sm:$0xff] }
 0x1fa   :  { %v1048_v10 = vpop.f32.mrb[50].mxu0 }
 0x1fb   :  { %v1050_v17 = vpop.f32.mrb[51].mxu0  ;;  %2608 = vmatmul.mubr.f32.gmra.mrb[88].mxu1 %v1048_v10  ;;  %v1917_v10 = vld [vmem:[%s4579_s3 + $0x78] sm:$0xff] }
 0x1fc   :  { %v2951_v14 = vpack.c.bf16 %v1917_v10, %v1916_v9 }
 0x1fe   :  { %v1053_v19 = vpop.f32.mrb[52].mxu0  ;;  %2952 = vmatprep.subr.bf16.mxu1 %v2951_v14 }
 0x1ff   :  { %v1055_v25 = vpop.f32.mrb[53].mxu0  ;;  %2610 = vmatprep.mubr.f32.mxu1 %v1053_v19  ;;  %2954 = vmatpush3.bf16.msra.mxu1 %v2951_v14 }
 0x202   :  { %v1058_v29 = vpop.f32.mrb[54].mxu0 }
 0x203   :  { %v1060_v33 = vpop.f32.mrb[55].mxu0  ;;  %2611 = vmatmul.mubr.f32.gmra.mrb[90].mxu1 %v1058_v29 }
 0x206   :  { %v1063_v40 = vpop.f32.mrb[56].mxu0 }
 0x207   :  { %v1065_v46 = vpop.f32.mrb[57].mxu0  ;;  %2613 = vmatprep.mubr.f32.mxu1 %v1063_v40 }
 0x20a   :  { %v1068_v52 = vpop.f32.mrb[58].mxu0 }
 0x20b   :  { %v1070_v59 = vpop.f32.mrb[59].mxu0  ;;  %2614 = vmatmul.mubr.f32.gmra.mrb[92].mxu1 %v1068_v52 }
 0x20e   :  { %v1073_v61 = vpop.f32.mrb[60].mxu0 }
 0x20f   :  { %v1075_v5 = vpop.f32.mrb[61].mxu0  ;;  %2616 = vmatprep.mubr.f32.mxu1 %v1073_v61 }
 0x212   :  { %v1078_v7 = vpop.f32.mrb[62].mxu0 }
 0x213   :  { %v1080_v12 = vpop.f32.mrb[63].mxu0  ;;  %2617 = vmatmul.mubr.f32.gmra.mrb[94].mxu1 %v1078_v7 }
 0x216   :  { %v1083_v17 = vpop.f32.mrb[64].mxu0 }
 0x217   :  { %v1084_v18 = vadd.f32 %v1083_v17, %v4108_v37  ;;  %v1085_v19 = vpop.f32.mrb[65].mxu0 }
 0x219   :  { %2619 = vmatprep.mubr.f32.mxu1 %v1084_v18 }
 0x21a   :  { %v1088_v21 = vpop.f32.mrb[66].mxu0 }
 0x21b   :  { %v1089_v24 = vadd.f32 %v1088_v21, %v4116_v43  ;;  %v1090_v25 = vpop.f32.mrb[67].mxu0 }
 0x21d   :  { %2620 = vmatmul.mubr.f32.gmra.mrb[96].mxu1 %v1089_v24 }
 0x21e   :  { %v1093_v26 = vpop.f32.mrb[68].mxu0 }
 0x21f   :  { %v1094_v29 = vadd.f32 %v1093_v26, %v4130_v51  ;;  %v1095_v31 = vpop.f32.mrb[69].mxu0 }
 0x221   :  { %2622 = vmatprep.mubr.f32.mxu1 %v1094_v29 }
 0x222   :  { %v1098_v32 = vpop.f32.mrb[70].mxu0 }
 0x223   :  { %v1099_v33 = vadd.f32 %v1098_v32, %v4132_v55  ;;  %v1100_v36 = vpop.f32.mrb[71].mxu0 }
 0x225   :  { %2623 = vmatmul.mubr.f32.gmra.mrb[98].mxu1 %v1099_v33 }
 0x226   :  { %v1103_v40 = vpop.f32.mrb[72].mxu0 }
 0x227   :  { %v1104_v37 = vadd.f32 %v1103_v40, %v4146_v63  ;;  %v1105_v41 = vpop.f32.mrb[73].mxu0 }
 0x229   :  { %2625 = vmatprep.mubr.f32.mxu1 %v1104_v37 }
 0x22a   :  { %v1108_v42 = vpop.f32.mrb[74].mxu0 }
 0x22b   :  { %v1109_v43 = vadd.f32 %v1108_v42, %v4148_v4  ;;  %v1110_v46 = vpop.f32.mrb[75].mxu0 }
 0x22d   :  { %2626 = vmatmul.mubr.f32.gmra.mrb[100].mxu1 %v1109_v43 }
 0x22e   :  { %v1113_v49 = vpop.f32.mrb[76].mxu0 }
 0x22f   :  { %v1114_v51 = vadd.f32 %v1113_v49, %v4162_v11  ;;  %v1115_v52 = vpop.f32.mrb[77].mxu0 }
 0x231   :  { %2628 = vmatprep.mubr.f32.mxu1 %v1114_v51 }
 0x232   :  { %v1118_v53 = vpop.f32.mrb[78].mxu0 }
 0x233   :  { %v1119_v55 = vadd.f32 %v1118_v53, %v4164_v15  ;;  %v1120_v57 = vpop.f32.mrb[79].mxu0 }
 0x235   :  { %2629 = vmatmul.mubr.f32.gmra.mrb[102].mxu1 %v1119_v55 }
 0x236   :  { %v1123_v59 = vpop.f32.mrb[80].mxu0 }
 0x237   :  { %v1124_v63 = vadd.f32 %v1123_v59, %v4178_v23  ;;  %v1125_v60 = vpop.f32.mrb[81].mxu0 }
 0x239   :  { %2631 = vmatprep.mubr.f32.mxu1 %v1124_v63 }
 0x23a   :  { %v1128_v61 = vpop.f32.mrb[82].mxu0 }
 0x23b   :  { %v1129_v4 = vadd.f32 %v1128_v61, %v4180_v27  ;;  %v1130_v1 = vpop.f32.mrb[83].mxu0 }
 0x23d   :  { %2632 = vmatmul.mubr.f32.gmra.mrb[104].mxu1 %v1129_v4 }
 0x23e   :  { %v1133_v3 = vpop.f32.mrb[84].mxu0 }
 0x23f   :  { %v1134_v11 = vadd.f32 %v1133_v3, %v4191_v34  ;;  %v1135_v5 = vpop.f32.mrb[85].mxu0 }
 0x241   :  { %2634 = vmatprep.mubr.f32.mxu1 %v1134_v11 }
 0x242   :  { %v1138_v6 = vpop.f32.mrb[86].mxu0 }
 0x243   :  { %v1139_v15 = vadd.f32 %v1138_v6, %v4193_v39  ;;  %v1140_v7 = vpop.f32.mrb[87].mxu0 }
 0x245   :  { %2635 = vmatmul.mubr.f32.gmra.mrb[106].mxu1 %v1139_v15 }
 0x246   :  { %v1143_v9 = vpop.f32.mrb[88].mxu0 }
 0x247   :  { %v1144_v23 = vadd.f32 %v1143_v9, %v4195_v44  ;;  %v1145_v10 = vpop.f32.mrb[89].mxu0 }
 0x249   :  { %2637 = vmatprep.mubr.f32.mxu1 %v1144_v23 }
 0x24a   :  { %v1148_v12 = vpop.f32.mrb[90].mxu0 }
 0x24b   :  { %v1149_v27 = vadd.f32 %v1148_v12, %v4197_v48  ;;  %v1150_v14 = vpop.f32.mrb[91].mxu0 }
 0x24d   :  { %2638 = vmatmul.mubr.f32.gmra.mrb[108].mxu1 %v1149_v27 }
 0x24e   :  { %v1153_v17 = vpop.f32.mrb[92].mxu0 }
 0x24f   :  { %v1154_v34 = vadd.f32 %v1153_v17, %v4199_v50  ;;  %v1155_v18 = vpop.f32.mrb[93].mxu0 }
 0x251   :  { %2640 = vmatprep.mubr.f32.mxu1 %v1154_v34 }
 0x252   :  { %v1158_v19 = vpop.f32.mrb[94].mxu0 }
 0x253   :  { %v1159_v39 = vadd.f32 %v1158_v19, %v4201_v56  ;;  %v1160_v21 = vpop.f32.mrb[95].mxu0 }
 0x255   :  { %2641 = vmatmul.mubr.f32.gmra.mrb[110].mxu1 %v1159_v39 }
 0x256   :  { %v1163_v24 = vpop.f32.mrb[96].mxu0 }
 0x257   :  { %v1164_v44 = vadd.f32 %v1163_v24, %v4203_v58  ;;  %v1165_v25 = vpop.f32.mrb[97].mxu0 }
 0x259   :  { %2643 = vmatprep.mubr.f32.mxu1 %v1164_v44 }
 0x25a   :  { %v1168_v26 = vpop.f32.mrb[98].mxu0 }
 0x25b   :  { %v1169_v48 = vadd.f32 %v1168_v26, %v4205_v62  ;;  %v1170_v29 = vpop.f32.mrb[99].mxu0 }
 0x25d   :  { %2644 = vmatmul.mubr.f32.gmra.mrb[112].mxu1 %v1169_v48 }
 0x25e   :  { %v1173_v31 = vpop.f32.mrb[100].mxu0 }
 0x25f   :  { %v1174_v50 = vadd.f32 %v1173_v31, %v4207_v2  ;;  %v1175_v32 = vpop.f32.mrb[101].mxu0 }
 0x261   :  { %2646 = vmatprep.mubr.f32.mxu1 %v1174_v50 }
 0x262   :  { %v1178_v33 = vpop.f32.mrb[102].mxu0 }
 0x263   :  { %v1179_v56 = vadd.f32 %v1178_v33, %v4209_v0  ;;  %v1180_v36 = vpop.f32.mrb[103].mxu0 }
 0x265   :  { %2647 = vmatmul.mubr.f32.gmra.mrb[114].mxu1 %v1179_v56 }
 0x266   :  { %v1183_v40 = vpop.f32.mrb[104].mxu0 }
 0x267   :  { %v1184_v58 = vadd.f32 %v1183_v40, %v4211_v8  ;;  %v1185_v37 = vpop.f32.mrb[105].mxu0 }
 0x269   :  { %2649 = vmatprep.mubr.f32.mxu1 %v1184_v58 }
 0x26a   :  { %v1188_v41 = vpop.f32.mrb[106].mxu0 }
 0x26b   :  { %v1189_v62 = vadd.f32 %v1188_v41, %v4213_v13  ;;  %v1190_v42 = vpop.f32.mrb[107].mxu0 }
 0x26d   :  { %2650 = vmatmul.mubr.f32.gmra.mrb[116].mxu1 %v1189_v62 }
 0x26e   :  { %v1193_v43 = vpop.f32.mrb[108].mxu0  ;;  %v2573_v46 = vpop.f32.mrb[64].mxu1 }
 0x26f   :  { %v1194_v2 = vadd.f32 %v1193_v43, %v4215_v16  ;;  %v1195_v49 = vpop.f32.mrb[109].mxu0  ;;  %v1519_v51 = vpop.f32.mrb[65].mxu1  ;;  %v1839_v21 = vmax.f32 %v2573_v46, 0.0 }
 0x271   :  { %2652 = vmatprep.mubr.f32.mxu1 %v1194_v2 }
 0x272   :  { %v1198_v0 = vpop.f32.mrb[110].mxu0 }
 0x273   :  { %v1199_v52 = vadd.f32 %v1198_v0, %v4217_v20  ;;  %v1200_v53 = vpop.f32.mrb[111].mxu0 }
 0x275   :  { %2653 = vmatmul.mubr.f32.gmra.mrb[118].mxu1 %v1199_v52 }
 0x276   :  { %v1203_v8 = vpop.f32.mrb[112].mxu0  ;;  %v2576_v55 = vpop.f32.mrb[66].mxu1 }
 0x277   :  { %v1204_v57 = vadd.f32 %v1203_v8, %v4219_v22  ;;  %v1205_v59 = vpop.f32.mrb[113].mxu0  ;;  %v1529_v13 = vpop.f32.mrb[67].mxu1  ;;  %v1841_v44 = vmax.f32 %v2576_v55, 0.0 }
 0x279   :  { %2655 = vmatprep.mubr.f32.mxu1 %v1204_v57 }
 0x27a   :  { %v1208_v63 = vpop.f32.mrb[114].mxu0 }
 0x27b   :  { %v1209_v60 = vadd.f32 %v1208_v63, %v4221_v28  ;;  %v1210_v61 = vpop.f32.mrb[115].mxu0 }
 0x27d   :  { %2656 = vmatmul.mubr.f32.gmra.mrb[120].mxu1 %v1209_v60 }
 0x27e   :  { %v1213_v16 = vpop.f32.mrb[116].mxu0  ;;  %v2579_v4 = vpop.f32.mrb[68].mxu1 }
 0x27f   :  { %v1214_v1 = vadd.f32 %v1213_v16, %v4223_v30  ;;  %v1215_v3 = vpop.f32.mrb[117].mxu0  ;;  %v1539_v20 = vpop.f32.mrb[69].mxu1  ;;  %v1843_v26 = vmax.f32 %v2579_v4, 0.0 }
 0x280   :  { %v1842_v25 = vmax.f32 %v1539_v20, 0.0 }
 0x281   :  { %2658 = vmatprep.mubr.f32.mxu1 %v1214_v1 }
 0x282   :  { %v1218_v11 = vpop.f32.mrb[118].mxu0 }
 0x283   :  { %v1219_v5 = vadd.f32 %v1218_v11, %v4225_v35  ;;  %v1220_v6 = vpop.f32.mrb[119].mxu0 }
 0x285   :  { %2659 = vmatmul.mubr.f32.gmra.mrb[122].mxu1 %v1219_v5 }
 0x286   :  { %v1223_v22 = vpop.f32.mrb[120].mxu0  ;;  %v2582_v15 = vpop.f32.mrb[70].mxu1 }
 0x287   :  { %v1224_v7 = vadd.f32 %v1223_v22, %v4227_v38  ;;  %v1225_v9 = vpop.f32.mrb[121].mxu0  ;;  %v1549_v28 = vpop.f32.mrb[71].mxu1  ;;  %v1838_v38 = vmax.f32 %v1519_v51, 0.0 }
 0x288   :  { %v1844_v29 = vmax.f32 %v1549_v28, 0.0 }
 0x289   :  { %2661 = vmatprep.mubr.f32.mxu1 %v1224_v7 }
 0x28a   :  { %v1228_v23 = vpop.f32.mrb[122].mxu0 }
 0x28b   :  { %v1229_v10 = vadd.f32 %v1228_v23, %v4229_v45  ;;  %v1230_v12 = vpop.f32.mrb[123].mxu0  ;;  %v1840_v45 = vmax.f32 %v1529_v13, 0.0 }
 0x28d   :  { %2662 = vmatmul.mubr.f32.gmra.mrb[124].mxu1 %v1229_v10 }
 0x28e   :  { %v1233_v30 = vpop.f32.mrb[124].mxu0  ;;  %v2585_v27 = vpop.f32.mrb[72].mxu1 }
 0x28f   :  { %v1234_v14 = vadd.f32 %v1233_v30, %v4231_v47  ;;  %v1235_v17 = vpop.f32.mrb[125].mxu0  ;;  %v1559_v35 = vpop.f32.mrb[73].mxu1  ;;  %v1847_v32 = vmax.f32 %v2585_v27, 0.0 }
 0x290   :  { %v1846_v31 = vmax.f32 %v1559_v35, 0.0 }
 0x291   :  { %2664 = vmatprep.mubr.f32.mxu1 %v1234_v14 }
 0x292   :  { %v1238_v34 = vpop.f32.mrb[126].mxu0 }
 0x293   :  { %v1239_v18 = vadd.f32 %v1238_v34, %v4233_v54  ;;  %v1240_v19 = vpop.f32.mrb[127].mxu0  ;;  %v1845_v54 = vmax.f32 %v2582_v15, 0.0 }
 0x295   :  { %2665 = vmatmul.mubr.f32.gmra.mrb[126].mxu1 %v1239_v18 }
 0x296   :  { %v2588_v39 = vpop.f32.mrb[74].mxu1  ;;  %2699 = vmatprep.mubr.f32.mxu1 %v1838_v38 }
 0x297   :  { %v1569_v24 = vpop.f32.mrb[75].mxu1  ;;  %v1849_v36 = vmax.f32 %v2588_v39, 0.0 }
 0x298   :  { %v1848_v56 = vmax.f32 %v1569_v24, 0.0 }
 0x299   :  { %2700 = vmatmul.mubr.f32.vlgmr.msra.gmra.mrb[128].mxu1 %v1839_v21 }
 0x29a   :  { %2702 = vmatprep.mubr.f32.mxu1 %v1840_v45 }
 0x29d   :  { %2703 = vmatmul.mubr.f32.gmra.mrb[130].mxu1 %v1841_v44 }
 0x29e   :  { %v2591_v47 = vpop.f32.mrb[76].mxu1  ;;  %2705 = vmatprep.mubr.f32.mxu1 %v1842_v25 }
 0x29f   :  { %v1579_v48 = vpop.f32.mrb[77].mxu1  ;;  %v1851_v37 = vmax.f32 %v2591_v47, 0.0 }
 0x2a0   :  { %v1850_v40 = vmax.f32 %v1579_v48, 0.0 }
 0x2a1   :  { %2706 = vmatmul.mubr.f32.gmra.mrb[132].mxu1 %v1843_v26 }
 0x2a2   :  { %2708 = vmatprep.mubr.f32.mxu1 %v1844_v29 }
 0x2a5   :  { %2709 = vmatmul.mubr.f32.gmra.mrb[134].mxu1 %v1845_v54 }
 0x2a6   :  { %v2594_v50 = vpop.f32.mrb[78].mxu1  ;;  %2711 = vmatprep.mubr.f32.mxu1 %v1846_v31 }
 0x2a7   :  { %v1589_v33 = vpop.f32.mrb[79].mxu1  ;;  %v1853_v42 = vmax.f32 %v2594_v50, 0.0 }
 0x2a8   :  { %v1852_v62 = vmax.f32 %v1589_v33, 0.0 }
 0x2a9   :  { %2712 = vmatmul.mubr.f32.gmra.mrb[136].mxu1 %v1847_v32 }
 0x2aa   :  { %2714 = vmatprep.mubr.f32.mxu1 %v1848_v56 }
 0x2ad   :  { %2715 = vmatmul.mubr.f32.gmra.mrb[138].mxu1 %v1849_v36 }
 0x2ae   :  { %v2597_v58 = vpop.f32.mrb[80].mxu1  ;;  %2717 = vmatprep.mubr.f32.mxu1 %v1850_v40 }
 0x2af   :  { %v1599_v41 = vpop.f32.mrb[81].mxu1  ;;  %v1855_v2 = vmax.f32 %v2597_v58, 0.0 }
 0x2b0   :  { %v1854_v43 = vmax.f32 %v1599_v41, 0.0 }
 0x2b1   :  { %2718 = vmatmul.mubr.f32.gmra.mrb[140].mxu1 %v1851_v37 }
 0x2b2   :  { %2720 = vmatprep.mubr.f32.mxu1 %v1852_v62 }
 0x2b5   :  { %2721 = vmatmul.mubr.f32.gmra.mrb[142].mxu1 %v1853_v42 }
 0x2b6   :  { %v2600_v46 = vpop.f32.mrb[82].mxu1  ;;  %2723 = vmatprep.mubr.f32.mxu1 %v1854_v43 }
 0x2b7   :  { %v1609_v49 = vpop.f32.mrb[83].mxu1  ;;  %v1857_v0 = vmax.f32 %v2600_v46, 0.0 }
 0x2b8   :  { %v1856_v51 = vmax.f32 %v1609_v49, 0.0 }
 0x2b9   :  { %2724 = vmatmul.mubr.f32.gmra.mrb[144].mxu1 %v1855_v2 }
 0x2ba   :  { %2726 = vmatprep.mubr.f32.mxu1 %v1856_v51 }
 0x2bd   :  { %2727 = vmatmul.mubr.f32.gmra.mrb[146].mxu1 %v1857_v0 }
 0x2be   :  { %v2603_v52 = vpop.f32.mrb[84].mxu1 }
 0x2bf   :  { %v1619_v53 = vpop.f32.mrb[85].mxu1  ;;  %v1859_v55 = vmax.f32 %v2603_v52, 0.0 }
 0x2c0   :  { %v1858_v8 = vmax.f32 %v1619_v53, 0.0 }
 0x2c2   :  { %2729 = vmatprep.mubr.f32.mxu1 %v1858_v8 }
 0x2c3   :  { %2730 = vmatmul.mubr.f32.gmra.mrb[148].mxu1 %v1859_v55 }
 0x2c6   :  { %v2606_v57 = vpop.f32.mrb[86].mxu1 }
 0x2c7   :  { %v1629_v59 = vpop.f32.mrb[87].mxu1  ;;  %v1861_v63 = vmax.f32 %v2606_v57, 0.0 }
 0x2c8   :  { %v1860_v13 = vmax.f32 %v1629_v59, 0.0 }
 0x2ca   :  { %2732 = vmatprep.mubr.f32.mxu1 %v1860_v13 }
 0x2cb   :  { %2733 = vmatmul.mubr.f32.gmra.mrb[150].mxu1 %v1861_v63 }
 0x2ce   :  { %v2609_v60 = vpop.f32.mrb[88].mxu1 }
 0x2cf   :  { %v1639_v61 = vpop.f32.mrb[89].mxu1  ;;  %v1863_v4 = vmax.f32 %v2609_v60, 0.0 }
 0x2d0   :  { %v1862_v16 = vmax.f32 %v1639_v61, 0.0 }
 0x2d2   :  { %2735 = vmatprep.mubr.f32.mxu1 %v1862_v16 }
 0x2d3   :  { %2736 = vmatmul.mubr.f32.gmra.mrb[152].mxu1 %v1863_v4 }
 0x2d6   :  { %v2612_v1 = vpop.f32.mrb[90].mxu1 }
 0x2d7   :  { %v1649_v3 = vpop.f32.mrb[91].mxu1  ;;  %v1865_v11 = vmax.f32 %v2612_v1, 0.0 }
 0x2d8   :  { %v1864_v20 = vmax.f32 %v1649_v3, 0.0 }
 0x2da   :  { %2738 = vmatprep.mubr.f32.mxu1 %v1864_v20 }
 0x2db   :  { %2739 = vmatmul.mubr.f32.gmra.mrb[154].mxu1 %v1865_v11 }
 0x2de   :  { %v2615_v5 = vpop.f32.mrb[92].mxu1 }
 0x2df   :  { %v1659_v6 = vpop.f32.mrb[93].mxu1  ;;  %v1867_v15 = vmax.f32 %v2615_v5, 0.0 }
 0x2e0   :  { %v1866_v22 = vmax.f32 %v1659_v6, 0.0 }
 0x2e2   :  { %2741 = vmatprep.mubr.f32.mxu1 %v1866_v22 }
 0x2e3   :  { %2742 = vmatmul.mubr.f32.gmra.mrb[156].mxu1 %v1867_v15 }
 0x2e6   :  { %v2618_v7 = vpop.f32.mrb[94].mxu1 }
 0x2e7   :  { %v1669_v9 = vpop.f32.mrb[95].mxu1  ;;  %v1869_v23 = vmax.f32 %v2618_v7, 0.0 }
 0x2e8   :  { %v1868_v28 = vmax.f32 %v1669_v9, 0.0 }
 0x2ea   :  { %2744 = vmatprep.mubr.f32.mxu1 %v1868_v28 }
 0x2eb   :  { %2745 = vmatmul.mubr.f32.gmra.mrb[158].mxu1 %v1869_v23  ;;  %v4318_v23 = vld [vmem:[%s4580_s4] ss:$0 sm:$0xff] }
 0x2f0   :  { %v2621_v10 = vpop.f32.mrb[96].mxu1 }
 0x2f1   :  { %v1679_v12 = vpop.f32.mrb[97].mxu1  ;;  %v1871_v27 = vmax.f32 %v2621_v10, 0.0 }
 0x2f2   :  { %v1870_v30 = vmax.f32 %v1679_v12, 0.0 }
 0x2f4   :  { %2747 = vmatprep.mubr.f32.mxu1 %v1870_v30 }
 0x2f5   :  { %2748 = vmatmul.mubr.f32.gmra.mrb[160].mxu1 %v1871_v27 }
 0x2f8   :  { %v2624_v14 = vpop.f32.mrb[98].mxu1 }
 0x2f9   :  { %v1689_v17 = vpop.f32.mrb[99].mxu1  ;;  %v1873_v34 = vmax.f32 %v2624_v14, 0.0 }
 0x2fa   :  { %v1872_v35 = vmax.f32 %v1689_v17, 0.0 }
 0x2fc   :  { %2750 = vmatprep.mubr.f32.mxu1 %v1872_v35 }
 0x2fd   :  { %2751 = vmatmul.mubr.f32.gmra.mrb[162].mxu1 %v1873_v34 }
 0x300   :  { %v2627_v18 = vpop.f32.mrb[100].mxu1 }
 0x301   :  { %v1699_v19 = vpop.f32.mrb[101].mxu1  ;;  %v1875_v39 = vmax.f32 %v2627_v18, 0.0 }
 0x302   :  { %v1874_v38 = vmax.f32 %v1699_v19, 0.0 }
 0x304   :  { %2753 = vmatprep.mubr.f32.mxu1 %v1874_v38 }
 0x305   :  { %2754 = vmatmul.mubr.f32.gmra.mrb[164].mxu1 %v1875_v39 }
 0x308   :  { %v2630_v21 = vpop.f32.mrb[102].mxu1 }
 0x309   :  { %v1709_v24 = vpop.f32.mrb[103].mxu1  ;;  %v1877_v44 = vmax.f32 %v2630_v21, 0.0 }
 0x30a   :  { %v1876_v45 = vmax.f32 %v1709_v24, 0.0 }
 0x30c   :  { %2756 = vmatprep.mubr.f32.mxu1 %v1876_v45 }
 0x30d   :  { %2757 = vmatmul.mubr.f32.gmra.mrb[166].mxu1 %v1877_v44 }
 0x310   :  { %v2633_v25 = vpop.f32.mrb[104].mxu1 }
 0x311   :  { %v1719_v47 = vpop.f32.mrb[105].mxu1  ;;  %v1879_v48 = vmax.f32 %v2633_v25, 0.0 }
 0x312   :  { %v1878_v26 = vmax.f32 %v1719_v47, 0.0 }
 0x314   :  { %2759 = vmatprep.mubr.f32.mxu1 %v1878_v26 }
 0x315   :  { %2760 = vmatmul.mubr.f32.gmra.mrb[168].mxu1 %v1879_v48 }
 0x318   :  { %v2636_v29 = vpop.f32.mrb[106].mxu1 }
 0x319   :  { %v1729_v54 = vpop.f32.mrb[107].mxu1  ;;  %v1881_v50 = vmax.f32 %v2636_v29, 0.0 }
 0x31a   :  { %v1880_v31 = vmax.f32 %v1729_v54, 0.0 }
 0x31c   :  { %2762 = vmatprep.mubr.f32.mxu1 %v1880_v31 }
 0x31d   :  { %2763 = vmatmul.mubr.f32.gmra.mrb[170].mxu1 %v1881_v50 }
 0x320   :  { %v2639_v32 = vpop.f32.mrb[108].mxu1 }
 0x321   :  { %v1739_v33 = vpop.f32.mrb[109].mxu1  ;;  %v1883_v36 = vmax.f32 %v2639_v32, 0.0 }
 0x322   :  { %v1882_v56 = vmax.f32 %v1739_v33, 0.0 }
 0x324   :  { %2765 = vmatprep.mubr.f32.mxu1 %v1882_v56 }
 0x325   :  { %2766 = vmatmul.mubr.f32.gmra.mrb[172].mxu1 %v1883_v36 }
 0x328   :  { %v2642_v40 = vpop.f32.mrb[110].mxu1 }
 0x329   :  { %v1749_v58 = vpop.f32.mrb[111].mxu1  ;;  %v1885_v41 = vmax.f32 %v2642_v40, 0.0 }
 0x32a   :  { %v1884_v37 = vmax.f32 %v1749_v58, 0.0 }
 0x32c   :  { %2768 = vmatprep.mubr.f32.mxu1 %v1884_v37 }
 0x32d   :  { %2769 = vmatmul.mubr.f32.gmra.mrb[174].mxu1 %v1885_v41 }
 0x330   :  { %v2645_v62 = vpop.f32.mrb[112].mxu1 }
 0x331   :  { %v1759_v42 = vpop.f32.mrb[113].mxu1  ;;  %v1887_v46 = vmax.f32 %v2645_v62, 0.0 }
 0x332   :  { %v1886_v43 = vmax.f32 %v1759_v42, 0.0 }
 0x334   :  { %2771 = vmatprep.mubr.f32.mxu1 %v1886_v43 }
 0x335   :  { %2772 = vmatmul.mubr.f32.gmra.mrb[176].mxu1 %v1887_v46 }
 0x338   :  { %v2648_v2 = vpop.f32.mrb[114].mxu1 }
 0x339   :  { %v1769_v49 = vpop.f32.mrb[115].mxu1  ;;  %v1889_v0 = vmax.f32 %v2648_v2, 0.0 }
 0x33a   :  { %v1888_v51 = vmax.f32 %v1769_v49, 0.0 }
 0x33c   :  { %2774 = vmatprep.mubr.f32.mxu1 %v1888_v51 }
 0x33d   :  { %2775 = vmatmul.mubr.f32.gmra.mrb[178].mxu1 %v1889_v0 }
 0x340   :  { %v2651_v52 = vpop.f32.mrb[116].mxu1 }
 0x341   :  { %v1779_v53 = vpop.f32.mrb[117].mxu1  ;;  %v1891_v55 = vmax.f32 %v2651_v52, 0.0 }
 0x342   :  { %v1890_v8 = vmax.f32 %v1779_v53, 0.0 }
 0x344   :  { %2777 = vmatprep.mubr.f32.mxu1 %v1890_v8 }
 0x345   :  { %2778 = vmatmul.mubr.f32.gmra.mrb[180].mxu1 %v1891_v55 }
 0x348   :  { %v2654_v57 = vpop.f32.mrb[118].mxu1 }
 0x349   :  { %v1789_v59 = vpop.f32.mrb[119].mxu1  ;;  %v1893_v63 = vmax.f32 %v2654_v57, 0.0 }
 0x34a   :  { %v1892_v13 = vmax.f32 %v1789_v59, 0.0 }
 0x34c   :  { %2780 = vmatprep.mubr.f32.mxu1 %v1892_v13 }
 0x34d   :  { %2781 = vmatmul.mubr.f32.gmra.mrb[182].mxu1 %v1893_v63 }
 0x350   :  { %v2657_v60 = vpop.f32.mrb[120].mxu1 }
 0x351   :  { %v1799_v61 = vpop.f32.mrb[121].mxu1  ;;  %v1895_v4 = vmax.f32 %v2657_v60, 0.0 }
 0x352   :  { %v1894_v16 = vmax.f32 %v1799_v61, 0.0 }
 0x354   :  { %2783 = vmatprep.mubr.f32.mxu1 %v1894_v16 }
 0x355   :  { %2784 = vmatmul.mubr.f32.gmra.mrb[184].mxu1 %v1895_v4 }
 0x358   :  { %v2660_v1 = vpop.f32.mrb[122].mxu1 }
 0x359   :  { %v1809_v3 = vpop.f32.mrb[123].mxu1  ;;  %v1897_v11 = vmax.f32 %v2660_v1, 0.0 }
 0x35a   :  { %v1896_v20 = vmax.f32 %v1809_v3, 0.0 }
 0x35c   :  { %2786 = vmatprep.mubr.f32.mxu1 %v1896_v20 }
 0x35d   :  { %2787 = vmatmul.mubr.f32.gmra.mrb[186].mxu1 %v1897_v11 }
 0x360   :  { %v2663_v5 = vpop.f32.mrb[124].mxu1 }
 0x361   :  { %v1819_v6 = vpop.f32.mrb[125].mxu1  ;;  %v1899_v15 = vmax.f32 %v2663_v5, 0.0 }
 0x362   :  { %v1898_v22 = vmax.f32 %v1819_v6, 0.0 }
 0x364   :  { %2789 = vmatprep.mubr.f32.mxu1 %v1898_v22 }
 0x365   :  { %2790 = vmatmul.mubr.f32.gmra.mrb[188].mxu1 %v1899_v15 }
 0x368   :  { %v2666_v7 = vpop.f32.mrb[126].mxu1 }
 0x369   :  { %v1829_v9 = vpop.f32.mrb[127].mxu1  ;;  %v1901_v10 = vmax.f32 %v2666_v7, 0.0 }
 0x36a   :  { %v1900_v28 = vmax.f32 %v1829_v9, 0.0 }
 0x36c   :  { %v2701_v12 = vpop.f32.mrb[128].mxu1  ;;  %2792 = vmatprep.mubr.f32.mxu1 %v1900_v28 }
 0x36d   :  { %v1997_v30 = vadd.f32 %v2701_v12, %v4318_v23  ;;  %v1991_v27 = vpop.f32.mrb[129].mxu1  ;;  %2793 = vmatmul.mubr.f32.gmra.mrb[190].mxu1 %v1901_v10 }
 0x36e   :  { %v1992_v14 = vadd.f32 %v4318_v23, %v1991_v27 }
 0x36f   :  { %2311 = vst [vmem:[%s4581_s5 + $0x8] sm:$0xff] %v1997_v30 }
 0x370   :  { %2310 = vst [vmem:[%s4581_s5] sm:$0xff] %v1992_v14  ;;  %v2704_v17 = vpop.f32.mrb[130].mxu1 }
 0x371   :  { %v2007_v35 = vadd.f32 %v2704_v17, %v4318_v23  ;;  %v2001_v34 = vpop.f32.mrb[131].mxu1 }
 0x372   :  { %v2002_v18 = vadd.f32 %v4318_v23, %v2001_v34 }
 0x373   :  { %2313 = vst [vmem:[%s4581_s5 + $0x18] sm:$0xff] %v2007_v35 }
 0x374   :  { %2312 = vst [vmem:[%s4581_s5 + $0x10] sm:$0xff] %v2002_v18  ;;  %v2707_v19 = vpop.f32.mrb[132].mxu1 }
 0x375   :  { %v2017_v38 = vadd.f32 %v2707_v19, %v4318_v23  ;;  %v2011_v39 = vpop.f32.mrb[133].mxu1 }
 0x376   :  { %v2012_v21 = vadd.f32 %v4318_v23, %v2011_v39 }
 0x377   :  { %2315 = vst [vmem:[%s4581_s5 + $0x28] sm:$0xff] %v2017_v38 }
 0x378   :  { %2314 = vst [vmem:[%s4581_s5 + $0x20] sm:$0xff] %v2012_v21  ;;  %v2710_v24 = vpop.f32.mrb[134].mxu1 }
 0x379   :  { %v2027_v45 = vadd.f32 %v2710_v24, %v4318_v23  ;;  %v2021_v44 = vpop.f32.mrb[135].mxu1 }
 0x37a   :  { %v2022_v25 = vadd.f32 %v4318_v23, %v2021_v44 }
 0x37b   :  { %2317 = vst [vmem:[%s4581_s5 + $0x38] sm:$0xff] %v2027_v45 }
 0x37c   :  { %2316 = vst [vmem:[%s4581_s5 + $0x30] sm:$0xff] %v2022_v25  ;;  %v2713_v47 = vpop.f32.mrb[136].mxu1 }
 0x37d   :  { %v2037_v26 = vadd.f32 %v2713_v47, %v4318_v23  ;;  %v2031_v48 = vpop.f32.mrb[137].mxu1 }
 0x37e   :  { %v2032_v29 = vadd.f32 %v4318_v23, %v2031_v48 }
 0x37f   :  { %2319 = vst [vmem:[%s4581_s5 + $0x48] sm:$0xff] %v2037_v26 }
 0x380   :  { %2318 = vst [vmem:[%s4581_s5 + $0x40] sm:$0xff] %v2032_v29  ;;  %v2716_v54 = vpop.f32.mrb[138].mxu1 }
 0x381   :  { %v2047_v31 = vadd.f32 %v2716_v54, %v4318_v23  ;;  %v2041_v50 = vpop.f32.mrb[139].mxu1 }
 0x382   :  { %v2042_v32 = vadd.f32 %v4318_v23, %v2041_v50 }
 0x383   :  { %2321 = vst [vmem:[%s4581_s5 + $0x58] sm:$0xff] %v2047_v31 }
 0x384   :  { %2320 = vst [vmem:[%s4581_s5 + $0x50] sm:$0xff] %v2042_v32  ;;  %v2719_v33 = vpop.f32.mrb[140].mxu1 }
 0x385   :  { %v2057_v56 = vadd.f32 %v2719_v33, %v4318_v23  ;;  %v2051_v36 = vpop.f32.mrb[141].mxu1 }
 0x386   :  { %v2052_v40 = vadd.f32 %v4318_v23, %v2051_v36 }
 0x387   :  { %2323 = vst [vmem:[%s4581_s5 + $0x68] sm:$0xff] %v2057_v56 }
 0x388   :  { %2322 = vst [vmem:[%s4581_s5 + $0x60] sm:$0xff] %v2052_v40  ;;  %v2722_v58 = vpop.f32.mrb[142].mxu1 }
 0x389   :  { %v2067_v37 = vadd.f32 %v2722_v58, %v4318_v23  ;;  %v2061_v41 = vpop.f32.mrb[143].mxu1 }
 0x38a   :  { %v2062_v62 = vadd.f32 %v4318_v23, %v2061_v41 }
 0x38b   :  { %2325 = vst [vmem:[%s4581_s5 + $0x78] sm:$0xff] %v2067_v37 }
 0x38c   :  { %2324 = vst [vmem:[%s4581_s5 + $0x70] sm:$0xff] %v2062_v62  ;;  %v2725_v42 = vpop.f32.mrb[144].mxu1 }
 0x38d   :  { %v2077_v43 = vadd.f32 %v2725_v42, %v4318_v23  ;;  %v2071_v46 = vpop.f32.mrb[145].mxu1 }
 0x38e   :  { %v2072_v2 = vadd.f32 %v4318_v23, %v2071_v46 }
 0x38f   :  { %2327 = vst [vmem:[%s4581_s5 + $0x88] sm:$0xff] %v2077_v43 }
 0x390   :  { %2326 = vst [vmem:[%s4581_s5 + $0x80] sm:$0xff] %v2072_v2  ;;  %v2728_v49 = vpop.f32.mrb[146].mxu1 }
 0x391   :  { %v2087_v51 = vadd.f32 %v2728_v49, %v4318_v23  ;;  %v2081_v0 = vpop.f32.mrb[147].mxu1 }
 0x392   :  { %v2082_v52 = vadd.f32 %v4318_v23, %v2081_v0 }
 0x393   :  { %2329 = vst [vmem:[%s4581_s5 + $0x98] sm:$0xff] %v2087_v51 }
 0x394   :  { %2328 = vst [vmem:[%s4581_s5 + $0x90] sm:$0xff] %v2082_v52 }
 0x396   :  { %v2731_v53 = vpop.f32.mrb[148].mxu1 }
 0x397   :  { %v2097_v8 = vadd.f32 %v2731_v53, %v4318_v23  ;;  %v2091_v55 = vpop.f32.mrb[149].mxu1 }
 0x398   :  { %v2092_v57 = vadd.f32 %v4318_v23, %v2091_v55 }
 0x399   :  { %2331 = vst [vmem:[%s4581_s5 + $0xa8] sm:$0xff] %v2097_v8 }
 0x39a   :  { %2330 = vst [vmem:[%s4581_s5 + $0xa0] sm:$0xff] %v2092_v57 }
 0x39e   :  { %v2734_v59 = vpop.f32.mrb[150].mxu1 }
 0x39f   :  { %v2107_v13 = vadd.f32 %v2734_v59, %v4318_v23  ;;  %v2101_v63 = vpop.f32.mrb[151].mxu1 }
 0x3a0   :  { %v2102_v60 = vadd.f32 %v4318_v23, %v2101_v63 }
 0x3a1   :  { %2333 = vst [vmem:[%s4581_s5 + $0xb8] sm:$0xff] %v2107_v13 }
 0x3a2   :  { %2332 = vst [vmem:[%s4581_s5 + $0xb0] sm:$0xff] %v2102_v60 }
 0x3a6   :  { %v2737_v61 = vpop.f32.mrb[152].mxu1 }
 0x3a7   :  { %v2117_v16 = vadd.f32 %v2737_v61, %v4318_v23  ;;  %v2111_v4 = vpop.f32.mrb[153].mxu1 }
 0x3a8   :  { %v2112_v1 = vadd.f32 %v4318_v23, %v2111_v4 }
 0x3a9   :  { %2335 = vst [vmem:[%s4581_s5 + $0xc8] sm:$0xff] %v2117_v16 }
 0x3aa   :  { %2334 = vst [vmem:[%s4581_s5 + $0xc0] sm:$0xff] %v2112_v1 }
 0x3ae   :  { %v2740_v3 = vpop.f32.mrb[154].mxu1 }
 0x3af   :  { %v2127_v20 = vadd.f32 %v2740_v3, %v4318_v23  ;;  %v2121_v11 = vpop.f32.mrb[155].mxu1 }
 0x3b0   :  { %v2122_v5 = vadd.f32 %v4318_v23, %v2121_v11 }
 0x3b1   :  { %2337 = vst [vmem:[%s4581_s5 + $0xd8] sm:$0xff] %v2127_v20 }
 0x3b2   :  { %2336 = vst [vmem:[%s4581_s5 + $0xd0] sm:$0xff] %v2122_v5 }
 0x3b6   :  { %v2743_v6 = vpop.f32.mrb[156].mxu1 }
 0x3b7   :  { %v2137_v22 = vadd.f32 %v2743_v6, %v4318_v23  ;;  %v2131_v15 = vpop.f32.mrb[157].mxu1 }
 0x3b8   :  { %v2132_v7 = vadd.f32 %v4318_v23, %v2131_v15 }
 0x3b9   :  { %2339 = vst [vmem:[%s4581_s5 + $0xe8] sm:$0xff] %v2137_v22 }
 0x3ba   :  { %2338 = vst [vmem:[%s4581_s5 + $0xe0] sm:$0xff] %v2132_v7 }
 0x3be   :  { %v2746_v9 = vpop.f32.mrb[158].mxu1 }
 0x3bf   :  { %v2147_v28 = vadd.f32 %v2746_v9, %v4318_v23  ;;  %v2141_v10 = vpop.f32.mrb[159].mxu1 }
 0x3c0   :  { %v2142_v12 = vadd.f32 %v4318_v23, %v2141_v10 }
 0x3c1   :  { %2341 = vst [vmem:[%s4581_s5 + $0xf8] sm:$0xff] %v2147_v28 }
 0x3c2   :  { %2340 = vst [vmem:[%s4581_s5 + $0xf0] sm:$0xff] %v2142_v12 }
 0x3c8   :  { %v2749_v30 = vpop.f32.mrb[160].mxu1 }
 0x3c9   :  { %v2157_v27 = vadd.f32 %v2749_v30, %v4318_v23  ;;  %v2151_v14 = vpop.f32.mrb[161].mxu1 }
 0x3ca   :  { %v2152_v17 = vadd.f32 %v4318_v23, %v2151_v14 }
 0x3cb   :  { %2343 = vst [vmem:[%s4581_s5 + $0x108] sm:$0xff] %v2157_v27 }
 0x3cc   :  { %2342 = vst [vmem:[%s4581_s5 + $0x100] sm:$0xff] %v2152_v17 }
 0x3d0   :  { %v2752_v35 = vpop.f32.mrb[162].mxu1 }
 0x3d1   :  { %v2167_v34 = vadd.f32 %v2752_v35, %v4318_v23  ;;  %v2161_v18 = vpop.f32.mrb[163].mxu1 }
 0x3d2   :  { %v2162_v19 = vadd.f32 %v4318_v23, %v2161_v18 }
 0x3d3   :  { %2345 = vst [vmem:[%s4581_s5 + $0x118] sm:$0xff] %v2167_v34 }
 0x3d4   :  { %2344 = vst [vmem:[%s4581_s5 + $0x110] sm:$0xff] %v2162_v19 }
 0x3d8   :  { %v2755_v38 = vpop.f32.mrb[164].mxu1 }
 0x3d9   :  { %v2177_v39 = vadd.f32 %v2755_v38, %v4318_v23  ;;  %v2171_v21 = vpop.f32.mrb[165].mxu1 }
 0x3da   :  { %v2172_v24 = vadd.f32 %v4318_v23, %v2171_v21 }
 0x3db   :  { %2347 = vst [vmem:[%s4581_s5 + $0x128] sm:$0xff] %v2177_v39 }
 0x3dc   :  { %2346 = vst [vmem:[%s4581_s5 + $0x120] sm:$0xff] %v2172_v24 }
 0x3e0   :  { %v2758_v45 = vpop.f32.mrb[166].mxu1 }
 0x3e1   :  { %v2187_v44 = vadd.f32 %v2758_v45, %v4318_v23  ;;  %v2181_v25 = vpop.f32.mrb[167].mxu1 }
 0x3e2   :  { %v2182_v47 = vadd.f32 %v4318_v23, %v2181_v25 }
 0x3e3   :  { %2349 = vst [vmem:[%s4581_s5 + $0x138] sm:$0xff] %v2187_v44 }
 0x3e4   :  { %2348 = vst [vmem:[%s4581_s5 + $0x130] sm:$0xff] %v2182_v47 }
 0x3e8   :  { %v2761_v26 = vpop.f32.mrb[168].mxu1 }
 0x3e9   :  { %v2197_v48 = vadd.f32 %v2761_v26, %v4318_v23  ;;  %v2191_v29 = vpop.f32.mrb[169].mxu1 }
 0x3ea   :  { %v2192_v54 = vadd.f32 %v4318_v23, %v2191_v29 }
 0x3eb   :  { %2351 = vst [vmem:[%s4581_s5 + $0x148] sm:$0xff] %v2197_v48 }
 0x3ec   :  { %2350 = vst [vmem:[%s4581_s5 + $0x140] sm:$0xff] %v2192_v54 }
 0x3f0   :  { %v2764_v31 = vpop.f32.mrb[170].mxu1 }
 0x3f1   :  { %v2207_v50 = vadd.f32 %v2764_v31, %v4318_v23  ;;  %v2201_v32 = vpop.f32.mrb[171].mxu1 }
 0x3f2   :  { %v2202_v33 = vadd.f32 %v4318_v23, %v2201_v32 }
 0x3f3   :  { %2353 = vst [vmem:[%s4581_s5 + $0x158] sm:$0xff] %v2207_v50 }
 0x3f4   :  { %2352 = vst [vmem:[%s4581_s5 + $0x150] sm:$0xff] %v2202_v33 }
 0x3f8   :  { %v2767_v56 = vpop.f32.mrb[172].mxu1 }
 0x3f9   :  { %v2217_v36 = vadd.f32 %v2767_v56, %v4318_v23  ;;  %v2211_v40 = vpop.f32.mrb[173].mxu1 }
 0x3fa   :  { %v2212_v58 = vadd.f32 %v4318_v23, %v2211_v40 }
 0x3fb   :  { %2355 = vst [vmem:[%s4581_s5 + $0x168] sm:$0xff] %v2217_v36 }
 0x3fc   :  { %2354 = vst [vmem:[%s4581_s5 + $0x160] sm:$0xff] %v2212_v58 }
 0x400   :  { %v2770_v37 = vpop.f32.mrb[174].mxu1 }
 0x401   :  { %v2227_v41 = vadd.f32 %v2770_v37, %v4318_v23  ;;  %v2221_v62 = vpop.f32.mrb[175].mxu1 }
 0x402   :  { %v2222_v42 = vadd.f32 %v4318_v23, %v2221_v62 }
 0x403   :  { %2357 = vst [vmem:[%s4581_s5 + $0x178] sm:$0xff] %v2227_v41 }
 0x404   :  { %2356 = vst [vmem:[%s4581_s5 + $0x170] sm:$0xff] %v2222_v42 }
 0x408   :  { %v2773_v43 = vpop.f32.mrb[176].mxu1 }
 0x409   :  { %v2237_v46 = vadd.f32 %v2773_v43, %v4318_v23  ;;  %v2231_v2 = vpop.f32.mrb[177].mxu1 }
 0x40a   :  { %v2232_v49 = vadd.f32 %v4318_v23, %v2231_v2 }
 0x40b   :  { %2359 = vst [vmem:[%s4581_s5 + $0x188] sm:$0xff] %v2237_v46 }
 0x40c   :  { %2358 = vst [vmem:[%s4581_s5 + $0x180] sm:$0xff] %v2232_v49 }
 0x410   :  { %v2776_v51 = vpop.f32.mrb[178].mxu1 }
 0x411   :  { %v2247_v0 = vadd.f32 %v2776_v51, %v4318_v23  ;;  %v2241_v52 = vpop.f32.mrb[179].mxu1 }
 0x412   :  { %v2242_v53 = vadd.f32 %v4318_v23, %v2241_v52 }
 0x413   :  { %2361 = vst [vmem:[%s4581_s5 + $0x198] sm:$0xff] %v2247_v0 }
 0x414   :  { %2360 = vst [vmem:[%s4581_s5 + $0x190] sm:$0xff] %v2242_v53 }
 0x418   :  { %v2779_v8 = vpop.f32.mrb[180].mxu1 }
 0x419   :  { %v2257_v55 = vadd.f32 %v2779_v8, %v4318_v23  ;;  %v2251_v57 = vpop.f32.mrb[181].mxu1 }
 0x41a   :  { %v2252_v59 = vadd.f32 %v4318_v23, %v2251_v57 }
 0x41b   :  { %2363 = vst [vmem:[%s4581_s5 + $0x1a8] sm:$0xff] %v2257_v55 }
 0x41c   :  { %2362 = vst [vmem:[%s4581_s5 + $0x1a0] sm:$0xff] %v2252_v59 }
 0x420   :  { %v2782_v13 = vpop.f32.mrb[182].mxu1 }
 0x421   :  { %v2267_v63 = vadd.f32 %v2782_v13, %v4318_v23  ;;  %v2261_v60 = vpop.f32.mrb[183].mxu1 }
 0x422   :  { %v2262_v61 = vadd.f32 %v4318_v23, %v2261_v60 }
 0x423   :  { %2365 = vst [vmem:[%s4581_s5 + $0x1b8] sm:$0xff] %v2267_v63 }
 0x424   :  { %2364 = vst [vmem:[%s4581_s5 + $0x1b0] sm:$0xff] %v2262_v61 }
 0x428   :  { %v2785_v16 = vpop.f32.mrb[184].mxu1 }
 0x429   :  { %v2277_v4 = vadd.f32 %v2785_v16, %v4318_v23  ;;  %v2271_v1 = vpop.f32.mrb[185].mxu1 }
 0x42a   :  { %v2272_v3 = vadd.f32 %v4318_v23, %v2271_v1 }
 0x42b   :  { %2367 = vst [vmem:[%s4581_s5 + $0x1c8] sm:$0xff] %v2277_v4 }
 0x42c   :  { %2366 = vst [vmem:[%s4581_s5 + $0x1c0] sm:$0xff] %v2272_v3 }
 0x430   :  { %v2788_v20 = vpop.f32.mrb[186].mxu1 }
 0x431   :  { %v2287_v11 = vadd.f32 %v2788_v20, %v4318_v23  ;;  %v2281_v5 = vpop.f32.mrb[187].mxu1 }
 0x432   :  { %v2282_v6 = vadd.f32 %v4318_v23, %v2281_v5 }
 0x433   :  { %2369 = vst [vmem:[%s4581_s5 + $0x1d8] sm:$0xff] %v2287_v11 }
 0x434   :  { %2368 = vst [vmem:[%s4581_s5 + $0x1d0] sm:$0xff] %v2282_v6 }
 0x438   :  { %v2791_v22 = vpop.f32.mrb[188].mxu1 }
 0x439   :  { %v2297_v15 = vadd.f32 %v2791_v22, %v4318_v23  ;;  %v2291_v7 = vpop.f32.mrb[189].mxu1 }
 0x43a   :  { %v2292_v9 = vadd.f32 %v4318_v23, %v2291_v7 }
 0x43b   :  { %2371 = vst [vmem:[%s4581_s5 + $0x1e8] sm:$0xff] %v2297_v15 }
 0x43c   :  { %2370 = vst [vmem:[%s4581_s5 + $0x1e0] sm:$0xff] %v2292_v9 }
 0x440   :  { %v2794_v28 = vpop.f32.mrb[190].mxu1 }
 0x441   :  { %v2307_v10 = vadd.f32 %v2794_v28, %v4318_v23  ;;  %v2301_v12 = vpop.f32.mrb[191].mxu1 }
 0x442   :  { %v2302_v30 = vadd.f32 %v4318_v23, %v2301_v12 }
 0x443   :  { %2373 = vst [vmem:[%s4581_s5 + $0x1f8] sm:$0xff] %v2307_v10 }
 0x444   :  { %2372 = vst [vmem:[%s4581_s5 + $0x1f0] sm:$0xff] %v2302_v30 }

// kernel: gnn_forward.3
= control target key start
LH: loop header
LB: loop body
LE: loop exit
PB: predicated region body
PF: predicated region fallthrough
CT: control target
= control target key end

     0   :  { %v2404_v0 = vmov 0.0|0.0   ;;  %vm2406_vm4 = vmmov 0   ;;  %vm1877_vm5 = vcmask 31744   ;;  %s3903_s2 = inlined_call_operand.vmem [shape: f32[512,128], index: 2, kind: input, shape index: {}]   ;;  %s3904_s1 = inlined_call_operand.vmem [shape: f32[512,512], index: 1, kind: input, shape index: {}]   ;;  %s3905_s0 = inlined_call_operand.vmem [shape: s32[1,512], index: 0, kind: input, shape index: {}]   ;;  %s3906_s3 = inlined_call_operand.vmem [shape: f32[128,128], index: 3, kind: input, shape index: {}]   ;;  %s3907_s5 = inlined_call_operand.vmem [shape: f32[128,4], index: 5, kind: input, shape index: {}]   ;;  %s3908_s4 = inlined_call_operand.vmem [shape: f32[1,128], index: 4, kind: input, shape index: {}]   ;;  %s3909_s6 = inlined_call_operand.vmem [shape: f32[1,4], index: 6, kind: input, shape index: {}]   ;;  %s3910_s7 = inlined_call_operand.vmem [shape: f32[8,4], index: 7, kind: output, shape index: {}]  }
   0x1   :  { %2079 = vmatprep.subr.bf16.mxu0 %v2404_v0  ;;  %v420_v1 = vld [vmem:[%s3903_s2] sm:$0xff]  ;;  %v421_v2 = vld [vmem:[%s3903_s2 + $0x8] sm:$0xff]  ;;  %v422_v3 = vld [vmem:[%s3903_s2 + $0x10] sm:$0xff]  ;;  %2287 = vmatprep.subr.bf16.mxu1 %v2404_v0 }
   0x2   :  { %v2080_v4 = vpack.c.bf16 %v421_v2, %v420_v1  ;;  %v423_v5 = vld [vmem:[%s3903_s2 + $0x18] sm:$0xff]  ;;  %v424_v7 = vld [vmem:[%s3903_s2 + $0x20] sm:$0xff]  ;;  %v425_v8 = vld [vmem:[%s3903_s2 + $0x28] sm:$0xff] }
   0x3   :  { %v2083_v6 = vpack.c.bf16 %v423_v5, %v422_v3  ;;  %v2086_v9 = vpack.c.bf16 %v425_v8, %v424_v7  ;;  %v426_v10 = vld [vmem:[%s3903_s2 + $0x30] sm:$0xff]  ;;  %v427_v11 = vld [vmem:[%s3903_s2 + $0x38] sm:$0xff]  ;;  %v452_v12 = vld [vmem:[%s3903_s2 + $0x100] sm:$0xff] }
   0x4   :  { %2081 = vmatpush1.bf16.msra.mxu0 %v2080_v4  ;;  %v453_v13 = vld [vmem:[%s3903_s2 + $0x108] sm:$0xff]  ;;  %v454_v15 = vld [vmem:[%s3903_s2 + $0x110] sm:$0xff]  ;;  %v2089_v16 = vpack.c.bf16 %v427_v11, %v426_v10  ;;  %v455_v17 = vld [vmem:[%s3903_s2 + $0x118] sm:$0xff] }
   0x5   :  { %2082 = vmatprep.subr.bf16.mxu0 %v2404_v0  ;;  %v2482_v14 = vpack.c.bf16 %v453_v13, %v452_v12  ;;  %v428_v18 = vld [vmem:[%s3903_s2 + $0x40] sm:$0xff]  ;;  %v429_v19 = vld [vmem:[%s3903_s2 + $0x48] sm:$0xff]  ;;  %v2498_v20 = vpack.c.bf16 %v455_v17, %v454_v15  ;;  %v430_v25 = vld [vmem:[%s3903_s2 + $0x50] sm:$0xff] }
   0x6   :  { %v165_v21 = vld [vmem:[%s3904_s1 + $0x8] sm:$0xff]  ;;  %v456_v22 = vld [vmem:[%s3903_s2 + $0x120] sm:$0xff]  ;;  %v2092_v24 = vpack.c.bf16 %v429_v19, %v428_v18  ;;  %v431_v26 = vld [vmem:[%s3903_s2 + $0x58] sm:$0xff] }
   0x7   :  { %2303 = vmatpush1.bf16.msra.mxu1 %v2482_v14  ;;  %v457_v23 = vld [vmem:[%s3903_s2 + $0x128] sm:$0xff]  ;;  %548 = vmatprep.mubr.f32.mxu0 %v165_v21  ;;  %v458_v28 = vld [vmem:[%s3903_s2 + $0x130] sm:$0xff]  ;;  %v459_v29 = vld [vmem:[%s3903_s2 + $0x138] sm:$0xff]  ;;  %v2095_v30 = vpack.c.bf16 %v431_v26, %v430_v25 }
   0x8   :  { %2084 = vmatpush1.bf16.msra.mxu0 %v2083_v6  ;;  %2288 = vmatprep.subr.bf16.mxu1 %v2404_v0  ;;  %v2518_v27 = vpack.c.bf16 %v457_v23, %v456_v22  ;;  %v432_v31 = vld [vmem:[%s3903_s2 + $0x60] sm:$0xff]  ;;  %v433_v32 = vld [vmem:[%s3903_s2 + $0x68] sm:$0xff]  ;;  %v2535_v33 = vpack.c.bf16 %v459_v29, %v458_v28  ;;  %v434_v37 = vld [vmem:[%s3903_s2 + $0x70] sm:$0xff] }
   0x9   :  { %2085 = vmatprep.subr.bf16.mxu0 %v2404_v0  ;;  %v460_v34 = vld [vmem:[%s3903_s2 + $0x140] sm:$0xff]  ;;  %v461_v35 = vld [vmem:[%s3903_s2 + $0x148] sm:$0xff]  ;;  %v2098_v36 = vpack.c.bf16 %v433_v32, %v432_v31  ;;  %v435_v38 = vld [vmem:[%s3903_s2 + $0x78] sm:$0xff] }
   0xa   :  { %v2552_v39 = vpack.c.bf16 %v461_v35, %v460_v34  ;;  %v462_v40 = vld [vmem:[%s3903_s2 + $0x150] sm:$0xff]  ;;  %v463_v41 = vld [vmem:[%s3903_s2 + $0x158] sm:$0xff]  ;;  %v2101_v42 = vpack.c.bf16 %v435_v38, %v434_v37  ;;  %v436_v43 = vld [vmem:[%s3903_s2 + $0x80] sm:$0xff] }
   0xb   :  { %2304 = vmatpush1.bf16.msra.mxu1 %v2498_v20  ;;  %v437_v44 = vld [vmem:[%s3903_s2 + $0x88] sm:$0xff]  ;;  %v2569_v45 = vpack.c.bf16 %v463_v41, %v462_v40  ;;  %v464_v46 = vld [vmem:[%s3903_s2 + $0x160] sm:$0xff]  ;;  %v219_v48 = vld [vmem:[%s3904_s1 + $0x1b8] sm:$0xff] }
   0xc   :  { %2087 = vmatpush1.bf16.msra.mxu0 %v2086_v9  ;;  %2289 = vmatprep.subr.bf16.mxu1 %v2404_v0  ;;  %v465_v47 = vld [vmem:[%s3903_s2 + $0x168] sm:$0xff]  ;;  %v2104_v49 = vpack.c.bf16 %v437_v44, %v436_v43  ;;  %v438_v50 = vld [vmem:[%s3903_s2 + $0x90] sm:$0xff]  ;;  %v439_v51 = vld [vmem:[%s3903_s2 + $0x98] sm:$0xff] }
   0xd   :  { %2088 = vmatprep.subr.bf16.mxu0 %v2404_v0  ;;  %998 = vmatprep.mubr.f32.mxu1 %v219_v48  ;;  %v2589_v52 = vpack.c.bf16 %v465_v47, %v464_v46  ;;  %v466_v53 = vld [vmem:[%s3903_s2 + $0x170] sm:$0xff]  ;;  %v467_v54 = vld [vmem:[%s3903_s2 + $0x178] sm:$0xff]  ;;  %v2107_v55 = vpack.c.bf16 %v439_v51, %v438_v50  ;;  %v440_v56 = vld [vmem:[%s3903_s2 + $0xa0] sm:$0xff] }
   0xe   :  { %v441_v57 = vld [vmem:[%s3903_s2 + $0xa8] sm:$0xff]  ;;  %v2606_v58 = vpack.c.bf16 %v467_v54, %v466_v53  ;;  %v468_v59 = vld [vmem:[%s3903_s2 + $0x180] sm:$0xff]  ;;  %v442_v62 = vld [vmem:[%s3903_s2 + $0xb0] sm:$0xff] }
   0xf   :  { %2305 = vmatpush1.bf16.msra.mxu1 %v2518_v27  ;;  %v469_v60 = vld [vmem:[%s3903_s2 + $0x188] sm:$0xff]  ;;  %v2110_v61 = vpack.c.bf16 %v441_v57, %v440_v56  ;;  %v443_v63 = vld [vmem:[%s3903_s2 + $0xb8] sm:$0xff]  ;;  %v470_v2 = vld [vmem:[%s3903_s2 + $0x190] sm:$0xff] }
  0x10   :  { %2090 = vmatpush1.bf16.msra.mxu0 %v2089_v16  ;;  %2290 = vmatprep.subr.bf16.mxu1 %v2404_v0  ;;  %v2623_v1 = vpack.c.bf16 %v469_v60, %v468_v59  ;;  %v471_v3 = vld [vmem:[%s3903_s2 + $0x198] sm:$0xff]  ;;  %v2113_v4 = vpack.c.bf16 %v443_v63, %v442_v62  ;;  %v444_v5 = vld [vmem:[%s3903_s2 + $0xc0] sm:$0xff]  ;;  %v445_v6 = vld [vmem:[%s3903_s2 + $0xc8] sm:$0xff] }
  0x11   :  { %2091 = vmatprep.subr.bf16.mxu0 %v2404_v0  ;;  %v2640_v7 = vpack.c.bf16 %v471_v3, %v470_v2  ;;  %v472_v8 = vld [vmem:[%s3903_s2 + $0x1a0] sm:$0xff]  ;;  %v473_v9 = vld [vmem:[%s3903_s2 + $0x1a8] sm:$0xff]  ;;  %v2116_v10 = vpack.c.bf16 %v445_v6, %v444_v5  ;;  %v446_v11 = vld [vmem:[%s3903_s2 + $0xd0] sm:$0xff] }
  0x12   :  { %v447_v12 = vld [vmem:[%s3903_s2 + $0xd8] sm:$0xff]  ;;  %v2657_v13 = vpack.c.bf16 %v473_v9, %v472_v8  ;;  %v474_v15 = vld [vmem:[%s3903_s2 + $0x1b0] sm:$0xff]  ;;  %v448_v18 = vld [vmem:[%s3903_s2 + $0xe0] sm:$0xff] }
  0x13   :  { %2306 = vmatpush1.bf16.msra.mxu1 %v2535_v33  ;;  %v475_v16 = vld [vmem:[%s3903_s2 + $0x1b8] sm:$0xff]  ;;  %v2119_v17 = vpack.c.bf16 %v447_v12, %v446_v11  ;;  %v449_v19 = vld [vmem:[%s3903_s2 + $0xe8] sm:$0xff]  ;;  %v476_v22 = vld [vmem:[%s3903_s2 + $0x1c0] sm:$0xff] }
  0x14   :  { %2093 = vmatpush1.bf16.msra.mxu0 %v2092_v24  ;;  %2291 = vmatprep.subr.bf16.mxu1 %v2404_v0  ;;  %v2674_v21 = vpack.c.bf16 %v475_v16, %v474_v15  ;;  %v477_v23 = vld [vmem:[%s3903_s2 + $0x1c8] sm:$0xff]  ;;  %v2122_v24 = vpack.c.bf16 %v449_v19, %v448_v18  ;;  %v450_v25 = vld [vmem:[%s3903_s2 + $0xf0] sm:$0xff]  ;;  %v451_v26 = vld [vmem:[%s3903_s2 + $0xf8] sm:$0xff] }
  0x15   :  { %2094 = vmatprep.subr.bf16.mxu0 %v2404_v0  ;;  %v2691_v28 = vpack.c.bf16 %v477_v23, %v476_v22  ;;  %v478_v29 = vld [vmem:[%s3903_s2 + $0x1d0] sm:$0xff]  ;;  %v2125_v31 = vpack.c.bf16 %v451_v26, %v450_v25  ;;  %v480_v34 = vld [vmem:[%s3903_s2 + $0x1e0] sm:$0xff]  ;;  %v481_v35 = vld [vmem:[%s3903_s2 + $0x1e8] sm:$0xff] }
  0x16   :  { %v169_v37 = vld [vmem:[%s3904_s1 + $0x28] sm:$0xff]  ;;  %v2718_v38 = vpack.c.bf16 %v481_v35, %v480_v34  ;;  %v482_v40 = vld [vmem:[%s3903_s2 + $0x1f0] sm:$0xff]  ;;  %v483_v41 = vld [vmem:[%s3903_s2 + $0x1f8] sm:$0xff] }
  0x17   :  { %2307 = vmatpush1.bf16.msra.mxu1 %v2552_v39  ;;  %v173_v43 = vld [vmem:[%s3904_s1 + $0x48] sm:$0xff]  ;;  %v2736_v44 = vpack.c.bf16 %v483_v41, %v482_v40  ;;  %v172_v46 = vld [vmem:[%s3904_s1 + $0x40] sm:$0xff]  ;;  %v218_v47 = vld [vmem:[%s3904_s1 + $0x1b0] sm:$0xff] }
  0x18   :  { %2096 = vmatpush1.bf16.msra.mxu0 %v2095_v30  ;;  %2292 = vmatprep.subr.bf16.mxu1 %v2404_v0  ;;  %v479_v30 = vld [vmem:[%s3903_s2 + $0x1d8] sm:$0xff]  ;;  %v222_v50 = vld [vmem:[%s3904_s1 + $0x1d0] sm:$0xff]  ;;  %v180_v53 = vld [vmem:[%s3904_s1 + $0x80] sm:$0xff] }
  0x19   :  { %2097 = vmatprep.subr.bf16.mxu0 %v2404_v0  ;;  %v2702_v32 = vpack.c.bf16 %v479_v30, %v478_v29  ;;  %v223_v48 = vld [vmem:[%s3904_s1 + $0x1d8] sm:$0xff]  ;;  %v185_v54 = vld [vmem:[%s3904_s1 + $0xa8] sm:$0xff]  ;;  %v184_v56 = vld [vmem:[%s3904_s1 + $0xa0] sm:$0xff] }
  0x1a   :  { %v227_v51 = vld [vmem:[%s3904_s1 + $0x1f8] sm:$0xff]  ;;  %v189_v57 = vld [vmem:[%s3904_s1 + $0xc8] sm:$0xff]  ;;  %v188_v60 = vld [vmem:[%s3904_s1 + $0xc0] sm:$0xff] }
  0x1b   :  { %2308 = vmatpush1.bf16.msra.mxu1 %v2569_v45  ;;  %v235_v59 = vld [vmem:[%s3904_s1 + $0x238] sm:$0xff]  ;;  %v192_v63 = vld [vmem:[%s3904_s1 + $0xe0] sm:$0xff]  ;;  %v197_v2 = vld [vmem:[%s3904_s1 + $0x108] sm:$0xff] }
  0x1c   :  { %2099 = vmatpush1.bf16.msra.mxu0 %v2098_v36  ;;  %2293 = vmatprep.subr.bf16.mxu1 %v2404_v0  ;;  %v164_v36 = vld [vmem:[%s3904_s1] sm:$0xff]  ;;  %v239_v62 = vld [vmem:[%s3904_s1 + $0x258] sm:$0xff]  ;;  %v201_v5 = vld [vmem:[%s3904_s1 + $0x128] sm:$0xff] }
  0x1d   :  { %2100 = vmatprep.subr.bf16.mxu0 %v2404_v0  ;;  %v243_v3 = vld [vmem:[%s3904_s1 + $0x278] sm:$0xff]  ;;  %v200_v8 = vld [vmem:[%s3904_s1 + $0x120] sm:$0xff]  ;;  %v205_v9 = vld [vmem:[%s3904_s1 + $0x148] sm:$0xff] }
  0x1e   :  { %v247_v6 = vld [vmem:[%s3904_s1 + $0x298] sm:$0xff]  ;;  %v204_v11 = vld [vmem:[%s3904_s1 + $0x140] sm:$0xff]  ;;  %v209_v12 = vld [vmem:[%s3904_s1 + $0x168] sm:$0xff] }
  0x1f   :  { %2309 = vmatpush1.bf16.msra.mxu1 %v2589_v52  ;;  %v255_v15 = vld [vmem:[%s3904_s1 + $0x2d8] sm:$0xff]  ;;  %v208_v16 = vld [vmem:[%s3904_s1 + $0x160] sm:$0xff]  ;;  %v217_v22 = vld [vmem:[%s3904_s1 + $0x1a8] sm:$0xff] }
  0x20   :  { %2102 = vmatpush1.bf16.msra.mxu0 %v2101_v42  ;;  %2294 = vmatprep.subr.bf16.mxu1 %v2404_v0  ;;  %v168_v42 = vld [vmem:[%s3904_s1 + $0x20] sm:$0xff]  ;;  %v259_v18 = vld [vmem:[%s3904_s1 + $0x2f8] sm:$0xff]  ;;  %v221_v25 = vld [vmem:[%s3904_s1 + $0x1c8] sm:$0xff] }
  0x21   :  { %2103 = vmatprep.subr.bf16.mxu0 %v2404_v0  ;;  %v212_v19 = vld [vmem:[%s3904_s1 + $0x180] sm:$0xff]  ;;  %v263_v23 = vld [vmem:[%s3904_s1 + $0x318] sm:$0xff]  ;;  %v225_v30 = vld [vmem:[%s3904_s1 + $0x1e8] sm:$0xff] }
  0x22   :  { %v267_v26 = vld [vmem:[%s3904_s1 + $0x338] sm:$0xff]  ;;  %v220_v29 = vld [vmem:[%s3904_s1 + $0x1c0] sm:$0xff]  ;;  %v229_v35 = vld [vmem:[%s3904_s1 + $0x208] sm:$0xff] }
  0x23   :  { %2310 = vmatpush1.bf16.msra.mxu1 %v2606_v58  ;;  %v224_v34 = vld [vmem:[%s3904_s1 + $0x1e0] sm:$0xff]  ;;  %v233_v40 = vld [vmem:[%s3904_s1 + $0x228] sm:$0xff]  ;;  %v279_v41 = vld [vmem:[%s3904_s1 + $0x398] sm:$0xff] }
  0x24   :  { %2105 = vmatpush1.bf16.msra.mxu0 %v2104_v49  ;;  %2295 = vmatprep.subr.bf16.mxu1 %v2404_v0  ;;  %v181_v49 = vld [vmem:[%s3904_s1 + $0x88] sm:$0xff] }
  0x25   :  { %2106 = vmatprep.subr.bf16.mxu0 %v2404_v0 }
  0x27   :  { %2311 = vmatpush1.bf16.msra.mxu1 %v2623_v1 }
  0x28   :  { %2108 = vmatpush1.bf16.msra.mxu0 %v2107_v55  ;;  %2296 = vmatprep.subr.bf16.mxu1 %v2404_v0  ;;  %v231_v55 = vld [vmem:[%s3904_s1 + $0x218] sm:$0xff] }
  0x29   :  { %2109 = vmatprep.subr.bf16.mxu0 %v2404_v0 }
  0x2b   :  { %2312 = vmatpush1.bf16.msra.mxu1 %v2640_v7 }
  0x2c   :  { %2111 = vmatpush1.bf16.msra.mxu0 %v2110_v61  ;;  %2297 = vmatprep.subr.bf16.mxu1 %v2404_v0  ;;  %v193_v61 = vld [vmem:[%s3904_s1 + $0xe8] sm:$0xff] }
  0x2d   :  { %2112 = vmatprep.subr.bf16.mxu0 %v2404_v0 }
  0x2f   :  { %2313 = vmatpush1.bf16.msra.mxu1 %v2657_v13 }
  0x30   :  { %2114 = vmatpush1.bf16.msra.mxu0 %v2113_v4  ;;  %2298 = vmatprep.subr.bf16.mxu1 %v2404_v0  ;;  %v196_v4 = vld [vmem:[%s3904_s1 + $0x100] sm:$0xff] }
  0x31   :  { %2115 = vmatprep.subr.bf16.mxu0 %v2404_v0 }
  0x33   :  { %2314 = vmatpush1.bf16.msra.mxu1 %v2674_v21 }
  0x34   :  { %2117 = vmatpush1.bf16.msra.mxu0 %v2116_v10  ;;  %2299 = vmatprep.subr.bf16.mxu1 %v2404_v0  ;;  %v251_v10 = vld [vmem:[%s3904_s1 + $0x2b8] sm:$0xff] }
  0x35   :  { %2118 = vmatprep.subr.bf16.mxu0 %v2404_v0 }
  0x37   :  { %2315 = vmatpush1.bf16.msra.mxu1 %v2691_v28 }
  0x38   :  { %2120 = vmatpush1.bf16.msra.mxu0 %v2119_v17  ;;  %2300 = vmatprep.subr.bf16.mxu1 %v2404_v0  ;;  %v213_v17 = vld [vmem:[%s3904_s1 + $0x188] sm:$0xff] }
  0x39   :  { %2121 = vmatprep.subr.bf16.mxu0 %v2404_v0 }
  0x3b   :  { %2316 = vmatpush1.bf16.msra.mxu1 %v2702_v32 }
  0x3c   :  { %2123 = vmatpush1.bf16.msra.mxu0 %v2122_v24  ;;  %2301 = vmatprep.subr.bf16.mxu1 %v2404_v0  ;;  %v216_v24 = vld [vmem:[%s3904_s1 + $0x1a0] sm:$0xff] }
  0x3d   :  { %2124 = vmatprep.subr.bf16.mxu0 %v2404_v0 }
  0x3f   :  { %2317 = vmatpush1.bf16.msra.mxu1 %v2718_v38 }
  0x40   :  { %2126 = vmatpush1.bf16.msra.mxu0 %v2125_v31  ;;  %2302 = vmatprep.subr.bf16.mxu1 %v2404_v0  ;;  %v271_v31 = vld [vmem:[%s3904_s1 + $0x358] sm:$0xff] }
  0x41   :  { %2127 = vmatprep.subr.bf16.mxu0 %v2404_v0 }
  0x43   :  { %549 = vmatmul.mubr.f32.vlgmr.msra.gmra.mrb[0].mxu0 %v164_v36  ;;  %2318 = vmatpush1.bf16.msra.mxu1 %v2736_v44  ;;  %v275_v36 = vld [vmem:[%s3904_s1 + $0x378] sm:$0xff] }
  0x44   :  { %553 = vmatprep.mubr.f32.mxu0 %v169_v37  ;;  %2129 = vmatpush1.bf16.msra.mxu0 %v2482_v14  ;;  %v177_v14 = vld [vmem:[%s3904_s1 + $0x68] sm:$0xff]  ;;  %v228_v37 = vld [vmem:[%s3904_s1 + $0x200] sm:$0xff] }
  0x45   :  { %2130 = vmatprep.subr.bf16.mxu0 %v2404_v0 }
  0x46   :  { %999 = vmatmul.mubr.f32.vlgmr.msra.gmra.mrb[0].mxu1 %v218_v47  ;;  %v241_v47 = vld [vmem:[%s3904_s1 + $0x268] sm:$0xff] }
  0x47   :  { %554 = vmatmul.mubr.f32.gmra.mrb[2].mxu0 %v168_v42  ;;  %1003 = vmatprep.mubr.f32.mxu1 %v223_v48  ;;  %v232_v42 = vld [vmem:[%s3904_s1 + $0x220] sm:$0xff]  ;;  %v282_v48 = vld [vmem:[%s3904_s1 + $0x3b0] sm:$0xff] }
  0x48   :  { %558 = vmatprep.mubr.f32.mxu0 %v173_v43  ;;  %2132 = vmatpush1.bf16.msra.mxu0 %v2498_v20  ;;  %v176_v20 = vld [vmem:[%s3904_s1 + $0x60] sm:$0xff]  ;;  %v237_v43 = vld [vmem:[%s3904_s1 + $0x248] sm:$0xff] }
  0x49   :  { %2133 = vmatprep.subr.bf16.mxu0 %v2404_v0 }
  0x4a   :  { %1004 = vmatmul.mubr.f32.gmra.mrb[2].mxu1 %v222_v50  ;;  %v245_v50 = vld [vmem:[%s3904_s1 + $0x288] sm:$0xff] }
  0x4b   :  { %559 = vmatmul.mubr.f32.gmra.mrb[4].mxu0 %v172_v46  ;;  %1008 = vmatprep.mubr.f32.mxu1 %v227_v51  ;;  %v283_v46 = vld [vmem:[%s3904_s1 + $0x3b8] sm:$0xff]  ;;  %v286_v51 = vld [vmem:[%s3904_s1 + $0x3d0] sm:$0xff] }
  0x4c   :  { %563 = vmatprep.mubr.f32.mxu0 %v177_v14  ;;  %2135 = vmatpush1.bf16.msra.mxu0 %v2518_v27  ;;  %v226_v27 = vld [vmem:[%s3904_s1 + $0x1f0] sm:$0xff]  ;;  %v236_v14 = vld [vmem:[%s3904_s1 + $0x240] sm:$0xff] }
  0x4d   :  { %2136 = vmatprep.subr.bf16.mxu0 %v2404_v0 }
  0x4e   :  { %1009 = vmatmul.mubr.f32.gmra.mrb[4].mxu1 %v226_v27  ;;  %v249_v27 = vld [vmem:[%s3904_s1 + $0x2a8] sm:$0xff] }
  0x4f   :  { %564 = vmatmul.mubr.f32.gmra.mrb[6].mxu0 %v176_v20  ;;  %1013 = vmatprep.mubr.f32.mxu1 %v231_v55  ;;  %v287_v20 = vld [vmem:[%s3904_s1 + $0x3d8] sm:$0xff]  ;;  %v290_v55 = vld [vmem:[%s3904_s1 + $0x3f0] sm:$0xff] }
  0x50   :  { %568 = vmatprep.mubr.f32.mxu0 %v181_v49  ;;  %2138 = vmatpush1.bf16.msra.mxu0 %v2535_v33  ;;  %v230_v33 = vld [vmem:[%s3904_s1 + $0x210] sm:$0xff]  ;;  %v240_v49 = vld [vmem:[%s3904_s1 + $0x260] sm:$0xff] }
  0x51   :  { %2139 = vmatprep.subr.bf16.mxu0 %v2404_v0 }
  0x52   :  { %1014 = vmatmul.mubr.f32.gmra.mrb[6].mxu1 %v230_v33  ;;  %v253_v33 = vld [vmem:[%s3904_s1 + $0x2c8] sm:$0xff] }
  0x53   :  { %569 = vmatmul.mubr.f32.gmra.mrb[8].mxu0 %v180_v53  ;;  %1018 = vmatprep.mubr.f32.mxu1 %v235_v59  ;;  %v291_v53 = vld [vmem:[%s3904_s1 + $0x3f8] sm:$0xff]  ;;  %v294_v59 = vld [vmem:[%s3904_s1 + $0x410] sm:$0xff] }
  0x54   :  { %573 = vmatprep.mubr.f32.mxu0 %v185_v54  ;;  %2141 = vmatpush1.bf16.msra.mxu0 %v2552_v39  ;;  %v234_v39 = vld [vmem:[%s3904_s1 + $0x230] sm:$0xff]  ;;  %v244_v54 = vld [vmem:[%s3904_s1 + $0x280] sm:$0xff] }
  0x55   :  { %2142 = vmatprep.subr.bf16.mxu0 %v2404_v0 }
  0x56   :  { %1019 = vmatmul.mubr.f32.gmra.mrb[8].mxu1 %v234_v39  ;;  %v257_v39 = vld [vmem:[%s3904_s1 + $0x2e8] sm:$0xff] }
  0x57   :  { %574 = vmatmul.mubr.f32.gmra.mrb[10].mxu0 %v184_v56  ;;  %1023 = vmatprep.mubr.f32.mxu1 %v239_v62  ;;  %v295_v56 = vld [vmem:[%s3904_s1 + $0x418] sm:$0xff]  ;;  %v298_v62 = vld [vmem:[%s3904_s1 + $0x430] sm:$0xff] }
  0x58   :  { %578 = vmatprep.mubr.f32.mxu0 %v189_v57  ;;  %2144 = vmatpush1.bf16.msra.mxu0 %v2569_v45  ;;  %v238_v45 = vld [vmem:[%s3904_s1 + $0x250] sm:$0xff]  ;;  %v248_v57 = vld [vmem:[%s3904_s1 + $0x2a0] sm:$0xff] }
  0x59   :  { %2145 = vmatprep.subr.bf16.mxu0 %v2404_v0 }
  0x5a   :  { %1024 = vmatmul.mubr.f32.gmra.mrb[10].mxu1 %v238_v45  ;;  %v261_v45 = vld [vmem:[%s3904_s1 + $0x308] sm:$0xff] }
  0x5b   :  { %579 = vmatmul.mubr.f32.gmra.mrb[12].mxu0 %v188_v60  ;;  %1028 = vmatprep.mubr.f32.mxu1 %v243_v3  ;;  %v299_v60 = vld [vmem:[%s3904_s1 + $0x438] sm:$0xff]  ;;  %v302_v3 = vld [vmem:[%s3904_s1 + $0x450] sm:$0xff] }
  0x5c   :  { %583 = vmatprep.mubr.f32.mxu0 %v193_v61  ;;  %2147 = vmatpush1.bf16.msra.mxu0 %v2589_v52  ;;  %v242_v52 = vld [vmem:[%s3904_s1 + $0x270] sm:$0xff]  ;;  %v252_v61 = vld [vmem:[%s3904_s1 + $0x2c0] sm:$0xff] }
  0x5d   :  { %2148 = vmatprep.subr.bf16.mxu0 %v2404_v0 }
  0x5e   :  { %1029 = vmatmul.mubr.f32.gmra.mrb[12].mxu1 %v242_v52  ;;  %v265_v52 = vld [vmem:[%s3904_s1 + $0x328] sm:$0xff] }
  0x5f   :  { %584 = vmatmul.mubr.f32.gmra.mrb[14].mxu0 %v192_v63  ;;  %1033 = vmatprep.mubr.f32.mxu1 %v247_v6  ;;  %v303_v63 = vld [vmem:[%s3904_s1 + $0x458] sm:$0xff]  ;;  %v306_v6 = vld [vmem:[%s3904_s1 + $0x470] sm:$0xff] }
  0x60   :  { %588 = vmatprep.mubr.f32.mxu0 %v197_v2  ;;  %2150 = vmatpush1.bf16.msra.mxu0 %v2606_v58  ;;  %v246_v58 = vld [vmem:[%s3904_s1 + $0x290] sm:$0xff]  ;;  %v256_v2 = vld [vmem:[%s3904_s1 + $0x2e0] sm:$0xff] }
  0x61   :  { %2151 = vmatprep.subr.bf16.mxu0 %v2404_v0 }
  0x62   :  { %1034 = vmatmul.mubr.f32.gmra.mrb[14].mxu1 %v246_v58  ;;  %v269_v58 = vld [vmem:[%s3904_s1 + $0x348] sm:$0xff] }
  0x63   :  { %589 = vmatmul.mubr.f32.gmra.mrb[16].mxu0 %v196_v4  ;;  %1038 = vmatprep.mubr.f32.mxu1 %v251_v10  ;;  %v307_v4 = vld [vmem:[%s3904_s1 + $0x478] sm:$0xff]  ;;  %v310_v10 = vld [vmem:[%s3904_s1 + $0x490] sm:$0xff] }
  0x64   :  { %593 = vmatprep.mubr.f32.mxu0 %v201_v5  ;;  %2153 = vmatpush1.bf16.msra.mxu0 %v2623_v1  ;;  %v250_v1 = vld [vmem:[%s3904_s1 + $0x2b0] sm:$0xff]  ;;  %v260_v5 = vld [vmem:[%s3904_s1 + $0x300] sm:$0xff] }
  0x65   :  { %2154 = vmatprep.subr.bf16.mxu0 %v2404_v0 }
  0x66   :  { %1039 = vmatmul.mubr.f32.gmra.mrb[16].mxu1 %v250_v1  ;;  %v273_v1 = vld [vmem:[%s3904_s1 + $0x368] sm:$0xff] }
  0x67   :  { %594 = vmatmul.mubr.f32.gmra.mrb[18].mxu0 %v200_v8  ;;  %1043 = vmatprep.mubr.f32.mxu1 %v255_v15  ;;  %v311_v8 = vld [vmem:[%s3904_s1 + $0x498] sm:$0xff]  ;;  %v314_v15 = vld [vmem:[%s3904_s1 + $0x4b0] sm:$0xff] }
  0x68   :  { %598 = vmatprep.mubr.f32.mxu0 %v205_v9  ;;  %2156 = vmatpush1.bf16.msra.mxu0 %v2640_v7  ;;  %v254_v7 = vld [vmem:[%s3904_s1 + $0x2d0] sm:$0xff]  ;;  %v264_v9 = vld [vmem:[%s3904_s1 + $0x320] sm:$0xff] }
  0x69   :  { %2157 = vmatprep.subr.bf16.mxu0 %v2404_v0 }
  0x6a   :  { %1044 = vmatmul.mubr.f32.gmra.mrb[18].mxu1 %v254_v7  ;;  %v277_v7 = vld [vmem:[%s3904_s1 + $0x388] sm:$0xff] }
  0x6b   :  { %599 = vmatmul.mubr.f32.gmra.mrb[20].mxu0 %v204_v11  ;;  %1048 = vmatprep.mubr.f32.mxu1 %v259_v18  ;;  %v315_v11 = vld [vmem:[%s3904_s1 + $0x4b8] sm:$0xff]  ;;  %v318_v18 = vld [vmem:[%s3904_s1 + $0x4d0] sm:$0xff] }
  0x6c   :  { %603 = vmatprep.mubr.f32.mxu0 %v209_v12  ;;  %2159 = vmatpush1.bf16.msra.mxu0 %v2657_v13  ;;  %v258_v13 = vld [vmem:[%s3904_s1 + $0x2f0] sm:$0xff]  ;;  %v268_v12 = vld [vmem:[%s3904_s1 + $0x340] sm:$0xff] }
  0x6d   :  { %2160 = vmatprep.subr.bf16.mxu0 %v2404_v0 }
  0x6e   :  { %1049 = vmatmul.mubr.f32.gmra.mrb[20].mxu1 %v258_v13  ;;  %v281_v13 = vld [vmem:[%s3904_s1 + $0x3a8] sm:$0xff] }
  0x6f   :  { %604 = vmatmul.mubr.f32.gmra.mrb[22].mxu0 %v208_v16  ;;  %1053 = vmatprep.mubr.f32.mxu1 %v263_v23  ;;  %v319_v16 = vld [vmem:[%s3904_s1 + $0x4d8] sm:$0xff]  ;;  %v322_v23 = vld [vmem:[%s3904_s1 + $0x4f0] sm:$0xff] }
  0x70   :  { %608 = vmatprep.mubr.f32.mxu0 %v213_v17  ;;  %2162 = vmatpush1.bf16.msra.mxu0 %v2674_v21  ;;  %v262_v21 = vld [vmem:[%s3904_s1 + $0x310] sm:$0xff]  ;;  %v272_v17 = vld [vmem:[%s3904_s1 + $0x360] sm:$0xff] }
  0x71   :  { %2163 = vmatprep.subr.bf16.mxu0 %v2404_v0 }
  0x72   :  { %1054 = vmatmul.mubr.f32.gmra.mrb[22].mxu1 %v262_v21  ;;  %v285_v21 = vld [vmem:[%s3904_s1 + $0x3c8] sm:$0xff] }
  0x73   :  { %609 = vmatmul.mubr.f32.gmra.mrb[24].mxu0 %v212_v19  ;;  %1058 = vmatprep.mubr.f32.mxu1 %v267_v26  ;;  %v323_v19 = vld [vmem:[%s3904_s1 + $0x4f8] sm:$0xff]  ;;  %v326_v26 = vld [vmem:[%s3904_s1 + $0x510] sm:$0xff] }
  0x74   :  { %613 = vmatprep.mubr.f32.mxu0 %v217_v22  ;;  %2165 = vmatpush1.bf16.msra.mxu0 %v2691_v28  ;;  %v266_v28 = vld [vmem:[%s3904_s1 + $0x330] sm:$0xff]  ;;  %v276_v22 = vld [vmem:[%s3904_s1 + $0x380] sm:$0xff] }
  0x75   :  { %2166 = vmatprep.subr.bf16.mxu0 %v2404_v0 }
  0x76   :  { %1059 = vmatmul.mubr.f32.gmra.mrb[24].mxu1 %v266_v28  ;;  %v289_v28 = vld [vmem:[%s3904_s1 + $0x3e8] sm:$0xff] }
  0x77   :  { %614 = vmatmul.mubr.f32.gmra.mrb[26].mxu0 %v216_v24  ;;  %1063 = vmatprep.mubr.f32.mxu1 %v271_v31  ;;  %v327_v24 = vld [vmem:[%s3904_s1 + $0x518] sm:$0xff]  ;;  %v330_v31 = vld [vmem:[%s3904_s1 + $0x530] sm:$0xff] }
  0x78   :  { %618 = vmatprep.mubr.f32.mxu0 %v221_v25  ;;  %2168 = vmatpush1.bf16.msra.mxu0 %v2702_v32  ;;  %v270_v32 = vld [vmem:[%s3904_s1 + $0x350] sm:$0xff]  ;;  %v280_v25 = vld [vmem:[%s3904_s1 + $0x3a0] sm:$0xff] }
  0x79   :  { %2169 = vmatprep.subr.bf16.mxu0 %v2404_v0 }
  0x7a   :  { %1064 = vmatmul.mubr.f32.gmra.mrb[26].mxu1 %v270_v32  ;;  %v293_v32 = vld [vmem:[%s3904_s1 + $0x408] sm:$0xff] }
  0x7b   :  { %619 = vmatmul.mubr.f32.gmra.mrb[28].mxu0 %v220_v29  ;;  %1068 = vmatprep.mubr.f32.mxu1 %v275_v36  ;;  %v331_v29 = vld [vmem:[%s3904_s1 + $0x538] sm:$0xff]  ;;  %v334_v36 = vld [vmem:[%s3904_s1 + $0x550] sm:$0xff] }
  0x7c   :  { %623 = vmatprep.mubr.f32.mxu0 %v225_v30  ;;  %2171 = vmatpush1.bf16.msra.mxu0 %v2718_v38  ;;  %v274_v38 = vld [vmem:[%s3904_s1 + $0x370] sm:$0xff]  ;;  %v284_v30 = vld [vmem:[%s3904_s1 + $0x3c0] sm:$0xff] }
  0x7d   :  { %2172 = vmatprep.subr.bf16.mxu0 %v2404_v0 }
  0x7e   :  { %1069 = vmatmul.mubr.f32.gmra.mrb[28].mxu1 %v274_v38  ;;  %v297_v38 = vld [vmem:[%s3904_s1 + $0x428] sm:$0xff] }
  0x7f   :  { %624 = vmatmul.mubr.f32.gmra.mrb[30].mxu0 %v224_v34  ;;  %1073 = vmatprep.mubr.f32.mxu1 %v279_v41  ;;  %v335_v34 = vld [vmem:[%s3904_s1 + $0x558] sm:$0xff]  ;;  %v338_v41 = vld [vmem:[%s3904_s1 + $0x570] sm:$0xff] }
  0x80   :  { %628 = vmatprep.mubr.f32.mxu0 %v229_v35  ;;  %2174 = vmatpush1.bf16.msra.mxu0 %v2736_v44  ;;  %v278_v44 = vld [vmem:[%s3904_s1 + $0x390] sm:$0xff]  ;;  %v288_v35 = vld [vmem:[%s3904_s1 + $0x3e0] sm:$0xff] }
  0x82   :  { %1074 = vmatmul.mubr.f32.gmra.mrb[30].mxu1 %v278_v44  ;;  %v301_v44 = vld [vmem:[%s3904_s1 + $0x448] sm:$0xff] }
  0x83   :  { %629 = vmatmul.mubr.f32.gmra.mrb[32].mxu0 %v228_v37  ;;  %1078 = vmatprep.mubr.f32.mxu1 %v283_v46  ;;  %v339_v37 = vld [vmem:[%s3904_s1 + $0x578] sm:$0xff]  ;;  %v342_v46 = vld [vmem:[%s3904_s1 + $0x590] sm:$0xff] }
  0x84   :  { %633 = vmatprep.mubr.f32.mxu0 %v233_v40  ;;  %v292_v40 = vld [vmem:[%s3904_s1 + $0x400] sm:$0xff] }
  0x86   :  { %1079 = vmatmul.mubr.f32.gmra.mrb[32].mxu1 %v282_v48  ;;  %v305_v48 = vld [vmem:[%s3904_s1 + $0x468] sm:$0xff] }
  0x87   :  { %634 = vmatmul.mubr.f32.gmra.mrb[34].mxu0 %v232_v42  ;;  %1083 = vmatprep.mubr.f32.mxu1 %v287_v20  ;;  %v343_v42 = vld [vmem:[%s3904_s1 + $0x598] sm:$0xff]  ;;  %v346_v20 = vld [vmem:[%s3904_s1 + $0x5b0] sm:$0xff] }
  0x88   :  { %638 = vmatprep.mubr.f32.mxu0 %v237_v43  ;;  %v296_v43 = vld [vmem:[%s3904_s1 + $0x420] sm:$0xff] }
  0x8a   :  { %1084 = vmatmul.mubr.f32.gmra.mrb[34].mxu1 %v286_v51  ;;  %v309_v51 = vld [vmem:[%s3904_s1 + $0x488] sm:$0xff] }
  0x8b   :  { %639 = vmatmul.mubr.f32.gmra.mrb[36].mxu0 %v236_v14  ;;  %1088 = vmatprep.mubr.f32.mxu1 %v291_v53  ;;  %v347_v14 = vld [vmem:[%s3904_s1 + $0x5b8] sm:$0xff]  ;;  %v350_v53 = vld [vmem:[%s3904_s1 + $0x5d0] sm:$0xff] }
  0x8c   :  { %643 = vmatprep.mubr.f32.mxu0 %v241_v47  ;;  %v300_v47 = vld [vmem:[%s3904_s1 + $0x440] sm:$0xff] }
  0x8e   :  { %1089 = vmatmul.mubr.f32.gmra.mrb[36].mxu1 %v290_v55  ;;  %v313_v55 = vld [vmem:[%s3904_s1 + $0x4a8] sm:$0xff] }
  0x8f   :  { %644 = vmatmul.mubr.f32.gmra.mrb[38].mxu0 %v240_v49  ;;  %1093 = vmatprep.mubr.f32.mxu1 %v295_v56  ;;  %v351_v49 = vld [vmem:[%s3904_s1 + $0x5d8] sm:$0xff]  ;;  %v354_v56 = vld [vmem:[%s3904_s1 + $0x5f0] sm:$0xff] }
  0x90   :  { %648 = vmatprep.mubr.f32.mxu0 %v245_v50  ;;  %v304_v50 = vld [vmem:[%s3904_s1 + $0x460] sm:$0xff] }
  0x92   :  { %1094 = vmatmul.mubr.f32.gmra.mrb[38].mxu1 %v294_v59  ;;  %v317_v59 = vld [vmem:[%s3904_s1 + $0x4c8] sm:$0xff] }
  0x93   :  { %649 = vmatmul.mubr.f32.gmra.mrb[40].mxu0 %v244_v54  ;;  %1098 = vmatprep.mubr.f32.mxu1 %v299_v60  ;;  %v355_v54 = vld [vmem:[%s3904_s1 + $0x5f8] sm:$0xff]  ;;  %v358_v60 = vld [vmem:[%s3904_s1 + $0x610] sm:$0xff] }
  0x94   :  { %653 = vmatprep.mubr.f32.mxu0 %v249_v27  ;;  %v308_v27 = vld [vmem:[%s3904_s1 + $0x480] sm:$0xff] }
  0x96   :  { %1099 = vmatmul.mubr.f32.gmra.mrb[40].mxu1 %v298_v62  ;;  %v321_v62 = vld [vmem:[%s3904_s1 + $0x4e8] sm:$0xff] }
  0x97   :  { %654 = vmatmul.mubr.f32.gmra.mrb[42].mxu0 %v248_v57  ;;  %1103 = vmatprep.mubr.f32.mxu1 %v303_v63  ;;  %v359_v57 = vld [vmem:[%s3904_s1 + $0x618] sm:$0xff]  ;;  %v362_v63 = vld [vmem:[%s3904_s1 + $0x630] sm:$0xff] }
  0x98   :  { %658 = vmatprep.mubr.f32.mxu0 %v253_v33  ;;  %v312_v33 = vld [vmem:[%s3904_s1 + $0x4a0] sm:$0xff] }
  0x9a   :  { %1104 = vmatmul.mubr.f32.gmra.mrb[42].mxu1 %v302_v3  ;;  %v325_v3 = vld [vmem:[%s3904_s1 + $0x508] sm:$0xff] }
  0x9b   :  { %659 = vmatmul.mubr.f32.gmra.mrb[44].mxu0 %v252_v61  ;;  %1108 = vmatprep.mubr.f32.mxu1 %v307_v4  ;;  %v363_v61 = vld [vmem:[%s3904_s1 + $0x638] sm:$0xff]  ;;  %v366_v4 = vld [vmem:[%s3904_s1 + $0x650] sm:$0xff] }
  0x9c   :  { %663 = vmatprep.mubr.f32.mxu0 %v257_v39  ;;  %v316_v39 = vld [vmem:[%s3904_s1 + $0x4c0] sm:$0xff] }
  0x9e   :  { %1109 = vmatmul.mubr.f32.gmra.mrb[44].mxu1 %v306_v6  ;;  %v329_v6 = vld [vmem:[%s3904_s1 + $0x528] sm:$0xff] }
  0x9f   :  { %664 = vmatmul.mubr.f32.gmra.mrb[46].mxu0 %v256_v2  ;;  %1113 = vmatprep.mubr.f32.mxu1 %v311_v8  ;;  %v367_v2 = vld [vmem:[%s3904_s1 + $0x658] sm:$0xff]  ;;  %v370_v8 = vld [vmem:[%s3904_s1 + $0x670] sm:$0xff] }
  0xa0   :  { %668 = vmatprep.mubr.f32.mxu0 %v261_v45  ;;  %v320_v45 = vld [vmem:[%s3904_s1 + $0x4e0] sm:$0xff] }
  0xa2   :  { %1114 = vmatmul.mubr.f32.gmra.mrb[46].mxu1 %v310_v10  ;;  %v333_v10 = vld [vmem:[%s3904_s1 + $0x548] sm:$0xff] }
  0xa3   :  { %669 = vmatmul.mubr.f32.gmra.mrb[48].mxu0 %v260_v5  ;;  %1118 = vmatprep.mubr.f32.mxu1 %v315_v11  ;;  %v371_v5 = vld [vmem:[%s3904_s1 + $0x678] sm:$0xff]  ;;  %v374_v11 = vld [vmem:[%s3904_s1 + $0x690] sm:$0xff] }
  0xa4   :  { %673 = vmatprep.mubr.f32.mxu0 %v265_v52  ;;  %v324_v52 = vld [vmem:[%s3904_s1 + $0x500] sm:$0xff] }
  0xa6   :  { %1119 = vmatmul.mubr.f32.gmra.mrb[48].mxu1 %v314_v15  ;;  %v337_v15 = vld [vmem:[%s3904_s1 + $0x568] sm:$0xff] }
  0xa7   :  { %674 = vmatmul.mubr.f32.gmra.mrb[50].mxu0 %v264_v9  ;;  %1123 = vmatprep.mubr.f32.mxu1 %v319_v16  ;;  %v375_v9 = vld [vmem:[%s3904_s1 + $0x698] sm:$0xff]  ;;  %v378_v16 = vld [vmem:[%s3904_s1 + $0x6b0] sm:$0xff] }
  0xa8   :  { %678 = vmatprep.mubr.f32.mxu0 %v269_v58  ;;  %v328_v58 = vld [vmem:[%s3904_s1 + $0x520] sm:$0xff] }
  0xaa   :  { %1124 = vmatmul.mubr.f32.gmra.mrb[50].mxu1 %v318_v18  ;;  %v341_v18 = vld [vmem:[%s3904_s1 + $0x588] sm:$0xff] }
  0xab   :  { %679 = vmatmul.mubr.f32.gmra.mrb[52].mxu0 %v268_v12  ;;  %1128 = vmatprep.mubr.f32.mxu1 %v323_v19  ;;  %v379_v12 = vld [vmem:[%s3904_s1 + $0x6b8] sm:$0xff]  ;;  %v382_v19 = vld [vmem:[%s3904_s1 + $0x6d0] sm:$0xff] }
  0xac   :  { %683 = vmatprep.mubr.f32.mxu0 %v273_v1  ;;  %v332_v1 = vld [vmem:[%s3904_s1 + $0x540] sm:$0xff] }
  0xae   :  { %1129 = vmatmul.mubr.f32.gmra.mrb[52].mxu1 %v322_v23  ;;  %v345_v23 = vld [vmem:[%s3904_s1 + $0x5a8] sm:$0xff] }
  0xaf   :  { %684 = vmatmul.mubr.f32.gmra.mrb[54].mxu0 %v272_v17  ;;  %1133 = vmatprep.mubr.f32.mxu1 %v327_v24  ;;  %v383_v17 = vld [vmem:[%s3904_s1 + $0x6d8] sm:$0xff]  ;;  %v386_v24 = vld [vmem:[%s3904_s1 + $0x6f0] sm:$0xff] }
  0xb0   :  { %688 = vmatprep.mubr.f32.mxu0 %v277_v7  ;;  %v336_v7 = vld [vmem:[%s3904_s1 + $0x560] sm:$0xff] }
  0xb2   :  { %1134 = vmatmul.mubr.f32.gmra.mrb[54].mxu1 %v326_v26  ;;  %v349_v26 = vld [vmem:[%s3904_s1 + $0x5c8] sm:$0xff] }
  0xb3   :  { %689 = vmatmul.mubr.f32.gmra.mrb[56].mxu0 %v276_v22  ;;  %1138 = vmatprep.mubr.f32.mxu1 %v331_v29  ;;  %v387_v22 = vld [vmem:[%s3904_s1 + $0x6f8] sm:$0xff]  ;;  %v390_v29 = vld [vmem:[%s3904_s1 + $0x710] sm:$0xff] }
  0xb4   :  { %693 = vmatprep.mubr.f32.mxu0 %v281_v13  ;;  %v340_v13 = vld [vmem:[%s3904_s1 + $0x580] sm:$0xff] }
  0xb6   :  { %1139 = vmatmul.mubr.f32.gmra.mrb[56].mxu1 %v330_v31  ;;  %v353_v31 = vld [vmem:[%s3904_s1 + $0x5e8] sm:$0xff] }
  0xb7   :  { %694 = vmatmul.mubr.f32.gmra.mrb[58].mxu0 %v280_v25  ;;  %1143 = vmatprep.mubr.f32.mxu1 %v335_v34  ;;  %v391_v25 = vld [vmem:[%s3904_s1 + $0x718] sm:$0xff]  ;;  %v394_v34 = vld [vmem:[%s3904_s1 + $0x730] sm:$0xff] }
  0xb8   :  { %698 = vmatprep.mubr.f32.mxu0 %v285_v21  ;;  %v344_v21 = vld [vmem:[%s3904_s1 + $0x5a0] sm:$0xff] }
  0xba   :  { %1144 = vmatmul.mubr.f32.gmra.mrb[58].mxu1 %v334_v36  ;;  %v357_v36 = vld [vmem:[%s3904_s1 + $0x608] sm:$0xff] }
  0xbb   :  { %699 = vmatmul.mubr.f32.gmra.mrb[60].mxu0 %v284_v30  ;;  %1148 = vmatprep.mubr.f32.mxu1 %v339_v37  ;;  %v395_v30 = vld [vmem:[%s3904_s1 + $0x738] sm:$0xff]  ;;  %v398_v37 = vld [vmem:[%s3904_s1 + $0x750] sm:$0xff] }
  0xbc   :  { %703 = vmatprep.mubr.f32.mxu0 %v289_v28  ;;  %v348_v28 = vld [vmem:[%s3904_s1 + $0x5c0] sm:$0xff] }
  0xbe   :  { %1149 = vmatmul.mubr.f32.gmra.mrb[60].mxu1 %v338_v41  ;;  %v361_v41 = vld [vmem:[%s3904_s1 + $0x628] sm:$0xff] }
  0xbf   :  { %704 = vmatmul.mubr.f32.gmra.mrb[62].mxu0 %v288_v35  ;;  %1153 = vmatprep.mubr.f32.mxu1 %v343_v42  ;;  %v399_v35 = vld [vmem:[%s3904_s1 + $0x758] sm:$0xff]  ;;  %v402_v42 = vld [vmem:[%s3904_s1 + $0x770] sm:$0xff] }
  0xc0   :  { %708 = vmatprep.mubr.f32.mxu0 %v293_v32  ;;  %v352_v32 = vld [vmem:[%s3904_s1 + $0x5e0] sm:$0xff] }
  0xc2   :  { %1154 = vmatmul.mubr.f32.gmra.mrb[62].mxu1 %v342_v46  ;;  %v365_v46 = vld [vmem:[%s3904_s1 + $0x648] sm:$0xff] }
  0xc3   :  { %709 = vmatmul.mubr.f32.gmra.mrb[64].mxu0 %v292_v40  ;;  %1158 = vmatprep.mubr.f32.mxu1 %v347_v14  ;;  %v403_v40 = vld [vmem:[%s3904_s1 + $0x778] sm:$0xff]  ;;  %v406_v14 = vld [vmem:[%s3904_s1 + $0x790] sm:$0xff] }
  0xc4   :  { %713 = vmatprep.mubr.f32.mxu0 %v297_v38  ;;  %v356_v38 = vld [vmem:[%s3904_s1 + $0x600] sm:$0xff] }
  0xc6   :  { %1159 = vmatmul.mubr.f32.gmra.mrb[64].mxu1 %v346_v20  ;;  %v369_v20 = vld [vmem:[%s3904_s1 + $0x668] sm:$0xff] }
  0xc7   :  { %714 = vmatmul.mubr.f32.gmra.mrb[66].mxu0 %v296_v43  ;;  %1163 = vmatprep.mubr.f32.mxu1 %v351_v49  ;;  %v407_v43 = vld [vmem:[%s3904_s1 + $0x798] sm:$0xff]  ;;  %v410_v49 = vld [vmem:[%s3904_s1 + $0x7b0] sm:$0xff] }
  0xc8   :  { %718 = vmatprep.mubr.f32.mxu0 %v301_v44  ;;  %v360_v44 = vld [vmem:[%s3904_s1 + $0x620] sm:$0xff] }
  0xca   :  { %1164 = vmatmul.mubr.f32.gmra.mrb[66].mxu1 %v350_v53  ;;  %v373_v53 = vld [vmem:[%s3904_s1 + $0x688] sm:$0xff] }
  0xcb   :  { %719 = vmatmul.mubr.f32.gmra.mrb[68].mxu0 %v300_v47  ;;  %1168 = vmatprep.mubr.f32.mxu1 %v355_v54  ;;  %v411_v47 = vld [vmem:[%s3904_s1 + $0x7b8] sm:$0xff]  ;;  %v414_v54 = vld [vmem:[%s3904_s1 + $0x7d0] sm:$0xff] }
  0xcc   :  { %723 = vmatprep.mubr.f32.mxu0 %v305_v48  ;;  %v364_v48 = vld [vmem:[%s3904_s1 + $0x640] sm:$0xff] }
  0xce   :  { %1169 = vmatmul.mubr.f32.gmra.mrb[68].mxu1 %v354_v56  ;;  %v377_v56 = vld [vmem:[%s3904_s1 + $0x6a8] sm:$0xff] }
  0xcf   :  { %724 = vmatmul.mubr.f32.gmra.mrb[70].mxu0 %v304_v50  ;;  %1173 = vmatprep.mubr.f32.mxu1 %v359_v57  ;;  %v415_v50 = vld [vmem:[%s3904_s1 + $0x7d8] sm:$0xff]  ;;  %v418_v57 = vld [vmem:[%s3904_s1 + $0x7f0] sm:$0xff] }
  0xd0   :  { %728 = vmatprep.mubr.f32.mxu0 %v309_v51  ;;  %v368_v51 = vld [vmem:[%s3904_s1 + $0x660] sm:$0xff] }
  0xd2   :  { %1174 = vmatmul.mubr.f32.gmra.mrb[70].mxu1 %v358_v60  ;;  %v380_v60 = vld [vmem:[%s3904_s1 + $0x6c0] sm:$0xff] }
  0xd3   :  { %729 = vmatmul.mubr.f32.gmra.mrb[72].mxu0 %v308_v27  ;;  %1178 = vmatprep.mubr.f32.mxu1 %v363_v61  ;;  %v419_v27 = vld [vmem:[%s3904_s1 + $0x7f8] sm:$0xff]  ;;  %v385_v61 = vld [vmem:[%s3904_s1 + $0x6e8] sm:$0xff] }
  0xd4   :  { %733 = vmatprep.mubr.f32.mxu0 %v313_v55  ;;  %v372_v55 = vld [vmem:[%s3904_s1 + $0x680] sm:$0xff] }
  0xd6   :  { %1179 = vmatmul.mubr.f32.gmra.mrb[72].mxu1 %v362_v63 }
  0xd7   :  { %734 = vmatmul.mubr.f32.gmra.mrb[74].mxu0 %v312_v33  ;;  %1183 = vmatprep.mubr.f32.mxu1 %v367_v2  ;;  %v376_v33 = vld [vmem:[%s3904_s1 + $0x6a0] sm:$0xff] }
  0xd8   :  { %738 = vmatprep.mubr.f32.mxu0 %v317_v59  ;;  %v381_v59 = vld [vmem:[%s3904_s1 + $0x6c8] sm:$0xff]  ;;  %v388_v2 = vld [vmem:[%s3904_s1 + $0x700] sm:$0xff] }
  0xda   :  { %1184 = vmatmul.mubr.f32.gmra.mrb[74].mxu1 %v366_v4 }
  0xdb   :  { %739 = vmatmul.mubr.f32.gmra.mrb[76].mxu0 %v316_v39  ;;  %1188 = vmatprep.mubr.f32.mxu1 %v371_v5  ;;  %v384_v39 = vld [vmem:[%s3904_s1 + $0x6e0] sm:$0xff] }
  0xdc   :  { %743 = vmatprep.mubr.f32.mxu0 %v321_v62  ;;  %v389_v62 = vld [vmem:[%s3904_s1 + $0x708] sm:$0xff]  ;;  %v392_v5 = vld [vmem:[%s3904_s1 + $0x720] sm:$0xff] }
  0xde   :  { %1189 = vmatmul.mubr.f32.gmra.mrb[76].mxu1 %v370_v8 }
  0xdf   :  { %744 = vmatmul.mubr.f32.gmra.mrb[78].mxu0 %v320_v45  ;;  %1193 = vmatprep.mubr.f32.mxu1 %v375_v9  ;;  %v396_v9 = vld [vmem:[%s3904_s1 + $0x740] sm:$0xff] }
  0xe0   :  { %748 = vmatprep.mubr.f32.mxu0 %v325_v3  ;;  %v393_v3 = vld [vmem:[%s3904_s1 + $0x728] sm:$0xff] }
  0xe2   :  { %1194 = vmatmul.mubr.f32.gmra.mrb[78].mxu1 %v374_v11 }
  0xe3   :  { %749 = vmatmul.mubr.f32.gmra.mrb[80].mxu0 %v324_v52  ;;  %1198 = vmatprep.mubr.f32.mxu1 %v379_v12  ;;  %v400_v12 = vld [vmem:[%s3904_s1 + $0x760] sm:$0xff] }
  0xe4   :  { %753 = vmatprep.mubr.f32.mxu0 %v329_v6  ;;  %v397_v6 = vld [vmem:[%s3904_s1 + $0x748] sm:$0xff] }
  0xe6   :  { %1199 = vmatmul.mubr.f32.gmra.mrb[80].mxu1 %v378_v16 }
  0xe7   :  { %754 = vmatmul.mubr.f32.gmra.mrb[82].mxu0 %v328_v58  ;;  %1203 = vmatprep.mubr.f32.mxu1 %v383_v17  ;;  %v404_v17 = vld [vmem:[%s3904_s1 + $0x780] sm:$0xff] }
  0xe8   :  { %758 = vmatprep.mubr.f32.mxu0 %v333_v10  ;;  %v401_v10 = vld [vmem:[%s3904_s1 + $0x768] sm:$0xff] }
  0xea   :  { %1204 = vmatmul.mubr.f32.gmra.mrb[82].mxu1 %v382_v19 }
  0xeb   :  { %759 = vmatmul.mubr.f32.gmra.mrb[84].mxu0 %v332_v1  ;;  %1208 = vmatprep.mubr.f32.mxu1 %v387_v22  ;;  %v408_v22 = vld [vmem:[%s3904_s1 + $0x7a0] sm:$0xff] }
  0xec   :  { %763 = vmatprep.mubr.f32.mxu0 %v337_v15  ;;  %v405_v15 = vld [vmem:[%s3904_s1 + $0x788] sm:$0xff] }
  0xee   :  { %1209 = vmatmul.mubr.f32.gmra.mrb[84].mxu1 %v386_v24 }
  0xef   :  { %764 = vmatmul.mubr.f32.gmra.mrb[86].mxu0 %v336_v7  ;;  %1213 = vmatprep.mubr.f32.mxu1 %v391_v25  ;;  %v412_v25 = vld [vmem:[%s3904_s1 + $0x7c0] sm:$0xff] }
  0xf0   :  { %768 = vmatprep.mubr.f32.mxu0 %v341_v18  ;;  %v409_v18 = vld [vmem:[%s3904_s1 + $0x7a8] sm:$0xff] }
  0xf2   :  { %1214 = vmatmul.mubr.f32.gmra.mrb[86].mxu1 %v390_v29 }
  0xf3   :  { %769 = vmatmul.mubr.f32.gmra.mrb[88].mxu0 %v340_v13  ;;  %1218 = vmatprep.mubr.f32.mxu1 %v395_v30  ;;  %v416_v30 = vld [vmem:[%s3904_s1 + $0x7e0] sm:$0xff] }
  0xf4   :  { %773 = vmatprep.mubr.f32.mxu0 %v345_v23  ;;  %v413_v23 = vld [vmem:[%s3904_s1 + $0x7c8] sm:$0xff] }
  0xf6   :  { %1219 = vmatmul.mubr.f32.gmra.mrb[88].mxu1 %v394_v34 }
  0xf7   :  { %774 = vmatmul.mubr.f32.gmra.mrb[90].mxu0 %v344_v21  ;;  %1223 = vmatprep.mubr.f32.mxu1 %v399_v35  ;;  %v166_v35 = vld [vmem:[%s3904_s1 + $0x10] sm:$0xff] }
  0xf8   :  { %778 = vmatprep.mubr.f32.mxu0 %v349_v26  ;;  %v417_v26 = vld [vmem:[%s3904_s1 + $0x7e8] sm:$0xff] }
  0xfa   :  { %1224 = vmatmul.mubr.f32.gmra.mrb[90].mxu1 %v398_v37 }
  0xfb   :  { %779 = vmatmul.mubr.f32.gmra.mrb[92].mxu0 %v348_v28  ;;  %1228 = vmatprep.mubr.f32.mxu1 %v403_v40  ;;  %v170_v40 = vld [vmem:[%s3904_s1 + $0x30] sm:$0xff] }
  0xfc   :  { %783 = vmatprep.mubr.f32.mxu0 %v353_v31  ;;  %v167_v31 = vld [vmem:[%s3904_s1 + $0x18] sm:$0xff] }
  0xfe   :  { %1229 = vmatmul.mubr.f32.gmra.mrb[92].mxu1 %v402_v42 }
  0xff   :  { %784 = vmatmul.mubr.f32.gmra.mrb[94].mxu0 %v352_v32  ;;  %1233 = vmatprep.mubr.f32.mxu1 %v407_v43  ;;  %v174_v43 = vld [vmem:[%s3904_s1 + $0x50] sm:$0xff] }
 0x100   :  { %788 = vmatprep.mubr.f32.mxu0 %v357_v36  ;;  %v171_v36 = vld [vmem:[%s3904_s1 + $0x38] sm:$0xff] }
 0x102   :  { %1234 = vmatmul.mubr.f32.gmra.mrb[94].mxu1 %v406_v14 }
 0x103   :  { %789 = vmatmul.mubr.f32.gmra.mrb[96].mxu0 %v356_v38  ;;  %1238 = vmatprep.mubr.f32.mxu1 %v411_v47 }
 0x104   :  { %793 = vmatprep.mubr.f32.mxu0 %v361_v41  ;;  %v175_v41 = vld [vmem:[%s3904_s1 + $0x58] sm:$0xff] }
 0x106   :  { %1239 = vmatmul.mubr.f32.gmra.mrb[96].mxu1 %v410_v49  ;;  %v178_v49 = vld [vmem:[%s3904_s1 + $0x70] sm:$0xff] }
 0x107   :  { %794 = vmatmul.mubr.f32.gmra.mrb[98].mxu0 %v360_v44  ;;  %1243 = vmatprep.mubr.f32.mxu1 %v415_v50 }
 0x108   :  { %798 = vmatprep.mubr.f32.mxu0 %v365_v46  ;;  %v179_v46 = vld [vmem:[%s3904_s1 + $0x78] sm:$0xff] }
 0x10a   :  { %1244 = vmatmul.mubr.f32.gmra.mrb[98].mxu1 %v414_v54 }
 0x10b   :  { %799 = vmatmul.mubr.f32.gmra.mrb[100].mxu0 %v364_v48  ;;  %1248 = vmatprep.mubr.f32.mxu1 %v419_v27 }
 0x10c   :  { %803 = vmatprep.mubr.f32.mxu0 %v369_v20 }
 0x10e   :  { %1249 = vmatmul.mubr.f32.gmra.mrb[100].mxu1 %v418_v57 }
 0x10f   :  { %804 = vmatmul.mubr.f32.gmra.mrb[102].mxu0 %v368_v51  ;;  %v183_v51 = vld [vmem:[%s3904_s1 + $0x98] sm:$0xff] }
 0x110   :  { %808 = vmatprep.mubr.f32.mxu0 %v373_v53 }
 0x113   :  { %809 = vmatmul.mubr.f32.gmra.mrb[104].mxu0 %v372_v55 }
 0x114   :  { %813 = vmatprep.mubr.f32.mxu0 %v377_v56  ;;  %v182_v56 = vld [vmem:[%s3904_s1 + $0x90] sm:$0xff] }
 0x117   :  { %814 = vmatmul.mubr.f32.gmra.mrb[106].mxu0 %v376_v33  ;;  %v187_v33 = vld [vmem:[%s3904_s1 + $0xb8] sm:$0xff] }
 0x118   :  { %818 = vmatprep.mubr.f32.mxu0 %v381_v59 }
 0x119   :  { %v3397_v63 = vpop.f32.mrb[0].mxu1 }
 0x11a   :  { %v1002_v45 = vpop.f32.mrb[1].mxu1 }
 0x11b   :  { %819 = vmatmul.mubr.f32.gmra.mrb[108].mxu0 %v380_v60 }
 0x11c   :  { %823 = vmatprep.mubr.f32.mxu0 %v385_v61 }
 0x11d   :  { %v3405_v4 = vpop.f32.mrb[2].mxu1 }
 0x11e   :  { %v1007_v52 = vpop.f32.mrb[3].mxu1 }
 0x11f   :  { %824 = vmatmul.mubr.f32.gmra.mrb[110].mxu0 %v384_v39 }
 0x120   :  { %828 = vmatprep.mubr.f32.mxu0 %v389_v62  ;;  %v186_v62 = vld [vmem:[%s3904_s1 + $0xb0] sm:$0xff] }
 0x121   :  { %v3413_v8 = vpop.f32.mrb[4].mxu1 }
 0x122   :  { %v1012_v58 = vpop.f32.mrb[5].mxu1 }
 0x123   :  { %829 = vmatmul.mubr.f32.gmra.mrb[112].mxu0 %v388_v2 }
 0x124   :  { %833 = vmatprep.mubr.f32.mxu0 %v393_v3  ;;  %v191_v3 = vld [vmem:[%s3904_s1 + $0xd8] sm:$0xff] }
 0x125   :  { %v3421_v11 = vpop.f32.mrb[6].mxu1 }
 0x126   :  { %v1017_v1 = vpop.f32.mrb[7].mxu1 }
 0x127   :  { %834 = vmatmul.mubr.f32.gmra.mrb[114].mxu0 %v392_v5 }
 0x128   :  { %838 = vmatprep.mubr.f32.mxu0 %v397_v6 }
 0x129   :  { %v3429_v16 = vpop.f32.mrb[8].mxu1 }
 0x12a   :  { %v1022_v7 = vpop.f32.mrb[9].mxu1 }
 0x12b   :  { %839 = vmatmul.mubr.f32.gmra.mrb[116].mxu0 %v396_v9  ;;  %v190_v9 = vld [vmem:[%s3904_s1 + $0xd0] sm:$0xff] }
 0x12c   :  { %843 = vmatprep.mubr.f32.mxu0 %v401_v10  ;;  %v195_v10 = vld [vmem:[%s3904_s1 + $0xf8] sm:$0xff] }
 0x12d   :  { %v3437_v19 = vpop.f32.mrb[10].mxu1 }
 0x12e   :  { %v1027_v13 = vpop.f32.mrb[11].mxu1 }
 0x12f   :  { %844 = vmatmul.mubr.f32.gmra.mrb[118].mxu0 %v400_v12  ;;  %v199_v13 = vld [vmem:[%s3904_s1 + $0x118] sm:$0xff] }
 0x130   :  { %848 = vmatprep.mubr.f32.mxu0 %v405_v15 }
 0x131   :  { %v3445_v24 = vpop.f32.mrb[12].mxu1 }
 0x132   :  { %v1032_v21 = vpop.f32.mrb[13].mxu1 }
 0x133   :  { %849 = vmatmul.mubr.f32.gmra.mrb[120].mxu0 %v404_v17  ;;  %v194_v17 = vld [vmem:[%s3904_s1 + $0xf0] sm:$0xff] }
 0x134   :  { %853 = vmatprep.mubr.f32.mxu0 %v409_v18 }
 0x135   :  { %v3453_v29 = vpop.f32.mrb[14].mxu1 }
 0x136   :  { %v1037_v28 = vpop.f32.mrb[15].mxu1 }
 0x137   :  { %854 = vmatmul.mubr.f32.gmra.mrb[122].mxu0 %v408_v22 }
 0x138   :  { %858 = vmatprep.mubr.f32.mxu0 %v413_v23 }
 0x139   :  { %v3461_v34 = vpop.f32.mrb[16].mxu1 }
 0x13a   :  { %v1042_v32 = vpop.f32.mrb[17].mxu1 }
 0x13b   :  { %859 = vmatmul.mubr.f32.gmra.mrb[124].mxu0 %v412_v25 }
 0x13c   :  { %863 = vmatprep.mubr.f32.mxu0 %v417_v26 }
 0x13d   :  { %v3469_v37 = vpop.f32.mrb[18].mxu1 }
 0x13e   :  { %v1047_v38 = vpop.f32.mrb[19].mxu1 }
 0x13f   :  { %864 = vmatmul.mubr.f32.gmra.mrb[126].mxu0 %v416_v30  ;;  %v198_v30 = vld [vmem:[%s3904_s1 + $0x110] sm:$0xff] }
 0x140   :  { %933 = vmatprep.mubr.f32.mxu0 %v167_v31  ;;  %v203_v31 = vld [vmem:[%s3904_s1 + $0x138] sm:$0xff] }
 0x141   :  { %v3477_v42 = vpop.f32.mrb[20].mxu1 }
 0x142   :  { %v1052_v44 = vpop.f32.mrb[21].mxu1 }
 0x143   :  { %934 = vmatmul.mubr.f32.vlgmr.msra.gmra.mrb[0].mxu0 %v166_v35  ;;  %v207_v44 = vld [vmem:[%s3904_s1 + $0x158] sm:$0xff] }
 0x144   :  { %938 = vmatprep.mubr.f32.mxu0 %v171_v36 }
 0x145   :  { %v3488_v20 = vpop.f32.mrb[22].mxu1 }
 0x146   :  { %v1057_v50 = vpop.f32.mrb[23].mxu1 }
 0x147   :  { %939 = vmatmul.mubr.f32.gmra.mrb[2].mxu0 %v170_v40  ;;  %v202_v40 = vld [vmem:[%s3904_s1 + $0x130] sm:$0xff] }
 0x148   :  { %943 = vmatprep.mubr.f32.mxu0 %v175_v41  ;;  %v206_v50 = vld [vmem:[%s3904_s1 + $0x150] sm:$0xff] }
 0x149   :  { %v3497_v55 = vpop.f32.mrb[24].mxu1 }
 0x14a   :  { %v615_v14 = vpop.f32.mrb[26].mxu0  ;;  %v1062_v57 = vpop.f32.mrb[25].mxu1 }
 0x14b   :  { %v3486_v47 = vadd.f32 %v3397_v63, %v615_v14  ;;  %v617_v48 = vpop.f32.mrb[27].mxu0  ;;  %944 = vmatmul.mubr.f32.gmra.mrb[4].mxu0 %v174_v43  ;;  %v210_v57 = vld [vmem:[%s3904_s1 + $0x170] sm:$0xff] }
 0x14c   :  { %948 = vmatprep.mubr.f32.mxu0 %v179_v46 }
 0x14d   :  { %v3506_v39 = vpop.f32.mrb[26].mxu1 }
 0x14e   :  { %v620_v53 = vpop.f32.mrb[28].mxu0  ;;  %v1067_v63 = vpop.f32.mrb[27].mxu1 }
 0x14f   :  { %v1006_v54 = vadd.f32 %v3405_v4, %v620_v53  ;;  %v622_v27 = vpop.f32.mrb[29].mxu0  ;;  %949 = vmatmul.mubr.f32.gmra.mrb[6].mxu0 %v178_v49  ;;  %v211_v53 = vld [vmem:[%s3904_s1 + $0x178] sm:$0xff] }
 0x150   :  { %953 = vmatprep.mubr.f32.mxu0 %v183_v51 }
 0x151   :  { %v1463_v2 = vmax.f32 %v1006_v54, 0.0 }
 0x152   :  { %v625_v59 = vpop.f32.mrb[30].mxu0 }
 0x153   :  { %v1011_v60 = vadd.f32 %v3413_v8, %v625_v59  ;;  %v627_v61 = vpop.f32.mrb[31].mxu0  ;;  %954 = vmatmul.mubr.f32.gmra.mrb[8].mxu0 %v182_v56  ;;  %v3517_v8 = vpop.f32.mrb[28].mxu1 }
 0x154   :  { %958 = vmatprep.mubr.f32.mxu0 %v187_v33  ;;  %v1072_v58 = vpop.f32.mrb[29].mxu1  ;;  %v215_v61 = vld [vmem:[%s3904_s1 + $0x198] sm:$0xff] }
 0x155   :  { %v1464_v45 = vmax.f32 %v1011_v60, 0.0 }
 0x156   :  { %v630_v4 = vpop.f32.mrb[32].mxu0 }
 0x157   :  { %v3514_v5 = vpack.c.bf16 %v1464_v45, %v1463_v2  ;;  %v1016_v52 = vadd.f32 %v3421_v11, %v630_v4  ;;  %v632_v6 = vpop.f32.mrb[33].mxu0  ;;  %959 = vmatmul.mubr.f32.gmra.mrb[10].mxu0 %v186_v62  ;;  %v3526_v11 = vpop.f32.mrb[30].mxu1 }
 0x158   :  { %963 = vmatprep.mubr.f32.mxu0 %v191_v3  ;;  %v1077_v7 = vpop.f32.mrb[31].mxu1  ;;  %v214_v3 = vld [vmem:[%s3904_s1 + $0x190] sm:$0xff] }
 0x159   :  { %v1465_v18 = vmax.f32 %v1016_v52, 0.0  ;;  %v3535_v26 = vpop.f32.mrb[32].mxu1 }
 0x15a   :  { %v635_v12 = vpop.f32.mrb[34].mxu0  ;;  %v1082_v28 = vpop.f32.mrb[33].mxu1 }
 0x15b   :  { %v1021_v1 = vadd.f32 %v3429_v16, %v635_v12  ;;  %v637_v15 = vpop.f32.mrb[35].mxu0  ;;  %964 = vmatmul.mubr.f32.gmra.mrb[12].mxu0 %v190_v9 }
 0x15c   :  { %968 = vmatprep.mubr.f32.mxu0 %v195_v10 }
 0x15d   :  { %v1466_v22 = vmax.f32 %v1021_v1, 0.0 }
 0x15e   :  { %v640_v23 = vpop.f32.mrb[36].mxu0 }
 0x15f   :  { %v2175_v25 = vpack.c.bf16 %v1466_v22, %v1465_v18  ;;  %v1026_v16 = vadd.f32 %v3437_v19, %v640_v23  ;;  %v642_v21 = vpop.f32.mrb[37].mxu0  ;;  %969 = vmatmul.mubr.f32.gmra.mrb[14].mxu0 %v194_v17  ;;  %v3544_v19 = vpop.f32.mrb[34].mxu1 }
 0x160   :  { %973 = vmatprep.mubr.f32.mxu0 %v199_v13  ;;  %v1087_v38 = vpop.f32.mrb[35].mxu1 }
 0x161   :  { %2176 = vmatprep.subr.bf16.mxu1 %v2175_v25  ;;  %v1467_v41 = vmax.f32 %v1026_v16, 0.0  ;;  %v3555_v49 = vpop.f32.mrb[36].mxu1 }
 0x162   :  { %v645_v35 = vpop.f32.mrb[38].mxu0  ;;  %v1092_v51 = vpop.f32.mrb[37].mxu1 }
 0x163   :  { %v1031_v32 = vadd.f32 %v3445_v24, %v645_v35  ;;  %v647_v36 = vpop.f32.mrb[39].mxu0  ;;  %974 = vmatmul.mubr.f32.gmra.mrb[16].mxu0 %v198_v30 }
 0x164   :  { %978 = vmatprep.mubr.f32.mxu0 %v203_v31 }
 0x165   :  { %v1468_v43 = vmax.f32 %v1031_v32, 0.0 }
 0x166   :  { %v650_v46 = vpop.f32.mrb[40].mxu0 }
 0x167   :  { %v3552_v14 = vpack.c.bf16 %v1468_v43, %v1467_v41  ;;  %v1036_v24 = vadd.f32 %v3453_v29, %v650_v46  ;;  %v652_v48 = vpop.f32.mrb[41].mxu0  ;;  %979 = vmatmul.mubr.f32.gmra.mrb[18].mxu0 %v202_v40  ;;  %v3564_v29 = vpop.f32.mrb[38].mxu1 }
 0x168   :  { %983 = vmatprep.mubr.f32.mxu0 %v207_v44  ;;  %v1097_v33 = vpop.f32.mrb[39].mxu1 }
 0x169   :  { %v1469_v59 = vmax.f32 %v1036_v24, 0.0  ;;  %v3575_v45 = vpop.f32.mrb[40].mxu1 }
 0x16a   :  { %v655_v54 = vpop.f32.mrb[42].mxu0  ;;  %v1102_v4 = vpop.f32.mrb[41].mxu1 }
 0x16b   :  { %v1041_v27 = vadd.f32 %v3461_v34, %v655_v54  ;;  %v657_v56 = vpop.f32.mrb[43].mxu0  ;;  %984 = vmatmul.mubr.f32.gmra.mrb[20].mxu0 %v206_v50 }
 0x16c   :  { %988 = vmatprep.mubr.f32.mxu0 %v211_v53 }
 0x16d   :  { %v1470_v60 = vmax.f32 %v1041_v27, 0.0  ;;  %v3581_v58 = vpop.f32.mrb[42].mxu1 }
 0x16e   :  { %v660_v62 = vpop.f32.mrb[44].mxu0  ;;  %v1107_v10 = vpop.f32.mrb[43].mxu1 }
 0x16f   :  { %v3572_v63 = vpack.c.bf16 %v1470_v60, %v1469_v59  ;;  %v1046_v34 = vadd.f32 %v3469_v37, %v660_v62  ;;  %v662_v2 = vpop.f32.mrb[45].mxu0  ;;  %989 = vmatmul.mubr.f32.gmra.mrb[22].mxu0 %v210_v57 }
 0x170   :  { %993 = vmatprep.mubr.f32.mxu0 %v215_v61 }
 0x171   :  { %v1471_v12 = vmax.f32 %v1046_v34, 0.0  ;;  %v3586_v18 = vpop.f32.mrb[44].mxu1 }
 0x172   :  { %v665_v52 = vpop.f32.mrb[46].mxu0  ;;  %v1112_v22 = vpop.f32.mrb[45].mxu1 }
 0x173   :  { %v1051_v6 = vadd.f32 %v3477_v42, %v665_v52  ;;  %v667_v9 = vpop.f32.mrb[47].mxu0  ;;  %994 = vmatmul.mubr.f32.gmra.mrb[24].mxu0 %v214_v3 }
 0x175   :  { %v1472_v37 = vmax.f32 %v1051_v6, 0.0  ;;  %v3589_v25 = vpop.f32.mrb[46].mxu1 }
 0x176   :  { %v670_v1 = vpop.f32.mrb[48].mxu0  ;;  %v1117_v16 = vpop.f32.mrb[47].mxu1 }
 0x177   :  { %v3583_v15 = vpack.c.bf16 %v1472_v37, %v1471_v12  ;;  %v1056_v17 = vadd.f32 %v3488_v20, %v670_v1  ;;  %v672_v7 = vpop.f32.mrb[49].mxu0 }
 0x179   :  { %v1473_v21 = vmax.f32 %v1056_v17, 0.0  ;;  %v3594_v20 = vpop.f32.mrb[48].mxu1 }
 0x17a   :  { %v675_v13 = vpop.f32.mrb[50].mxu0  ;;  %v1122_v36 = vpop.f32.mrb[49].mxu1 }
 0x17b   :  { %v1061_v23 = vadd.f32 %v3497_v55, %v675_v13  ;;  %v677_v42 = vpop.f32.mrb[51].mxu0 }
 0x17d   :  { %v1474_v30 = vmax.f32 %v1061_v23, 0.0  ;;  %v3597_v55 = vpop.f32.mrb[50].mxu1 }
 0x17e   :  { %v680_v28 = vpop.f32.mrb[52].mxu0  ;;  %v1127_v43 = vpop.f32.mrb[51].mxu1 }
 0x17f   :  { %v3591_v31 = vpack.c.bf16 %v1474_v30, %v1473_v21  ;;  %v1066_v35 = vadd.f32 %v3506_v39, %v680_v28  ;;  %v682_v32 = vpop.f32.mrb[53].mxu0 }
 0x181   :  { %v1475_v44 = vmax.f32 %v1066_v35, 0.0  ;;  %v3602_v39 = vpop.f32.mrb[52].mxu1 }
 0x182   :  { %v685_v40 = vpop.f32.mrb[54].mxu0  ;;  %v1132_v53 = vpop.f32.mrb[53].mxu1 }
 0x183   :  { %v1071_v38 = vadd.f32 %v3517_v8, %v685_v40  ;;  %v687_v41 = vpop.f32.mrb[55].mxu0 }
 0x185   :  { %v1476_v46 = vmax.f32 %v1071_v38, 0.0  ;;  %v3605_v8 = vpop.f32.mrb[54].mxu1 }
 0x186   :  { %v690_v24 = vpop.f32.mrb[56].mxu0  ;;  %v1137_v57 = vpop.f32.mrb[55].mxu1 }
 0x187   :  { %v3599_v48 = vpack.c.bf16 %v1476_v46, %v1475_v44  ;;  %v1076_v50 = vadd.f32 %v3526_v11, %v690_v24  ;;  %v692_v51 = vpop.f32.mrb[57].mxu0 }
 0x189   :  { %v1477_v33 = vmax.f32 %v1076_v50, 0.0  ;;  %v3610_v11 = vpop.f32.mrb[56].mxu1 }
 0x18a   :  { %v695_v54 = vpop.f32.mrb[58].mxu0  ;;  %v1142_v2 = vpop.f32.mrb[57].mxu1 }
 0x18b   :  { %v1081_v27 = vadd.f32 %v3535_v26, %v695_v54  ;;  %v697_v56 = vpop.f32.mrb[59].mxu0 }
 0x18d   :  { %v1478_v59 = vmax.f32 %v1081_v27, 0.0  ;;  %v3613_v26 = vpop.f32.mrb[58].mxu1 }
 0x18e   :  { %v700_v60 = vpop.f32.mrb[60].mxu0  ;;  %v1147_v6 = vpop.f32.mrb[59].mxu1 }
 0x18f   :  { %v3607_v61 = vpack.c.bf16 %v1478_v59, %v1477_v33  ;;  %v1086_v62 = vadd.f32 %v3544_v19, %v700_v60  ;;  %v702_v34 = vpop.f32.mrb[61].mxu0 }
 0x191   :  { %v1479_v9 = vmax.f32 %v1086_v62, 0.0  ;;  %v3618_v19 = vpop.f32.mrb[60].mxu1 }
 0x192   :  { %v705_v3 = vpop.f32.mrb[62].mxu0  ;;  %v1152_v7 = vpop.f32.mrb[61].mxu1 }
 0x193   :  { %v1091_v4 = vadd.f32 %v3555_v49, %v705_v3  ;;  %v707_v52 = vpop.f32.mrb[63].mxu0 }
 0x195   :  { %v1480_v10 = vmax.f32 %v1091_v4, 0.0  ;;  %v3621_v49 = vpop.f32.mrb[62].mxu1 }
 0x196   :  { %v710_v12 = vpop.f32.mrb[64].mxu0  ;;  %v1157_v42 = vpop.f32.mrb[63].mxu1 }
 0x197   :  { %v3615_v37 = vpack.c.bf16 %v1480_v10, %v1479_v9  ;;  %v1096_v1 = vadd.f32 %v3564_v29, %v710_v12  ;;  %v712_v17 = vpop.f32.mrb[65].mxu0 }
 0x199   :  { %v1481_v16 = vmax.f32 %v1096_v1, 0.0  ;;  %v3626_v29 = vpop.f32.mrb[64].mxu1 }
 0x19a   :  { %v715_v22 = vpop.f32.mrb[66].mxu0  ;;  %v1162_v36 = vpop.f32.mrb[65].mxu1 }
 0x19b   :  { %v1101_v13 = vadd.f32 %v3575_v45, %v715_v22  ;;  %v717_v23 = vpop.f32.mrb[67].mxu0 }
 0x19d   :  { %v1482_v21 = vmax.f32 %v1101_v13, 0.0  ;;  %v3629_v45 = vpop.f32.mrb[66].mxu1 }
 0x19e   :  { %v720_v30 = vpop.f32.mrb[68].mxu0  ;;  %v1167_v43 = vpop.f32.mrb[67].mxu1 }
 0x19f   :  { %v3623_v28 = vpack.c.bf16 %v1482_v21, %v1481_v16  ;;  %v1106_v35 = vadd.f32 %v3581_v58, %v720_v30  ;;  %v722_v32 = vpop.f32.mrb[69].mxu0 }
 0x1a1   :  { %v1483_v44 = vmax.f32 %v1106_v35, 0.0  ;;  %v3634_v58 = vpop.f32.mrb[68].mxu1 }
 0x1a2   :  { %v725_v40 = vpop.f32.mrb[70].mxu0  ;;  %v1172_v54 = vpop.f32.mrb[69].mxu1 }
 0x1a3   :  { %v1111_v38 = vadd.f32 %v3586_v18, %v725_v40  ;;  %v727_v41 = vpop.f32.mrb[71].mxu0 }
 0x1a5   :  { %v1484_v46 = vmax.f32 %v1111_v38, 0.0  ;;  %v3637_v18 = vpop.f32.mrb[70].mxu1 }
 0x1a6   :  { %v730_v24 = vpop.f32.mrb[72].mxu0  ;;  %v1177_v33 = vpop.f32.mrb[71].mxu1 }
 0x1a7   :  { %v3631_v50 = vpack.c.bf16 %v1484_v46, %v1483_v44  ;;  %v1116_v51 = vadd.f32 %v3589_v25, %v730_v24  ;;  %v732_v53 = vpop.f32.mrb[73].mxu0 }
 0x1a9   :  { %v1485_v59 = vmax.f32 %v1116_v51, 0.0  ;;  %v3642_v25 = vpop.f32.mrb[72].mxu1 }
 0x1aa   :  { %v735_v27 = vpop.f32.mrb[74].mxu0  ;;  %v1182_v4 = vpop.f32.mrb[73].mxu1 }
 0x1ab   :  { %v1121_v56 = vadd.f32 %v3594_v20, %v735_v27  ;;  %v737_v57 = vpop.f32.mrb[75].mxu0 }
 0x1ad   :  { %v1486_v60 = vmax.f32 %v1121_v56, 0.0  ;;  %v3645_v20 = vpop.f32.mrb[74].mxu1 }
 0x1ae   :  { %v740_v62 = vpop.f32.mrb[76].mxu0  ;;  %v1187_v10 = vpop.f32.mrb[75].mxu1 }
 0x1af   :  { %v3639_v34 = vpack.c.bf16 %v1486_v60, %v1485_v59  ;;  %v1126_v2 = vadd.f32 %v3597_v55, %v740_v62  ;;  %v742_v3 = vpop.f32.mrb[77].mxu0  ;;  %v1513_v60 = vlaneseq }
 0x1b1   :  { %v1487_v12 = vmax.f32 %v1126_v2, 0.0  ;;  %v3650_v55 = vpop.f32.mrb[76].mxu1  ;;  %v3668_v2 = vshrl.u32 %v1513_v60, 7 }
 0x1b2   :  { %v745_v52 = vpop.f32.mrb[78].mxu0  ;;  %v1192_v23 = vpop.f32.mrb[77].mxu1 }
 0x1b3   :  { %v1131_v6 = vadd.f32 %v3602_v39, %v745_v52  ;;  %v747_v9 = vpop.f32.mrb[79].mxu0 }
 0x1b5   :  { %v1488_v1 = vmax.f32 %v1131_v6, 0.0  ;;  %v3653_v39 = vpop.f32.mrb[78].mxu1  ;;  %v1522_v6 = vsub.s32 1, %v3668_v2 }
 0x1b6   :  { %v750_v17 = vpop.f32.mrb[80].mxu0  ;;  %v1197_v30 = vpop.f32.mrb[79].mxu1 }
 0x1b7   :  { %v3647_v7 = vpack.c.bf16 %v1488_v1, %v1487_v12  ;;  %v1136_v22 = vadd.f32 %v3605_v8, %v750_v17  ;;  %v752_v13 = vpop.f32.mrb[81].mxu0  ;;  %v1518_v12 = vsub.s32 0, %v3668_v2 }
 0x1b9   :  { %v1489_v35 = vmax.f32 %v1136_v22, 0.0  ;;  %v3658_v8 = vpop.f32.mrb[80].mxu1 }
 0x1ba   :  { %v755_v42 = vpop.f32.mrb[82].mxu0  ;;  %v1202_v43 = vpop.f32.mrb[81].mxu1 }
 0x1bb   :  { %v1141_v16 = vadd.f32 %v3610_v11, %v755_v42  ;;  %v757_v21 = vpop.f32.mrb[83].mxu0 }
 0x1bc   :  { %v2405_v21 = vmov 1.0  }
 0x1bd   :  { %v1490_v32 = vmax.f32 %v1141_v16, 0.0  ;;  %v3661_v11 = vpop.f32.mrb[82].mxu1 }
 0x1be   :  { %v760_v36 = vpop.f32.mrb[84].mxu0  ;;  %v1207_v51 = vpop.f32.mrb[83].mxu1 }
 0x1bf   :  { %v3655_v40 = vpack.c.bf16 %v1490_v32, %v1489_v35  ;;  %v1146_v38 = vadd.f32 %v3613_v26, %v760_v36  ;;  %v762_v41 = vpop.f32.mrb[85].mxu0 }
 0x1c1   :  { %v1491_v53 = vmax.f32 %v1146_v38, 0.0  ;;  %v3666_v26 = vpop.f32.mrb[84].mxu1 }
 0x1c2   :  { %v765_v44 = vpop.f32.mrb[86].mxu0  ;;  %v1212_v59 = vpop.f32.mrb[85].mxu1 }
 0x1c3   :  { %v1151_v46 = vadd.f32 %v3618_v19, %v765_v44  ;;  %v767_v24 = vpop.f32.mrb[87].mxu0 }
 0x1c5   :  { %v1492_v54 = vmax.f32 %v1151_v46, 0.0  ;;  %v3671_v4 = vpop.f32.mrb[86].mxu1 }
 0x1c6   :  { %v770_v27 = vpop.f32.mrb[88].mxu0  ;;  %v1217_v52 = vpop.f32.mrb[87].mxu1 }
 0x1c7   :  { %v3663_v56 = vpack.c.bf16 %v1492_v54, %v1491_v53  ;;  %v1156_v57 = vadd.f32 %v3621_v49, %v770_v27  ;;  %v772_v33 = vpop.f32.mrb[89].mxu0  ;;  %v3677_v49 = vld [vmem:[%s3905_s0] sm:$0xf] }
 0x1c8   :  { %v1523_v17 = vrot.slane %v3677_v49, %v1522_v6  ;;  %v3687_v42 = vrot.slane %v3677_v49, %v1518_v12 }
 0x1c9   :  { %v1493_v9 = vmax.f32 %v1156_v57, 0.0  ;;  %v3684_v23 = vpop.f32.mrb[88].mxu1 }
 0x1ca   :  { %v775_v62 = vpop.f32.mrb[90].mxu0  ;;  %v1222_v16 = vpop.f32.mrb[89].mxu1  ;;  %vm1533_vm0 = vcmp.eq.s32.totalorder %v3668_v2, %v1523_v17  ;;  %vm1532_vm1 = vcmp.eq.s32.totalorder %v3668_v2, %v3687_v42  ;;  %v1699_v42 = vld [vmem:[%s3906_s3 + $0x48] sm:$0xff] }
 0x1cb   :  { %v1161_v19 = vadd.f32 %v3626_v29, %v775_v62  ;;  %v777_v3 = vpop.f32.mrb[91].mxu0  ;;  %1899 = vmatprep.mubr.msk.f32.mxu1 %vm1533_vm0, %v2405_v21 }
 0x1cd   :  { %v1494_v10 = vmax.f32 %v1161_v19, 0.0 }
 0x1ce   :  { %v780_v1 = vpop.f32.mrb[92].mxu0 }
 0x1cf   :  { %v3681_v22 = vpack.c.bf16 %v1494_v10, %v1493_v9  ;;  %v1166_v29 = vadd.f32 %v3629_v45, %v780_v1  ;;  %v782_v13 = vpop.f32.mrb[93].mxu0  ;;  %v3694_v45 = vpop.f32.mrb[90].mxu1 }
 0x1d0   :  { %v1227_v36 = vpop.f32.mrb[91].mxu1 }
 0x1d1   :  { %v1495_v38 = vmax.f32 %v1166_v29, 0.0  ;;  %v1230_v51 = vpop.f32.mrb[92].mxu1 }
 0x1d2   :  { %v785_v30 = vpop.f32.mrb[94].mxu0  ;;  %v1232_v53 = vpop.f32.mrb[93].mxu1 }
 0x1d3   :  { %v1171_v35 = vadd.f32 %v3634_v58, %v785_v30  ;;  %v787_v32 = vpop.f32.mrb[95].mxu0 }
 0x1d5   :  { %v1496_v41 = vmax.f32 %v1171_v35, 0.0  ;;  %v3700_v33 = vpop.f32.mrb[94].mxu1 }
 0x1d6   :  { %v790_v43 = vpop.f32.mrb[96].mxu0  ;;  %v1237_v58 = vpop.f32.mrb[95].mxu1 }
 0x1d7   :  { %v3696_v44 = vpack.c.bf16 %v1496_v41, %v1495_v38  ;;  %v1176_v46 = vadd.f32 %v3637_v18, %v790_v43  ;;  %v792_v24 = vpop.f32.mrb[97].mxu0  ;;  %v1530_v43 = vsub.s32 3, %v3668_v2 }
 0x1d8   :  { %v1526_v24 = vsub.s32 2, %v3668_v2 }
 0x1d9   :  { %v1497_v59 = vmax.f32 %v1176_v46, 0.0  ;;  %v1240_v6 = vpop.f32.mrb[96].mxu1 }
 0x1da   :  { %v795_v54 = vpop.f32.mrb[98].mxu0  ;;  %v1242_v18 = vpop.f32.mrb[97].mxu1  ;;  %v3719_v58 = vrot.slane %v3677_v49, %v1526_v24 }
 0x1db   :  { %v1181_v27 = vadd.f32 %v3642_v25, %v795_v54  ;;  %v797_v57 = vpop.f32.mrb[99].mxu0  ;;  %v3713_v54 = vrot.slane %v3677_v49, %v1530_v43 }
 0x1dc   :  { %vm1534_vm3 = vcmp.eq.s32.totalorder %v3668_v2, %v3719_v58 }
 0x1dd   :  { %v1498_v60 = vmax.f32 %v1181_v27, 0.0  ;;  %v1245_v1 = vpop.f32.mrb[98].mxu1  ;;  %vm1535_vm2 = vcmp.eq.s32.totalorder %v3668_v2, %v3713_v54  ;;  %v1702_v54 = vld [vmem:[%s3906_s3 + $0x60] sm:$0xff] }
 0x1de   :  { %v800_v62 = vpop.f32.mrb[100].mxu0  ;;  %v1247_v25 = vpop.f32.mrb[99].mxu1 }
 0x1df   :  { %v3702_v19 = vpack.c.bf16 %v1498_v60, %v1497_v59  ;;  %v1186_v3 = vadd.f32 %v3645_v20, %v800_v62  ;;  %v802_v52 = vpop.f32.mrb[101].mxu0 }
 0x1e1   :  { %v1499_v17 = vmax.f32 %v1186_v3, 0.0  ;;  %v1250_v32 = vpop.f32.mrb[100].mxu1 }
 0x1e2   :  { %v805_v9 = vpop.f32.mrb[102].mxu0  ;;  %v1252_v36 = vpop.f32.mrb[101].mxu1 }
 0x1e3   :  { %v1191_v10 = vadd.f32 %v3650_v55, %v805_v9  ;;  %v807_v12 = vpop.f32.mrb[103].mxu0 }
 0x1e5   :  { %v1500_v29 = vmax.f32 %v1191_v10, 0.0 }
 0x1e6   :  { %v810_v13 = vpop.f32.mrb[104].mxu0 }
 0x1e7   :  { %v3706_v16 = vpack.c.bf16 %v1500_v29, %v1499_v17  ;;  %v1196_v30 = vadd.f32 %v3653_v39, %v810_v13  ;;  %v812_v35 = vpop.f32.mrb[105].mxu0 }
 0x1e9   :  { %v1501_v55 = vmax.f32 %v1196_v30, 0.0 }
 0x1ea   :  { %v815_v20 = vpop.f32.mrb[106].mxu0 }
 0x1eb   :  { %v1201_v38 = vadd.f32 %v3658_v8, %v815_v20  ;;  %v817_v41 = vpop.f32.mrb[107].mxu0 }
 0x1ed   :  { %v1502_v46 = vmax.f32 %v1201_v38, 0.0 }
 0x1ee   :  { %v820_v53 = vpop.f32.mrb[108].mxu0 }
 0x1ef   :  { %v3715_v27 = vpack.c.bf16 %v1502_v46, %v1501_v55  ;;  %v1206_v39 = vadd.f32 %v3661_v11, %v820_v53  ;;  %v822_v57 = vpop.f32.mrb[109].mxu0 }
 0x1f1   :  { %v1503_v62 = vmax.f32 %v1206_v39, 0.0 }
 0x1f2   :  { %v825_v8 = vpop.f32.mrb[110].mxu0 }
 0x1f3   :  { %v1211_v59 = vadd.f32 %v3666_v26, %v825_v8  ;;  %v827_v60 = vpop.f32.mrb[111].mxu0 }
 0x1f5   :  { %v1504_v3 = vmax.f32 %v1211_v59, 0.0 }
 0x1f6   :  { %v830_v52 = vpop.f32.mrb[112].mxu0 }
 0x1f7   :  { %v3726_v18 = vpack.c.bf16 %v1504_v3, %v1503_v62  ;;  %v1216_v11 = vadd.f32 %v3671_v4, %v830_v52  ;;  %v832_v9 = vpop.f32.mrb[113].mxu0 }
 0x1f9   :  { %v1505_v25 = vmax.f32 %v1216_v11, 0.0 }
 0x1fa   :  { %v835_v49 = vpop.f32.mrb[114].mxu0 }
 0x1fb   :  { %v1221_v10 = vadd.f32 %v3684_v23, %v835_v49  ;;  %v837_v12 = vpop.f32.mrb[115].mxu0 }
 0x1fd   :  { %v1506_v17 = vmax.f32 %v1221_v10, 0.0 }
 0x1fe   :  { %v840_v29 = vpop.f32.mrb[116].mxu0 }
 0x1ff   :  { %v3730_v13 = vpack.c.bf16 %v1506_v17, %v1505_v25  ;;  %v1226_v26 = vadd.f32 %v3694_v45, %v840_v29  ;;  %v842_v30 = vpop.f32.mrb[117].mxu0 }
 0x201   :  { %v1507_v38 = vmax.f32 %v1226_v26, 0.0 }
 0x202   :  { %v845_v35 = vpop.f32.mrb[118].mxu0 }
 0x203   :  { %v1231_v36 = vadd.f32 %v1230_v51, %v845_v35  ;;  %v847_v20 = vpop.f32.mrb[119].mxu0 }
 0x205   :  { %v1508_v41 = vmax.f32 %v1231_v36, 0.0 }
 0x206   :  { %v850_v43 = vpop.f32.mrb[120].mxu0 }
 0x207   :  { %v3733_v4 = vpack.c.bf16 %v1508_v41, %v1507_v38  ;;  %v1236_v55 = vadd.f32 %v3700_v33, %v850_v43  ;;  %v852_v23 = vpop.f32.mrb[121].mxu0 }
 0x209   :  { %v1509_v39 = vmax.f32 %v1236_v55, 0.0 }
 0x20a   :  { %v855_v46 = vpop.f32.mrb[122].mxu0 }
 0x20b   :  { %v1241_v24 = vadd.f32 %v1240_v6, %v855_v46  ;;  %v857_v53 = vpop.f32.mrb[123].mxu0 }
 0x20d   :  { %v1510_v57 = vmax.f32 %v1241_v24, 0.0 }
 0x20e   :  { %v860_v8 = vpop.f32.mrb[124].mxu0 }
 0x20f   :  { %v3736_v59 = vpack.c.bf16 %v1510_v57, %v1509_v39  ;;  %v1246_v45 = vadd.f32 %v1245_v1, %v860_v8  ;;  %v862_v60 = vpop.f32.mrb[125].mxu0 }
 0x211   :  { %v1511_v52 = vmax.f32 %v1246_v45, 0.0 }
 0x212   :  { %v865_v51 = vpop.f32.mrb[126].mxu0 }
 0x213   :  { %v1251_v62 = vadd.f32 %v1250_v32, %v865_v51  ;;  %v867_v3 = vpop.f32.mrb[127].mxu0 }
 0x215   :  { %v1512_v11 = vmax.f32 %v1251_v62, 0.0 }
 0x216   :  { %v935_v9 = vpop.f32.mrb[0].mxu0 }
 0x217   :  { %v3738_v49 = vpack.c.bf16 %v1512_v11, %v1511_v52  ;;  %v937_v33 = vpop.f32.mrb[1].mxu0  ;;  %v1449_v12 = vmax.f32 %v935_v9, 0.0 }
 0x21a   :  { %v940_v10 = vpop.f32.mrb[2].mxu0 }
 0x21b   :  { %v1450_v6 = vmax.f32 %v940_v10, 0.0  ;;  %v942_v25 = vpop.f32.mrb[3].mxu0 }
 0x21d   :  { %v2177_v17 = vpack.c.bf16 %v1450_v6, %v1449_v12 }
 0x21e   :  { %v945_v29 = vpop.f32.mrb[4].mxu0 }
 0x21f   :  { %v947_v26 = vpop.f32.mrb[5].mxu0  ;;  %2178 = vmatpush3.bf16.msra.mxu1 %v2177_v17  ;;  %v1451_v30 = vmax.f32 %v945_v29, 0.0  ;;  %v1462_v29 = vmax.f32 %v3486_v47, 0.0  ;;  %v1690_v47 = vld [vmem:[%s3906_s3] sm:$0xff] }
 0x220   :  { %2180 = vmatprep.subr.bf16.mxu1 %v3552_v14 }
 0x222   :  { %v950_v1 = vpop.f32.mrb[6].mxu0 }
 0x223   :  { %v1452_v32 = vmax.f32 %v950_v1, 0.0  ;;  %v952_v35 = vpop.f32.mrb[7].mxu0 }
 0x225   :  { %v2181_v36 = vpack.c.bf16 %v1452_v32, %v1451_v30 }
 0x226   :  { %v955_v20 = vpop.f32.mrb[8].mxu0 }
 0x227   :  { %v957_v38 = vpop.f32.mrb[9].mxu0  ;;  %2182 = vmatpush3.bf16.msra.mxu1 %v2181_v36  ;;  %v1453_v43 = vmax.f32 %v955_v20, 0.0  ;;  %v1784_v36 = vld [vmem:[%s3907_s5] sm:$0xff]  ;;  %v1785_v20 = vld [vmem:[%s3907_s5 + $0x8] sm:$0xff] }
 0x228   :  { %2184 = vmatprep.subr.bf16.mxu1 %v3572_v63 }
 0x22a   :  { %v960_v41 = vpop.f32.mrb[10].mxu0 }
 0x22b   :  { %v1454_v55 = vmax.f32 %v960_v41, 0.0  ;;  %v962_v23 = vpop.f32.mrb[11].mxu0 }
 0x22c   :  { %v1786_v23 = vld [vmem:[%s3907_s5 + $0x10] sm:$0xff] }
 0x22d   :  { %v2185_v46 = vpack.c.bf16 %v1454_v55, %v1453_v43  ;;  %v2264_v43 = vpack.c.bf16 %v1785_v20, %v1784_v36 }
 0x22e   :  { %v965_v24 = vpop.f32.mrb[12].mxu0 }
 0x22f   :  { %v967_v53 = vpop.f32.mrb[13].mxu0  ;;  %2186 = vmatpush3.bf16.msra.mxu1 %v2185_v46  ;;  %v1455_v39 = vmax.f32 %v965_v24, 0.0  ;;  %v1787_v46 = vld [vmem:[%s3907_s5 + $0x18] sm:$0xff] }
 0x230   :  { %2188 = vmatprep.subr.bf16.mxu1 %v3583_v15  ;;  %v2267_v24 = vpack.c.bf16 %v1787_v46, %v1786_v23  ;;  %v1788_v53 = vld [vmem:[%s3907_s5 + $0x20] sm:$0xff] }
 0x232   :  { %v970_v14 = vpop.f32.mrb[14].mxu0 }
 0x233   :  { %v1456_v57 = vmax.f32 %v970_v14, 0.0  ;;  %v972_v8 = vpop.f32.mrb[15].mxu0  ;;  %v1789_v14 = vld [vmem:[%s3907_s5 + $0x28] sm:$0xff] }
 0x234   :  { %v1791_v8 = vld [vmem:[%s3907_s5 + $0x38] sm:$0xff] }
 0x235   :  { %v2189_v45 = vpack.c.bf16 %v1456_v57, %v1455_v39  ;;  %v2270_v39 = vpack.c.bf16 %v1789_v14, %v1788_v53  ;;  %v1790_v57 = vld [vmem:[%s3907_s5 + $0x30] sm:$0xff] }
 0x236   :  { %v975_v60 = vpop.f32.mrb[16].mxu0 }
 0x237   :  { %v977_v51 = vpop.f32.mrb[17].mxu0  ;;  %2190 = vmatpush3.bf16.msra.mxu1 %v2189_v45  ;;  %v1457_v62 = vmax.f32 %v975_v60, 0.0  ;;  %v2273_v45 = vpack.c.bf16 %v1791_v8, %v1790_v57  ;;  %v1792_v60 = vld [vmem:[%s3907_s5 + $0x40] sm:$0xff] }
 0x238   :  { %2192 = vmatprep.subr.bf16.mxu1 %v3591_v31  ;;  %v1793_v51 = vld [vmem:[%s3907_s5 + $0x48] sm:$0xff] }
 0x23a   :  { %v980_v63 = vpop.f32.mrb[18].mxu0 }
 0x23b   :  { %v1458_v3 = vmax.f32 %v980_v63, 0.0  ;;  %v982_v52 = vpop.f32.mrb[19].mxu0  ;;  %v2276_v63 = vpack.c.bf16 %v1793_v51, %v1792_v60 }
 0x23d   :  { %v2193_v11 = vpack.c.bf16 %v1458_v3, %v1457_v62  ;;  %v1794_v62 = vld [vmem:[%s3907_s5 + $0x50] sm:$0xff]  ;;  %v1795_v3 = vld [vmem:[%s3907_s5 + $0x58] sm:$0xff] }
 0x23e   :  { %v985_v9 = vpop.f32.mrb[20].mxu0  ;;  %v2279_v52 = vpack.c.bf16 %v1795_v3, %v1794_v62 }
 0x23f   :  { %v987_v33 = vpop.f32.mrb[21].mxu0  ;;  %2194 = vmatpush3.bf16.msra.mxu1 %v2193_v11  ;;  %v1459_v10 = vmax.f32 %v985_v9, 0.0  ;;  %v1796_v11 = vld [vmem:[%s3907_s5 + $0x60] sm:$0xff]  ;;  %v1797_v9 = vld [vmem:[%s3907_s5 + $0x68] sm:$0xff] }
 0x240   :  { %2196 = vmatprep.subr.bf16.mxu1 %v3599_v48  ;;  %v2282_v33 = vpack.c.bf16 %v1797_v9, %v1796_v11 }
 0x242   :  { %v990_v15 = vpop.f32.mrb[22].mxu0 }
 0x243   :  { %v1460_v12 = vmax.f32 %v990_v15, 0.0  ;;  %v992_v6 = vpop.f32.mrb[23].mxu0  ;;  %v1798_v15 = vld [vmem:[%s3907_s5 + $0x70] sm:$0xff] }
 0x244   :  { %v1903_v6 = vld [vmem:[%s3908_s4] ss:$0 sm:$0xff] }
 0x245   :  { %v2197_v25 = vpack.c.bf16 %v1460_v12, %v1459_v10  ;;  %v1799_v10 = vld [vmem:[%s3907_s5 + $0x78] sm:$0xff] }
 0x246   :  { %v995_v17 = vpop.f32.mrb[24].mxu0  ;;  %v2285_v12 = vpack.c.bf16 %v1799_v10, %v1798_v15 }
 0x247   :  { %v1461_v26 = vmax.f32 %v995_v17, 0.0  ;;  %v997_v31 = vpop.f32.mrb[25].mxu0  ;;  %2198 = vmatpush3.bf16.msra.mxu1 %v2197_v25 }
 0x248   :  { %2200 = vmatprep.subr.bf16.mxu1 %v3607_v61  ;;  %v1692_v61 = vld [vmem:[%s3906_s3 + $0x10] sm:$0xff] }
 0x249   :  { %v2201_v1 = vpack.c.bf16 %v1462_v29, %v1461_v26 }
 0x24b   :  { %2202 = vmatpush3.bf16.msra.mxu1 %v2201_v1 }
 0x24c   :  { %2204 = vmatprep.subr.bf16.mxu1 %v3615_v37  ;;  %v1693_v37 = vld [vmem:[%s3906_s3 + $0x18] sm:$0xff] }
 0x24f   :  { %2206 = vmatpush3.bf16.msra.mxu1 %v3514_v5  ;;  %v1691_v5 = vld [vmem:[%s3906_s3 + $0x8] sm:$0xff] }
 0x250   :  { %2208 = vmatprep.subr.bf16.mxu1 %v3702_v19  ;;  %v2240_v48 = vpack.c.bf16 %v1691_v5, %v1690_v47  ;;  %v1701_v19 = vld [vmem:[%s3906_s3 + $0x58] sm:$0xff] }
 0x252   :  { %1900 = vmatmul.mubr.msk.f32.vlgmr.msra.gmra.mrb[102].mxu1 %vm1532_vm1, %v2405_v21 }
 0x253   :  { %2210 = vmatpush3.bf16.msra.mxu1 %v3623_v28  ;;  %1901 = vmatprep.mubr.msk.f32.mxu1 %vm1535_vm2, %v2405_v21  ;;  %v2243_v28 = vpack.c.bf16 %v1693_v37, %v1692_v61 }
 0x254   :  { %2212 = vmatprep.subr.bf16.mxu1 %v3706_v16 }
 0x257   :  { %2214 = vmatpush3.bf16.msra.mxu1 %v3631_v50  ;;  %v1694_v50 = vld [vmem:[%s3906_s3 + $0x20] sm:$0xff] }
 0x258   :  { %2216 = vmatprep.subr.bf16.mxu1 %v3715_v27  ;;  %v1703_v27 = vld [vmem:[%s3906_s3 + $0x68] sm:$0xff] }
 0x259   :  { %v2258_v58 = vpack.c.bf16 %v1703_v27, %v1702_v54 }
 0x25b   :  { %2218 = vmatpush3.bf16.msra.mxu1 %v3639_v34  ;;  %v1695_v34 = vld [vmem:[%s3906_s3 + $0x28] sm:$0xff] }
 0x25c   :  { %2220 = vmatprep.subr.bf16.mxu1 %v3726_v18  ;;  %v1704_v18 = vld [vmem:[%s3906_s3 + $0x70] sm:$0xff] }
 0x25f   :  { %2222 = vmatpush3.bf16.msra.mxu1 %v3647_v7  ;;  %v2246_v7 = vpack.c.bf16 %v1695_v34, %v1694_v50 }
 0x260   :  { %2224 = vmatprep.subr.bf16.mxu1 %v3730_v13  ;;  %v1705_v13 = vld [vmem:[%s3906_s3 + $0x78] sm:$0xff] }
 0x263   :  { %2226 = vmatpush3.bf16.msra.mxu1 %v3655_v40  ;;  %v1696_v40 = vld [vmem:[%s3906_s3 + $0x30] sm:$0xff] }
 0x264   :  { %2228 = vmatprep.subr.bf16.mxu1 %v3733_v4  ;;  %v2261_v4 = vpack.c.bf16 %v1705_v13, %v1704_v18 }
 0x267   :  { %2230 = vmatpush3.bf16.msra.mxu1 %v3663_v56  ;;  %v1697_v56 = vld [vmem:[%s3906_s3 + $0x38] sm:$0xff] }
 0x268   :  { %2232 = vmatprep.subr.bf16.mxu1 %v3736_v59  ;;  %v2249_v2 = vpack.c.bf16 %v1697_v56, %v1696_v40  ;;  %v2407_v59 = vmov 0.0  }
 0x26b   :  { %2234 = vmatpush3.bf16.msra.mxu1 %v3681_v22  ;;  %v1698_v22 = vld [vmem:[%s3906_s3 + $0x40] sm:$0xff] }
 0x26c   :  { %2236 = vmatprep.subr.bf16.mxu1 %v3738_v49 }
 0x26f   :  { %2238 = vmatpush3.bf16.msra.mxu1 %v3696_v44  ;;  %v1700_v44 = vld [vmem:[%s3906_s3 + $0x50] sm:$0xff] }
 0x270   :  { %2239 = vmatprep.subr.bf16.mxu1 %v2404_v0  ;;  %v2255_v16 = vpack.c.bf16 %v1701_v19, %v1700_v44 }
 0x272   :  { %1902 = vmatmul.mubr.msk.f32.vlgmr.msra.gmra.mrb[104].mxu1 %vm1534_vm3, %v2405_v21  ;;  %v2252_v21 = vpack.c.bf16 %v1699_v42, %v1698_v22 }
 0x273   :  { %2241 = vmatpush3.bf16.msra.mxu1 %v2240_v48  ;;  %2041 = vmatprep.mubr.msk.f32.mxu1 %vm2406_vm4, %v2407_v59 }
 0x274   :  { %2242 = vmatprep.subr.bf16.mxu1 %v2404_v0 }
 0x277   :  { %2244 = vmatpush3.bf16.msra.mxu1 %v2243_v28 }
 0x278   :  { %2245 = vmatprep.subr.bf16.mxu1 %v2404_v0 }
 0x27b   :  { %2247 = vmatpush3.bf16.msra.mxu1 %v2246_v7 }
 0x27c   :  { %2248 = vmatprep.subr.bf16.mxu1 %v2404_v0 }
 0x27f   :  { %2250 = vmatpush3.bf16.msra.mxu1 %v2249_v2 }
 0x280   :  { %2251 = vmatprep.subr.bf16.mxu1 %v2404_v0 }
 0x283   :  { %2253 = vmatpush3.bf16.msra.mxu1 %v2252_v21 }
 0x284   :  { %2254 = vmatprep.subr.bf16.mxu1 %v2404_v0 }
 0x287   :  { %2256 = vmatpush3.bf16.msra.mxu1 %v2255_v16 }
 0x288   :  { %2257 = vmatprep.subr.bf16.mxu1 %v2404_v0 }
 0x28b   :  { %2259 = vmatpush3.bf16.msra.mxu1 %v2258_v58 }
 0x28c   :  { %2260 = vmatprep.subr.bf16.mxu1 %v2404_v0 }
 0x28f   :  { %2262 = vmatpush3.bf16.msra.mxu1 %v2261_v4 }
 0x290   :  { %2263 = vmatprep.subr.bf16.mxu1 %v2404_v0 }
 0x325   :  { %v1937_v49 = vpop.f32.mrb[102].mxu1 }
 0x326   :  { %v1938_v30 = vpop.f32.mrb[103].mxu1 }
 0x327   :  { %v1939_v32 = vadd.f32 %v1938_v30, %v1937_v49 }
 0x345   :  { %v1972_v35 = vpop.f32.mrb[104].mxu1 }
 0x346   :  { %v1973_v38 = vpop.f32.mrb[105].mxu1 }
 0x347   :  { %v1974_v41 = vadd.f32 %v1973_v38, %v1972_v35 }
 0x349   :  { %v1682_v55 = vadd.f32 %v1974_v41, %v1939_v32 }
 0x34b   :  { %2042 = vmatmul.mubr.f32.vlgmr.msra.gmra.mrb[106].mxu1 %v1682_v55 }
 0x34c   :  { %2265 = vmatpush3.bf16.msra.mxu1 %v2264_v43  ;;  %2076 = vmatprep.mubr.msk.f32.mxu1 %vm2406_vm4, %v2407_v59 }
 0x34d   :  { %2266 = vmatprep.subr.bf16.mxu1 %v2404_v0 }
 0x350   :  { %2268 = vmatpush3.bf16.msra.mxu1 %v2267_v24 }
 0x351   :  { %2269 = vmatprep.subr.bf16.mxu1 %v2404_v0 }
 0x354   :  { %2271 = vmatpush3.bf16.msra.mxu1 %v2270_v39 }
 0x355   :  { %2272 = vmatprep.subr.bf16.mxu1 %v2404_v0 }
 0x358   :  { %2274 = vmatpush3.bf16.msra.mxu1 %v2273_v45 }
 0x359   :  { %2275 = vmatprep.subr.bf16.mxu1 %v2404_v0 }
 0x35c   :  { %2277 = vmatpush3.bf16.msra.mxu1 %v2276_v63 }
 0x35d   :  { %2278 = vmatprep.subr.bf16.mxu1 %v2404_v0 }
 0x360   :  { %2280 = vmatpush3.bf16.msra.mxu1 %v2279_v52 }
 0x361   :  { %2281 = vmatprep.subr.bf16.mxu1 %v2404_v0 }
 0x364   :  { %2283 = vmatpush3.bf16.msra.mxu1 %v2282_v33 }
 0x365   :  { %2284 = vmatprep.subr.bf16.mxu1 %v2404_v0  ;;  %v1904_v0 = vld [vmem:[%s3909_s6] ss:$0 sm:$0xff] }
 0x368   :  { %2286 = vmatpush3.bf16.msra.mxu1 %v2285_v12 }
 0x41e   :  { %v1779_v25 = vpop.f32.mrb[106].mxu1 }
 0x41f   :  { %v1780_v17 = vadd.f32 %v1903_v6, %v1779_v25  ;;  %v2043_v29 = vpop.f32.mrb[107].mxu1 }
 0x421   :  { %v1783_v26 = vmax.f32 %v1780_v17, 0.0 }
 0x423   :  { %2077 = vmatmul.mubr.f32.vlgmr.msra.gmra.mrb[108].mxu1 %v1783_v26 }
 0x4f6   :  { %v1873_v31 = vpop.f32.mrb[108].mxu1 }
 0x4f7   :  { %v1874_v1 = vadd.f32 %v1904_v0, %v1873_v31  ;;  %v2078_v47 = vpop.f32.mrb[109].mxu1 }
 0x4f9   :  { %v1878_v5 = vsel %vm1877_vm5, %v1874_v1, -inf }
 0x4fa   :  { %1879 = vmax.xlane.f32.xlu0 %v1878_v5 }
 0x587   :  { %v1880_v48 = vpop.xlane.xlu0 %1879 }
 0x588   :  { %v1881_v61 = vsub.f32 %v1874_v1, %v1880_v48 }
 0x58a   :  { %v1882_v37 = vmul.f32 1.442695, %v1881_v61 }
 0x58c   :  { %2400 = vpow2.f32 %v1882_v37 }
 0x596   :  { %v2401_v28 = vpop.eup %2400 }
 0x597   :  { %v1884_v50 = vsel %vm1877_vm5, %v2401_v28, 0.0 }
 0x598   :  { %1885 = vadd.xlane.f32.xlu0 %v1884_v50 }
 0x625   :  { %v1886_v34 = vpop.xlane.xlu0 %1885 }
 0x626   :  { %2402 = vlog2.f32 %v1886_v34 }
 0x630   :  { %v2403_v7 = vpop.eup %2402 }
 0x631   :  { %v1888_v40 = vmul.f32 0.6931472, %v2403_v7 }
 0x633   :  { %v1889_v56 = vsub.f32 %v1881_v61, %v1888_v40 }
 0x635   :  { %1890 = vst.msk [vmem:[%s3910_s7] sm:$0xff] %vm1877_vm5, %v1889_v56 }

</bundles_post_ra>
